<compile_context>
chip_gen: v6e
topology: v6e:2x2x1
jax: 0.10.0
libtpu: 0.0.40
codegen_flags: <defaults>
</compile_context>

<pallas_src>
import jax
import jax.numpy as jnp
from jax import lax
from jax.experimental import pallas as pl
from jax.experimental.pallas import tpu as pltpu

EPS = 1e-5
_VMEM_CAP_BYTES = 100 * 1024 * 1024  # below v5e/v6e physical VMEM; on v7x (64 MiB/TC)
                                     # pick num_out_tiles=2 / smaller tile_k instead.


def _num_tensorcores():
    """Best-effort TensorCore count of device 0 (2 on v7x, 1 on v5e/v6e).

    Used to pick how many output-channel tiles the 'parallel' grid axis gets so v7x's
    second core is not idle, while single-core chips see zero recompute."""
    try:
        n = getattr(jax.devices()[0], "num_cores", None)
        return max(1, int(n)) if n else 1
    except Exception:
        return 1


def _fc_res_kernel(x_ref, w0_ref, b0_ref,
                   w1_ref, g1_ref, be1_ref,
                   w2_ref, g2_ref, be2_ref,
                   o_ref,
                   h_f32):
    j = pl.program_id(0)                      # output-channel tile ("parallel")
    k = pl.program_id(1)                      # hidden-channel tile ("arbitrary", innermost)
    num_k = pl.num_programs(1)
    n = x_ref.shape[0]
    inv_n = 1.0 / n                           # static Python float

    # --- ch_align: h = x @ W0 + b0.  Computed at the first k step of each j tile; with
    # num_out_tiles == #TensorCores this is exactly once per core (megacore-safe). -----
    @pl.when(k == 0)
    def _compute_h():
        h_f32[...] = (jnp.dot(x_ref[...], w0_ref[...],
                              preferred_element_type=jnp.float32) + b0_ref[...])

    # --- feat Linear1 for this hidden tile (bias cancelled by training-mode BN). ------
    # Single f32 copy of h; the bf16 MXU operand is a per-step cast (VPU, hidden by MXU).
    h_bf16 = h_f32[...].astype(jnp.bfloat16)
    f1 = jnp.dot(h_bf16, w1_ref[...], preferred_element_type=jnp.float32)

    # --- BN1 (training-mode batch stats over the fully-resident batch) + ReLU. --------
    mean1 = jnp.sum(f1, axis=0, keepdims=True) * inv_n
    var1 = jnp.maximum(jnp.sum(f1 * f1, axis=0, keepdims=True) * inv_n - mean1 * mean1,
                       0.0)                                     # clamp: no NaN via rsqrt
    scale1 = g1_ref[...] * lax.rsqrt(var1 + EPS)
    shift1 = be1_ref[...] - mean1 * scale1
    f1 = jnp.maximum(f1 * scale1 + shift1, 0.0)                 # ReLU

    # --- feat Linear2 partial contraction, accumulated directly in the resident o_ref
    # block (index map constant across k): no acc scratch, no finalize copy. -----------
    partial = jnp.dot(f1.astype(jnp.bfloat16), w2_ref[...],
                      preferred_element_type=jnp.float32)

    @pl.when(k == 0)
    def _init_acc():
        o_ref[...] = partial

    @pl.when(k > 0)
    def _accumulate():
        o_ref[...] += partial

    # --- finalize: BN2 + ReLU + residual, lane-dense f32 store. -----------------------
    @pl.when(k == num_k - 1)
    def _finalize():
        f2 = o_ref[...]
        mean2 = jnp.sum(f2, axis=0, keepdims=True) * inv_n
        var2 = jnp.maximum(jnp.sum(f2 * f2, axis=0, keepdims=True) * inv_n - mean2 * mean2,
                           0.0)
        scale2 = g2_ref[...] * lax.rsqrt(var2 + EPS)
        shift2 = be2_ref[...] - mean2 * scale2
        f2 = jnp.maximum(f2 * scale2 + shift2, 0.0)             # ReLU

        tj = o_ref.shape[1]
        col = pl.multiple_of(j * tj, 128)
        o_ref[...] = f2 + h_f32[:, pl.ds(col, tj)]              # residual add (f32)


def basic_fc_res_forward(x, params, *, tile_k=None, num_out_tiles=None):
    """x: (N, ch_in) float32.  params: see init_params (weights stored bf16, transposed).

    Grid = (J, K): J output-channel tiles ("parallel"; default J = #TensorCores, so the
    Linear0 / Linear1+BN1 work is repeated at most once per core), K hidden-channel
    tiles ("arbitrary", innermost reduction of the second Linear, accumulated in the
    resident output block).  The batch stays fully resident so training-mode BatchNorm
    statistics are exact."""
    n, ch_in = x.shape
    ch_out = params["w0"].shape[1]
    hidden = 2 * ch_out

    if n % 8 or ch_in % 128 or ch_out % 128:
        raise ValueError("shapes must be lane/sublane aligned: N%8==0, channels%128==0")

    if num_out_tiles is None:
        num_out_tiles = _num_tensorcores()
    if num_out_tiles < 1 or ch_out % num_out_tiles or (ch_out // num_out_tiles) % 128:
        num_out_tiles = 1                     # fall back: one full-width output tile
    tile_j = ch_out // num_out_tiles

    if tile_k is None:
        # Moderate hidden dims: keep W1/W2 tiles at full depth and collapse the k grid
        # (v5e advice; fewest grid steps everywhere).  Large hidden dims: 512-deep tiles
        # keep the 256x256 MXU (v6e/v7x) fully fed with two pipeline buffers apiece.
        tile_k = hidden if hidden <= 1024 else 512
    if tile_k % 128 or hidden % tile_k:
        raise ValueError("tile_k must be a 128-multiple that divides 2*ch_out")

    grid = (num_out_tiles, hidden // tile_k)
    x_bf = x.astype(jnp.bfloat16)

    # --- derived VMEM budget: 2 pipeline buffers per block + scratch, 25% headroom ----
    block_bytes = (n * ch_in * 2              # x (bf16)
                   + ch_in * ch_out * 2       # W0 (bf16)
                   + ch_out * 4               # b0 (f32)
                   + ch_out * tile_k * 2      # W1 hidden tile (bf16)
                   + 2 * tile_k * 4           # gamma1 / beta1 tiles (f32)
                   + tile_k * tile_j * 2      # W2 tile (bf16)
                   + 2 * tile_j * 4           # gamma2 / beta2 tiles (f32)
                   + n * tile_j * 4)          # output tile (f32)
    scratch_bytes = n * ch_out * 4            # h (f32, residual + per-step bf16 cast)
    vmem_needed = int(1.25 * (2 * block_bytes + scratch_bytes))
    if vmem_needed > _VMEM_CAP_BYTES:
        raise ValueError(
            f"estimated VMEM {vmem_needed / 2**20:.1f} MiB exceeds "
            f"{_VMEM_CAP_BYTES / 2**20:.0f} MiB; use a smaller tile_k and/or more "
            "output tiles (num_out_tiles)")
    vmem_limit = max(32 * 1024 * 1024, vmem_needed)

    flops = (2 * n * (ch_in * ch_out + ch_out * hidden) * num_out_tiles
             + 2 * n * hidden * ch_out)
    bytes_accessed = (x_bf.size * 2
                      + (params["w0"].size + params["w1"].size + params["w2"].size) * 2
                      + (params["b0"].size + params["g1"].size + params["be1"].size
                         + params["g2"].size + params["be2"].size) * 4
                      + n * ch_out * 4)

    return pl.pallas_call(
        _fc_res_kernel,
        out_shape=jax.ShapeDtypeStruct((n, ch_out), jnp.float32),
        grid_spec=pltpu.PrefetchScalarGridSpec(
            num_scalar_prefetch=0,
            grid=grid,
            in_specs=[
                pl.BlockSpec((n, ch_in), lambda j, k: (0, 0)),        # x (bf16, resident)
                pl.BlockSpec((ch_in, ch_out), lambda j, k: (0, 0)),   # W0 (bf16, resident)
                pl.BlockSpec((1, ch_out), lambda j, k: (0, 0)),       # b0
                pl.BlockSpec((ch_out, tile_k), lambda j, k: (0, k)),  # W1 hidden tile
                pl.BlockSpec((1, tile_k), lambda j, k: (0, k)),       # gamma1 tile
                pl.BlockSpec((1, tile_k), lambda j, k: (0, k)),       # beta1 tile
                pl.BlockSpec((tile_k, tile_j), lambda j, k: (k, j)),  # W2 tile
                pl.BlockSpec((1, tile_j), lambda j, k: (0, j)),       # gamma2 tile
                pl.BlockSpec((1, tile_j), lambda j, k: (0, j)),       # beta2 tile
            ],
            out_specs=pl.BlockSpec((n, tile_j), lambda j, k: (0, j)),
            scratch_shapes=[
                pltpu.VMEM((n, ch_out), jnp.float32),   # h (f32; single copy)
            ],
        ),
        compiler_params=pltpu.CompilerParams(
            dimension_semantics=("parallel", "arbitrary"),
            vmem_limit_bytes=int(vmem_limit),
        ),
        cost_estimate=pl.CostEstimate(
            flops=int(flops),
            transcendentals=int(hidden * num_out_tiles + ch_out),
            bytes_accessed=int(bytes_accessed),
        ),
    )(x_bf, params["w0"], params["b0"],
      params["w1"], params["g1"], params["be1"],
      params["w2"], params["g2"], params["be2"])


def init_params(key, ch_in, ch_out):
    """PyTorch-default-style init. Linear weights stored transposed (fan_in, fan_out) in
    bf16 (MXU-friendly); BN gamma=1 / beta=0 in f32.  The biases of the two Linears that
    feed a training-mode BatchNorm are mathematically cancelled and therefore omitted."""
    ks = jax.random.split(key, 6)

    def lin(kw, kb, fan_in, fan_out, with_bias):
        bound = 1.0 / jnp.sqrt(jnp.float32(fan_in))
        w = jax.random.uniform(kw, (fan_in, fan_out), jnp.float32, -bound, bound)
        b = (jax.random.uniform(kb, (1, fan_out), jnp.float32, -bound, bound)
             if with_bias else None)
        return w.astype(jnp.bfloat16), b

    w0, b0 = lin(ks[0], ks[1], ch_in, ch_out, True)
    w1, _ = lin(ks[2], ks[3], ch_out, 2 * ch_out, False)
    w2, _ = lin(ks[4], ks[5], 2 * ch_out, ch_out, False)
    return {
        "w0": w0, "b0": b0,
        "w1": w1,
        "g1": jnp.ones((1, 2 * ch_out), jnp.float32),
        "be1": jnp.zeros((1, 2 * ch_out), jnp.float32),
        "w2": w2,
        "g2": jnp.ones((1, ch_out), jnp.float32),
        "be2": jnp.zeros((1, ch_out), jnp.float32),
    }


def _reference(x, p):
    """Pure-JAX reference mirroring the kernel's quantization points (bf16 MXU operands,
    f32 accumulation, training-mode BN with one-pass clamped stats, b1/b2 dropped)."""
    f32 = jnp.float32
    xb = x.astype(jnp.bfloat16)
    h = jnp.dot(xb, p["w0"], preferred_element_type=f32) + p["b0"]
    hb = h.astype(jnp.bfloat16)

    f = jnp.dot(hb, p["w1"], preferred_element_type=f32)
    m = jnp.mean(f, 0, keepdims=True)
    v = jnp.maximum(jnp.mean(f * f, 0, keepdims=True) - m * m, 0.0)
    f = jnp.maximum((f - m) * lax.rsqrt(v + EPS) * p["g1"] + p["be1"], 0.0)

    fb = f.astype(jnp.bfloat16)
    f = jnp.dot(fb, p["w2"], preferred_element_type=f32)
    m = jnp.mean(f, 0, keepdims=True)
    v = jnp.maximum(jnp.mean(f * f, 0, keepdims=True) - m * m, 0.0)
    f = jnp.maximum((f - m) * lax.rsqrt(v + EPS) * p["g2"] + p["be2"], 0.0)
    return f + h


if __name__ == "__main__":
    # Small but lane-dense shapes: batch 256, ch_in=128, ch_out=256 (hidden = 512).
    N, CH_IN, CH_OUT = 256, 128, 256
    key = jax.random.PRNGKey(0)
    kx, kp = jax.random.split(key)
    x = jax.random.normal(kx, (N, CH_IN), jnp.float32)
    params = init_params(kp, CH_IN, CH_OUT)

    ref = _reference(x, params)

    # Default config: k axis collapsed (K=1), one output tile per TensorCore.
    out = jax.block_until_ready(basic_fc_res_forward(x, params))
    assert out.shape == (N, CH_OUT)
    assert jnp.allclose(out, ref, atol=1e-3, rtol=1e-3), float(jnp.max(jnp.abs(out - ref)))

    # Tiled config: exercises the k-reduction (accumulate-into-o_ref) path and the
    # megacore-shardable 2-tile parallel j axis.
    out2 = jax.block_until_ready(
        basic_fc_res_forward(x, params, tile_k=256, num_out_tiles=2))
    assert jnp.allclose(out2, ref, atol=1e-3, rtol=1e-3), float(jnp.max(jnp.abs(out2 - ref)))

    print("KERNEL_OK")
</pallas_src>

<mosaic_0001>
module attributes {stable_mosaic.version = 11 : i64} {
  func.func @_fc_res_kernel(%arg0: i32, %arg1: i32, %arg2: memref<256x128xbf16, #tpu.memory_space<vmem>>, %arg3: memref<128x256xbf16, #tpu.memory_space<vmem>>, %arg4: memref<1x256xf32, #tpu.memory_space<vmem>>, %arg5: memref<256x512xbf16, #tpu.memory_space<vmem>>, %arg6: memref<1x512xf32, #tpu.memory_space<vmem>>, %arg7: memref<1x512xf32, #tpu.memory_space<vmem>>, %arg8: memref<512x256xbf16, #tpu.memory_space<vmem>>, %arg9: memref<1x256xf32, #tpu.memory_space<vmem>>, %arg10: memref<1x256xf32, #tpu.memory_space<vmem>>, %arg11: memref<256x256xf32, #tpu.memory_space<vmem>>, %arg12: memref<256x256xf32, #tpu.memory_space<vmem>>) attributes {dimension_semantics = [#tpu.dimension_semantics<parallel>, #tpu.dimension_semantics<arbitrary>], iteration_bounds = array<i64: 1, 1>, scalar_prefetch = 0 : i64, scratch_operands = 1 : i64, tpu.core_type = #tpu.core_type<tc>, window_params = [{pipeline_mode = #tpu.pipeline_mode<synchronous>, transform_indices = @transform_0, window_bounds = array<i64: 256, 128>}, {pipeline_mode = #tpu.pipeline_mode<synchronous>, transform_indices = @transform_1, window_bounds = array<i64: 128, 256>}, {pipeline_mode = #tpu.pipeline_mode<synchronous>, transform_indices = @transform_2, window_bounds = array<i64: 1, 256>}, {transform_indices = @transform_3, window_bounds = array<i64: 256, 512>}, {transform_indices = @transform_4, window_bounds = array<i64: 1, 512>}, {transform_indices = @transform_5, window_bounds = array<i64: 1, 512>}, {transform_indices = @transform_6, window_bounds = array<i64: 512, 256>}, {transform_indices = @transform_7, window_bounds = array<i64: 1, 256>}, {transform_indices = @transform_8, window_bounds = array<i64: 1, 256>}, {transform_indices = @transform_9, window_bounds = array<i64: 256, 256>}]} {
    %c0_i32 = arith.constant 0 : i32
    %0 = arith.cmpi eq, %arg1, %c0_i32 : i32
    %1 = arith.extui %0 : i1 to i32
    %c0_i32_0 = arith.constant 0 : i32
    %2 = arith.cmpi ne, %1, %c0_i32_0 : i32
    scf.if %2 {
      %c0_24 = arith.constant 0 : index
      %c0_25 = arith.constant 0 : index
      %46 = vector.load %arg2[%c0_24, %c0_25] : memref<256x128xbf16, #tpu.memory_space<vmem>>, vector<256x128xbf16>
      %c0_26 = arith.constant 0 : index
      %c0_27 = arith.constant 0 : index
      %47 = vector.load %arg3[%c0_26, %c0_27] : memref<128x256xbf16, #tpu.memory_space<vmem>>, vector<128x256xbf16>
      %cst_28 = arith.constant dense<0.000000e+00> : vector<256x256xf32>
      %48 = tpu.matmul %46, %47, %cst_28 {dimension_numbers = #tpu.dot_dimension_numbers<[1], [0], [0], [1], [0, 0, 1, 1], [], []>} : vector<256x128xbf16>, vector<128x256xbf16>, vector<256x256xf32> -> vector<256x256xf32>
      %c0_29 = arith.constant 0 : index
      %c0_30 = arith.constant 0 : index
      %49 = vector.load %arg4[%c0_29, %c0_30] : memref<1x256xf32, #tpu.memory_space<vmem>>, vector<1x256xf32>
      %50 = vector.broadcast %49 : vector<1x256xf32> to vector<256x256xf32>
      %51 = arith.addf %48, %50 : vector<256x256xf32>
      %c0_31 = arith.constant 0 : index
      %c0_32 = arith.constant 0 : index
      %52 = vector.load %arg12[%c0_31, %c0_32] : memref<256x256xf32, #tpu.memory_space<vmem>>, vector<256x256xf32>
      tpu.vector_store %arg12[%c0_31, %c0_32], %51 {strides = array<i32>} : memref<256x256xf32, #tpu.memory_space<vmem>>, vector<256x256xf32>,
    } else {
    }
    %c0 = arith.constant 0 : index
    %c0_1 = arith.constant 0 : index
    %3 = vector.load %arg12[%c0, %c0_1] : memref<256x256xf32, #tpu.memory_space<vmem>>, vector<256x256xf32>
    %4 = arith.truncf %3 : vector<256x256xf32> to vector<256x256xbf16>
    %c0_2 = arith.constant 0 : index
    %c0_3 = arith.constant 0 : index
    %5 = vector.load %arg5[%c0_2, %c0_3] : memref<256x512xbf16, #tpu.memory_space<vmem>>, vector<256x512xbf16>
    %cst = arith.constant dense<0.000000e+00> : vector<256x512xf32>
    %6 = tpu.matmul %4, %5, %cst {dimension_numbers = #tpu.dot_dimension_numbers<[1], [0], [0], [1], [0, 0, 1, 1], [], []>} : vector<256x256xbf16>, vector<256x512xbf16>, vector<256x512xf32> -> vector<256x512xf32>
    %cst_4 = arith.constant dense<0.000000e+00> : vector<512xf32>
    %7 = vector.multi_reduction <add>, %6, %cst_4 [0] : vector<256x512xf32> to vector<512xf32>
    %8 = vector.shape_cast %7 : vector<512xf32> to vector<1x512xf32>
    %cst_5 = arith.constant 3.906250e-03 : f32
    %9 = vector.broadcast %cst_5 : f32 to vector<1x512xf32>
    %10 = arith.mulf %8, %9 : vector<1x512xf32>
    %11 = arith.mulf %6, %6 : vector<256x512xf32>
    %cst_6 = arith.constant dense<0.000000e+00> : vector<512xf32>
    %12 = vector.multi_reduction <add>, %11, %cst_6 [0] : vector<256x512xf32> to vector<512xf32>
    %13 = vector.shape_cast %12 : vector<512xf32> to vector<1x512xf32>
    %cst_7 = arith.constant 3.906250e-03 : f32
    %14 = vector.broadcast %cst_7 : f32 to vector<1x512xf32>
    %15 = arith.mulf %13, %14 : vector<1x512xf32>
    %16 = arith.mulf %10, %10 : vector<1x512xf32>
    %17 = arith.subf %15, %16 : vector<1x512xf32>
    %cst_8 = arith.constant 0.000000e+00 : f32
    %18 = vector.broadcast %cst_8 : f32 to vector<1x512xf32>
    %19 = arith.maximumf %17, %18 : vector<1x512xf32>
    %c0_9 = arith.constant 0 : index
    %c0_10 = arith.constant 0 : index
    %20 = vector.load %arg6[%c0_9, %c0_10] : memref<1x512xf32, #tpu.memory_space<vmem>>, vector<1x512xf32>
    %cst_11 = arith.constant 9.99999974E-6 : f32
    %21 = vector.broadcast %cst_11 : f32 to vector<1x512xf32>
    %22 = arith.addf %19, %21 : vector<1x512xf32>
    %23 = math.rsqrt %22 : vector<1x512xf32>
    %24 = arith.mulf %20, %23 : vector<1x512xf32>
    %c0_12 = arith.constant 0 : index
    %c0_13 = arith.constant 0 : index
    %25 = vector.load %arg7[%c0_12, %c0_13] : memref<1x512xf32, #tpu.memory_space<vmem>>, vector<1x512xf32>
    %26 = arith.mulf %10, %24 : vector<1x512xf32>
    %27 = arith.subf %25, %26 : vector<1x512xf32>
    %28 = vector.broadcast %24 : vector<1x512xf32> to vector<256x512xf32>
    %29 = arith.mulf %6, %28 : vector<256x512xf32>
    %30 = vector.broadcast %27 : vector<1x512xf32> to vector<256x512xf32>
    %31 = arith.addf %29, %30 : vector<256x512xf32>
    %cst_14 = arith.constant 0.000000e+00 : f32
    %32 = vector.broadcast %cst_14 : f32 to vector<256x512xf32>
    %33 = arith.maximumf %31, %32 : vector<256x512xf32>
    %34 = arith.truncf %33 : vector<256x512xf32> to vector<256x512xbf16>
    %c0_15 = arith.constant 0 : index
    %c0_16 = arith.constant 0 : index
    %35 = vector.load %arg8[%c0_15, %c0_16] : memref<512x256xbf16, #tpu.memory_space<vmem>>, vector<512x256xbf16>
    %cst_17 = arith.constant dense<0.000000e+00> : vector<256x256xf32>
    %36 = tpu.matmul %34, %35, %cst_17 {dimension_numbers = #tpu.dot_dimension_numbers<[1], [0], [0], [1], [0, 0, 1, 1], [], []>} : vector<256x512xbf16>, vector<512x256xbf16>, vector<256x256xf32> -> vector<256x256xf32>
    %c0_i32_18 = arith.constant 0 : i32
    %37 = arith.cmpi eq, %arg1, %c0_i32_18 : i32
    %38 = arith.extui %37 : i1 to i32
    %c0_i32_19 = arith.constant 0 : i32
    %39 = arith.cmpi ne, %38, %c0_i32_19 : i32
    scf.if %39 {
      %c0_24 = arith.constant 0 : index
      %c0_25 = arith.constant 0 : index
      %46 = vector.load %arg11[%c0_24, %c0_25] : memref<256x256xf32, #tpu.memory_space<vmem>>, vector<256x256xf32>
      tpu.vector_store %arg11[%c0_24, %c0_25], %36 {strides = array<i32>} : memref<256x256xf32, #tpu.memory_space<vmem>>, vector<256x256xf32>,
    } else {
    }
    %c0_i32_20 = arith.constant 0 : i32
    %40 = arith.cmpi sgt, %arg1, %c0_i32_20 : i32
    %41 = arith.extui %40 : i1 to i32
    %c0_i32_21 = arith.constant 0 : i32
    %42 = arith.cmpi ne, %41, %c0_i32_21 : i32
    scf.if %42 {
      %c0_24 = arith.constant 0 : index
      %c0_25 = arith.constant 0 : index
      %46 = vector.load %arg11[%c0_24, %c0_25] : memref<256x256xf32, #tpu.memory_space<vmem>>, vector<256x256xf32>
      %47 = arith.addf %46, %36 : vector<256x256xf32>
      %c0_26 = arith.constant 0 : index
      %c0_27 = arith.constant 0 : index
      %48 = vector.load %arg11[%c0_26, %c0_27] : memref<256x256xf32, #tpu.memory_space<vmem>>, vector<256x256xf32>
      tpu.vector_store %arg11[%c0_26, %c0_27], %47 {strides = array<i32>} : memref<256x256xf32, #tpu.memory_space<vmem>>, vector<256x256xf32>,
    } else {
    }
    %c0_i32_22 = arith.constant 0 : i32
    %43 = arith.cmpi eq, %arg1, %c0_i32_22 : i32
    %44 = arith.extui %43 : i1 to i32
    %c0_i32_23 = arith.constant 0 : i32
    %45 = arith.cmpi ne, %44, %c0_i32_23 : i32
    scf.if %45 {
      %c0_24 = arith.constant 0 : index
      %c0_25 = arith.constant 0 : index
      %46 = vector.load %arg11[%c0_24, %c0_25] : memref<256x256xf32, #tpu.memory_space<vmem>>, vector<256x256xf32>
      %cst_26 = arith.constant dense<0.000000e+00> : vector<256xf32>
      %47 = vector.multi_reduction <add>, %46, %cst_26 [0] : vector<256x256xf32> to vector<256xf32>
      %48 = vector.shape_cast %47 : vector<256xf32> to vector<1x256xf32>
      %cst_27 = arith.constant 3.906250e-03 : f32
      %49 = vector.broadcast %cst_27 : f32 to vector<1x256xf32>
      %50 = arith.mulf %48, %49 : vector<1x256xf32>
      %51 = arith.mulf %46, %46 : vector<256x256xf32>
      %cst_28 = arith.constant dense<0.000000e+00> : vector<256xf32>
      %52 = vector.multi_reduction <add>, %51, %cst_28 [0] : vector<256x256xf32> to vector<256xf32>
      %53 = vector.shape_cast %52 : vector<256xf32> to vector<1x256xf32>
      %cst_29 = arith.constant 3.906250e-03 : f32
      %54 = vector.broadcast %cst_29 : f32 to vector<1x256xf32>
      %55 = arith.mulf %53, %54 : vector<1x256xf32>
      %56 = arith.mulf %50, %50 : vector<1x256xf32>
      %57 = arith.subf %55, %56 : vector<1x256xf32>
      %cst_30 = arith.constant 0.000000e+00 : f32
      %58 = vector.broadcast %cst_30 : f32 to vector<1x256xf32>
      %59 = arith.maximumf %57, %58 : vector<1x256xf32>
      %c0_31 = arith.constant 0 : index
      %c0_32 = arith.constant 0 : index
      %60 = vector.load %arg9[%c0_31, %c0_32] : memref<1x256xf32, #tpu.memory_space<vmem>>, vector<1x256xf32>
      %cst_33 = arith.constant 9.99999974E-6 : f32
      %61 = vector.broadcast %cst_33 : f32 to vector<1x256xf32>
      %62 = arith.addf %59, %61 : vector<1x256xf32>
      %63 = math.rsqrt %62 : vector<1x256xf32>
      %64 = arith.mulf %60, %63 : vector<1x256xf32>
      %c0_34 = arith.constant 0 : index
      %c0_35 = arith.constant 0 : index
      %65 = vector.load %arg10[%c0_34, %c0_35] : memref<1x256xf32, #tpu.memory_space<vmem>>, vector<1x256xf32>
      %66 = arith.mulf %50, %64 : vector<1x256xf32>
      %67 = arith.subf %65, %66 : vector<1x256xf32>
      %68 = vector.broadcast %64 : vector<1x256xf32> to vector<256x256xf32>
      %69 = arith.mulf %46, %68 : vector<256x256xf32>
      %70 = vector.broadcast %67 : vector<1x256xf32> to vector<256x256xf32>
      %71 = arith.addf %69, %70 : vector<256x256xf32>
      %cst_36 = arith.constant 0.000000e+00 : f32
      %72 = vector.broadcast %cst_36 : f32 to vector<256x256xf32>
      %73 = arith.maximumf %71, %72 : vector<256x256xf32>
      %c256_i32 = arith.constant 256 : i32
      %74 = arith.muli %arg0, %c256_i32 : i32
      %75 = tpu.assume_multiple %74, 128 : i32
      %c0_37 = arith.constant 0 : index
      %76 = arith.index_cast %75 : i32 to index
      %77 = vector.load %arg12[%c0_37, %76] : memref<256x256xf32, #tpu.memory_space<vmem>>, vector<256x256xf32>
      %78 = arith.addf %73, %77 : vector<256x256xf32>
      %c0_38 = arith.constant 0 : index
      %c0_39 = arith.constant 0 : index
      %79 = vector.load %arg11[%c0_38, %c0_39] : memref<256x256xf32, #tpu.memory_space<vmem>>, vector<256x256xf32>
      tpu.vector_store %arg11[%c0_38, %c0_39], %78 {strides = array<i32>} : memref<256x256xf32, #tpu.memory_space<vmem>>, vector<256x256xf32>,
    } else {
    }
    return
  }
  func.func @transform_0(%arg0: i32, %arg1: i32) -> (i32, i32) {
    %c0_i32 = arith.constant 0 : i32
    %c0_i32_0 = arith.constant 0 : i32
    %c0_i32_1 = arith.constant 0 : i32
    return %c0_i32, %c0_i32_0 : i32, i32
  }
  func.func @transform_1(%arg0: i32, %arg1: i32) -> (i32, i32) {
    %c0_i32 = arith.constant 0 : i32
    %c0_i32_0 = arith.constant 0 : i32
    %c0_i32_1 = arith.constant 0 : i32
    return %c0_i32, %c0_i32_0 : i32, i32
  }
  func.func @transform_2(%arg0: i32, %arg1: i32) -> (i32, i32) {
    %c0_i32 = arith.constant 0 : i32
    %c0_i32_0 = arith.constant 0 : i32
    %c0_i32_1 = arith.constant 0 : i32
    return %c0_i32, %c0_i32_0 : i32, i32
  }
  func.func @transform_3(%arg0: i32, %arg1: i32) -> (i32, i32) {
    %c0_i32 = arith.constant 0 : i32
    %c0_i32_0 = arith.constant 0 : i32
    return %c0_i32, %arg1 : i32, i32
  }
  func.func @transform_4(%arg0: i32, %arg1: i32) -> (i32, i32) {
    %c0_i32 = arith.constant 0 : i32
    %c0_i32_0 = arith.constant 0 : i32
    return %c0_i32, %arg1 : i32, i32
  }
  func.func @transform_5(%arg0: i32, %arg1: i32) -> (i32, i32) {
    %c0_i32 = arith.constant 0 : i32
    %c0_i32_0 = arith.constant 0 : i32
    return %c0_i32, %arg1 : i32, i32
  }
  func.func @transform_6(%arg0: i32, %arg1: i32) -> (i32, i32) {
    %c0_i32 = arith.constant 0 : i32
    return %arg1, %arg0 : i32, i32
  }
  func.func @transform_7(%arg0: i32, %arg1: i32) -> (i32, i32) {
    %c0_i32 = arith.constant 0 : i32
    %c0_i32_0 = arith.constant 0 : i32
    return %c0_i32, %arg0 : i32, i32
  }
  func.func @transform_8(%arg0: i32, %arg1: i32) -> (i32, i32) {
    %c0_i32 = arith.constant 0 : i32
    %c0_i32_0 = arith.constant 0 : i32
    return %c0_i32, %arg0 : i32, i32
  }
  func.func @transform_9(%arg0: i32, %arg1: i32) -> (i32, i32) {
    %c0_i32 = arith.constant 0 : i32
    %c0_i32_0 = arith.constant 0 : i32
    return %c0_i32, %arg0 : i32, i32
  }
}

</mosaic_0001>

<bundles_post_ra>
// kernel: tpu_custom_call.1
= control target key start
LH: loop header
LB: loop body
LE: loop exit
PB: predicated region body
PF: predicated region fallthrough
CT: control target
= control target key end

     0   :  { %14 = vsyncpa [#allocation4], 0  ;;  %s8091_s0 = inlined_call_operand.hbm [shape: bf16[256,128], index: 0, kind: input, shape index: {}]   ;;  %s8092_s1 = inlined_call_operand.hbm [shape: bf16[128,256], index: 1, kind: input, shape index: {}]   ;;  %s8093_s2 = inlined_call_operand.hbm [shape: f32[1,256], index: 2, kind: input, shape index: {}]   ;;  %s8094_s3 = inlined_call_operand.hbm [shape: bf16[256,512], index: 3, kind: input, shape index: {}]   ;;  %s8095_s4 = inlined_call_operand.vmem [shape: f32[1,512], index: 4, kind: input, shape index: {}]   ;;  %s8096_s5 = inlined_call_operand.vmem [shape: f32[1,512], index: 5, kind: input, shape index: {}]   ;;  %s8097_s6 = inlined_call_operand.hbm [shape: bf16[512,256], index: 6, kind: input, shape index: {}]   ;;  %s8098_s7 = inlined_call_operand.vmem [shape: f32[1,256], index: 7, kind: input, shape index: {}]   ;;  %s8099_s8 = inlined_call_operand.vmem [shape: f32[1,256], index: 8, kind: input, shape index: {}]   ;;  %s8100_s9 = inlined_call_operand.hbm [shape: f32[256,256], index: 9, kind: output, shape index: {}]  }
   0x1   :  { %15 = vsyncpa [#allocation7], 0 }
   0x2   :  { %16 = vsyncpa [#allocation10], 0 }
   0x3   :  { %17 = vsyncpa [#allocation5], 0  ;;  %s4833_s30 = smov [#allocation6]  }
   0x4   :  { %s35_s10 = sshll.u32 %s4833_s30, 4  ;;  %s36_s10 = int_to_ptr.vmem [resolvable:$true] %s35_s10 }
   0x5   :  { %s4713_s11 = scalar_lea.vmem %s36_s10, 2048  ;;  %p4718_p1 = scmp.lt.s32.totalorder %s36_s10, %s36_s10 }
   0x6   :  { %p4714_p0 = scmp.ne.s32.totalorder %s36_s10, %s4713_s11  ;;  %p4719_p2 = scmp.lt.s32.totalorder %s4713_s11, %s4713_s11 }
   0x8   :  { %p4720_p3 = por %p4719_p2, %p4718_p1 }
   0xa   :  { %p4721_p4 = pnand %p4720_p3, %p4714_p0 }
   0xc   :  { %4724 = shalt.err (!%p4721_p4)
}
   0xd   :  { %s4834_s12 = smov 128   ;;  %s4835_s13 = smov 8  }
   0xe   :  { %41 = dma.hbm_to_vmem [thread:$0]  %s8092_s1, 2048, %s36_s10, [#allocation7], %s4834_s12, %s4834_s12, %s4835_s13  }
   0xf   :  { %s4836_s16 = smov [#allocation9]  }
  0x10   :  { %s57_s17 = sshll.u32 %s4836_s16, 4  ;;  %s58_s17 = int_to_ptr.vmem [resolvable:$true] %s57_s17 }
  0x11   :  { %s4733_s18 = scalar_lea.vmem %s58_s17, 8192  ;;  %p4738_p6 = scmp.lt.s32.totalorder %s58_s17, %s58_s17 }
  0x12   :  { %p4734_p5 = scmp.ne.s32.totalorder %s58_s17, %s4733_s18  ;;  %p4739_p7 = scmp.lt.s32.totalorder %s4733_s18, %s4733_s18 }
  0x14   :  { %p4740_p8 = por %p4739_p7, %p4738_p6 }
  0x16   :  { %p4741_p9 = pnand %p4740_p8, %p4734_p5 }
  0x18   :  { %4744 = shalt.err (!%p4741_p9)
}
  0x19   :  { %s4837_s19 = smov 256   ;;  %s4838_s20 = smov 16  }
  0x1a   :  { %63 = dma.hbm_to_vmem [thread:$0]  %s8094_s3, 8192, %s58_s17, [#allocation10], %s4837_s19, %s4837_s19, %s4838_s20  }
  0x1b   :  { %s4839_s1 = smov [#allocation3]  }
  0x1c   :  { %s23_s23 = sshll.u32 %s4839_s1, 4  ;;  %s24_s23 = int_to_ptr.vmem [resolvable:$true] %s23_s23 }
  0x1d   :  { %s4753_s24 = scalar_lea.vmem %s24_s23, 2048  ;;  %p4758_p11 = scmp.lt.s32.totalorder %s24_s23, %s24_s23 }
  0x1e   :  { %p4754_p10 = scmp.ne.s32.totalorder %s24_s23, %s4753_s24  ;;  %p4759_p12 = scmp.lt.s32.totalorder %s4753_s24, %s4753_s24 }
  0x20   :  { %p4760_p13 = por %p4759_p12, %p4758_p11 }
  0x22   :  { %p4761_p0 = pnand %p4760_p13, %p4754_p10 }
  0x24   :  { %4764 = shalt.err (!%p4761_p0)
}
  0x25   :  { %s4840_s25 = smov 64   ;;  %s4841_s26 = smov 4  }
  0x26   :  { %29 = dma.hbm_to_vmem [thread:$0]  %s8091_s0, 2048, %s24_s23, [#allocation4], %s4840_s25, %s4840_s25, %s4841_s26  }
  0x27   :  { %s4842_s29 = smov [#allocation8]   ;;  %s4843_s3 = smov [#allocation11]  }
  0x28   :  { %s48_s30 = sshll.u32 %s4842_s29, 4  ;;  %s73_s10 = sshll.u32 %s4843_s3, 4  ;;  %s49_s30 = int_to_ptr.vmem [resolvable:$true] %s48_s30  ;;  %s74_s10 = int_to_ptr.vmem [resolvable:$true] %s73_s10 }
  0x29   :  { %s4773_s11 = scalar_lea.vmem %s49_s30, 32  ;;  %p4778_p2 = scmp.lt.s32.totalorder %s49_s30, %s49_s30 }
  0x2a   :  { %p4774_p1 = scmp.ne.s32.totalorder %s49_s30, %s4773_s11  ;;  %p4779_p3 = scmp.lt.s32.totalorder %s4773_s11, %s4773_s11 }
  0x2c   :  { %p4780_p4 = por %p4779_p3, %p4778_p2 }
  0x2e   :  { %p4781_p5 = pnand %p4780_p4, %p4774_p1 }
  0x30   :  { %4784 = shalt.err (!%p4781_p5)
}
  0x31   :  { %51 = dma.hbm_to_vmem [thread:$0]  %s8093_s2, 32, %s49_s30, [#allocation7]  }
  0x32   :  { %s4793_s16 = scalar_lea.vmem %s74_s10, 8192  ;;  %p4798_p7 = scmp.lt.s32.totalorder %s74_s10, %s74_s10 }
  0x33   :  { %p4794_p6 = scmp.ne.s32.totalorder %s74_s10, %s4793_s16  ;;  %p4799_p8 = scmp.lt.s32.totalorder %s4793_s16, %s4793_s16 }
  0x35   :  { %p4800_p9 = por %p4799_p8, %p4798_p7 }
  0x37   :  { %p4801_p10 = pnand %p4800_p9, %p4794_p6 }
  0x39   :  { %4804 = shalt.err (!%p4801_p10)
}
  0x3a   :  { %79 = dma.hbm_to_vmem [thread:$0]  %s8097_s6, 8192, %s74_s10, [#allocation10], %s4834_s12, %s4834_s12, %s4835_s13  }
  0x3b   :  { %4825 = dma.done.wait [#allocation4], 2048  }
  0x3c   :  { %4826 = vsyncadd [#allocation4], 4294965248 }
  0x3d   :  { %4827 = dma.done.wait [#allocation7], 2080  }
  0x3e   :  { %4828 = vsyncadd [#allocation7], 4294965216 }
  0x3f   :  { %4829 = dma.done.wait [#allocation10], 16384  }
  0x40   :  { %4830 = vsyncadd [#allocation10], 4294950912  ;;  %v4844_v0 = vmov 0   ;;  %v4461_v1 = vld [vmem:[#allocation6 + $0x74] ss:$8 sps:$4 sm:$0xff]   ;;  %v4485_v19 = vld [vmem:[#allocation3] sm:$0xff]  }
  0x41   :  { %372 = vmatprep.mubr.bf16.mxu0 %v4844_v0  ;;  %452 = vmatprep.mubr.bf16.mxu1 %v4844_v0  ;;  %v4463_v2 = vld [vmem:[#allocation6 + $0x70] ss:$8 sps:$4 sm:$0xff]   ;;  %v4464_v3 = vld [vmem:[#allocation6 + $0x64] ss:$8 sps:$4 sm:$0xff]   ;;  %v4466_v4 = vld [vmem:[#allocation6 + $0x60] ss:$8 sps:$4 sm:$0xff]  }
  0x42   :  { %340 = vmatprep.subr.bf16.mxu0 %v4461_v1  ;;  %4431 = vmatprep.subr.bf16.mxu1 %v4461_v1  ;;  %v4467_v5 = vld [vmem:[#allocation6 + $0x54] ss:$8 sps:$4 sm:$0xff]   ;;  %v4469_v6 = vld [vmem:[#allocation6 + $0x50] ss:$8 sps:$4 sm:$0xff]   ;;  %v4470_v7 = vld [vmem:[#allocation6 + $0x44] ss:$8 sps:$4 sm:$0xff]  }
  0x43   :  { %341 = vmatpush1.bf16.msra.mxu0 %v4463_v2  ;;  %4439 = vmatpush1.bf16.msra.mxu1 %v4463_v2  ;;  %v4472_v8 = vld [vmem:[#allocation6 + $0x40] ss:$8 sps:$4 sm:$0xff]   ;;  %v4473_v9 = vld [vmem:[#allocation6 + $0x34] ss:$8 sps:$4 sm:$0xff]   ;;  %v4475_v10 = vld [vmem:[#allocation6 + $0x30] ss:$8 sps:$4 sm:$0xff]  }
  0x44   :  { %342 = vmatprep.subr.bf16.mxu0 %v4464_v3  ;;  %4432 = vmatprep.subr.bf16.mxu1 %v4464_v3  ;;  %v4476_v11 = vld [vmem:[#allocation6 + $0x24] ss:$8 sps:$4 sm:$0xff]   ;;  %v4478_v12 = vld [vmem:[#allocation6 + $0x20] ss:$8 sps:$4 sm:$0xff]   ;;  %v4479_v13 = vld [vmem:[#allocation6 + $0x14] ss:$8 sps:$4 sm:$0xff]  }
  0x45   :  { %v4481_v14 = vld [vmem:[#allocation6 + $0x10] ss:$8 sps:$4 sm:$0xff]   ;;  %v4482_v15 = vld [vmem:[#allocation6 + $0x4] ss:$8 sps:$4 sm:$0xff]   ;;  %v4484_v16 = vld [vmem:[#allocation6] ss:$8 sps:$4 sm:$0xff]  }
  0x46   :  { %v4503_v17 = vld [vmem:[#allocation9 + $0xe4] ss:$16 sps:$4 sm:$0xff]   ;;  %v4506_v18 = vld [vmem:[#allocation9 + $0xec] ss:$16 sps:$4 sm:$0xff]   ;;  %v4501_v21 = vld [vmem:[#allocation9 + $0xe0] ss:$16 sps:$4 sm:$0xff]  }
  0x47   :  { %343 = vmatpush1.bf16.msra.mxu0 %v4466_v4  ;;  %4440 = vmatpush1.bf16.msra.mxu1 %v4466_v4  ;;  %v4493_v20 = vld [vmem:[#allocation3 + $0x40] sm:$0xff]   ;;  %v4504_v22 = vld [vmem:[#allocation9 + $0xe8] ss:$16 sps:$4 sm:$0xff]   ;;  %v4487_v39 = vld [vmem:[#allocation3 + $0x10] sm:$0xff]  }
  0x48   :  { %344 = vmatprep.subr.bf16.mxu0 %v4467_v5  ;;  %4433 = vmatprep.subr.bf16.mxu1 %v4467_v5  ;;  %v4509_v23 = vld [vmem:[#allocation9 + $0xc4] ss:$16 sps:$4 sm:$0xff]   ;;  %v4512_v24 = vld [vmem:[#allocation9 + $0xcc] ss:$16 sps:$4 sm:$0xff]   ;;  %v4507_v25 = vld [vmem:[#allocation9 + $0xc0] ss:$16 sps:$4 sm:$0xff]  }
  0x49   :  { %v4510_v26 = vld [vmem:[#allocation9 + $0xc8] ss:$16 sps:$4 sm:$0xff]   ;;  %v4515_v27 = vld [vmem:[#allocation9 + $0xa4] ss:$16 sps:$4 sm:$0xff]   ;;  %v4518_v28 = vld [vmem:[#allocation9 + $0xac] ss:$16 sps:$4 sm:$0xff]  }
  0x4a   :  { %v4486_v29 = vld [vmem:[#allocation3 + $0x8] sm:$0xff]   ;;  %v4513_v31 = vld [vmem:[#allocation9 + $0xa0] ss:$16 sps:$4 sm:$0xff]   ;;  %v4488_v49 = vld [vmem:[#allocation3 + $0x18] sm:$0xff]  }
  0x4b   :  { %345 = vmatpush1.bf16.msra.mxu0 %v4469_v6  ;;  %4441 = vmatpush1.bf16.msra.mxu1 %v4469_v6  ;;  %v4494_v30 = vld [vmem:[#allocation3 + $0x48] sm:$0xff]   ;;  %v4519_v35 = vld [vmem:[#allocation9 + $0x80] ss:$16 sps:$4 sm:$0xff]   ;;  %v4496_v50 = vld [vmem:[#allocation3 + $0x58] sm:$0xff]  }
  0x4c   :  { %346 = vmatprep.subr.bf16.mxu0 %v4470_v7  ;;  %4434 = vmatprep.subr.bf16.mxu1 %v4470_v7  ;;  %v4516_v32 = vld [vmem:[#allocation9 + $0xa8] ss:$16 sps:$4 sm:$0xff]   ;;  %v4521_v33 = vld [vmem:[#allocation9 + $0x84] ss:$16 sps:$4 sm:$0xff]   ;;  %v4524_v34 = vld [vmem:[#allocation9 + $0x8c] ss:$16 sps:$4 sm:$0xff]  }
  0x4d   :  { %v4522_v36 = vld [vmem:[#allocation9 + $0x88] ss:$16 sps:$4 sm:$0xff]   ;;  %v4527_v37 = vld [vmem:[#allocation9 + $0x64] ss:$16 sps:$4 sm:$0xff]   ;;  %v4530_v38 = vld [vmem:[#allocation9 + $0x6c] ss:$16 sps:$4 sm:$0xff]  }
  0x4e   :  { %v4495_v40 = vld [vmem:[#allocation3 + $0x50] sm:$0xff]   ;;  %v4528_v42 = vld [vmem:[#allocation9 + $0x68] ss:$16 sps:$4 sm:$0xff]   ;;  %v4489_v57 = vld [vmem:[#allocation3 + $0x20] sm:$0xff]  }
  0x4f   :  { %347 = vmatpush1.bf16.msra.mxu0 %v4472_v8  ;;  %4442 = vmatpush1.bf16.msra.mxu1 %v4472_v8  ;;  %v4525_v41 = vld [vmem:[#allocation9 + $0x60] ss:$16 sps:$4 sm:$0xff]   ;;  %v4533_v43 = vld [vmem:[#allocation9 + $0x44] ss:$16 sps:$4 sm:$0xff]   ;;  %v4536_v44 = vld [vmem:[#allocation9 + $0x4c] ss:$16 sps:$4 sm:$0xff]  }
  0x50   :  { %348 = vmatprep.subr.bf16.mxu0 %v4473_v9  ;;  %4435 = vmatprep.subr.bf16.mxu1 %v4473_v9  ;;  %v4531_v45 = vld [vmem:[#allocation9 + $0x40] ss:$16 sps:$4 sm:$0xff]   ;;  %v4534_v46 = vld [vmem:[#allocation9 + $0x48] ss:$16 sps:$4 sm:$0xff]   ;;  %v4539_v47 = vld [vmem:[#allocation9 + $0x24] ss:$16 sps:$4 sm:$0xff]  }
  0x51   :  { %v4542_v48 = vld [vmem:[#allocation9 + $0x2c] ss:$16 sps:$4 sm:$0xff]   ;;  %v4537_v51 = vld [vmem:[#allocation9 + $0x20] ss:$16 sps:$4 sm:$0xff]   ;;  %v4540_v52 = vld [vmem:[#allocation9 + $0x28] ss:$16 sps:$4 sm:$0xff]  }
  0x52   :  { %v4545_v53 = vld [vmem:[#allocation9 + $0x4] ss:$16 sps:$4 sm:$0xff]   ;;  %v4548_v54 = vld [vmem:[#allocation9 + $0xc] ss:$16 sps:$4 sm:$0xff]   ;;  %v4543_v55 = vld [vmem:[#allocation9] ss:$16 sps:$4 sm:$0xff]  }
  0x53   :  { %349 = vmatpush1.bf16.msra.mxu0 %v4475_v10  ;;  %4443 = vmatpush1.bf16.msra.mxu1 %v4475_v10  ;;  %v4546_v56 = vld [vmem:[#allocation9 + $0x8] ss:$16 sps:$4 sm:$0xff]   ;;  %v4551_v58 = vld [vmem:[#allocation9 + $0x1e4] ss:$16 sps:$4 sm:$0xff]   ;;  %v4554_v59 = vld [vmem:[#allocation9 + $0x1ec] ss:$16 sps:$4 sm:$0xff]  }
  0x54   :  { %350 = vmatprep.subr.bf16.mxu0 %v4476_v11  ;;  %4436 = vmatprep.subr.bf16.mxu1 %v4476_v11  ;;  %v4497_v60 = vld [vmem:[#allocation3 + $0x60] sm:$0xff]   ;;  %v4552_v62 = vld [vmem:[#allocation9 + $0x1e8] ss:$16 sps:$4 sm:$0xff]  }
  0x55   :  { %v4549_v61 = vld [vmem:[#allocation9 + $0x1e0] ss:$16 sps:$4 sm:$0xff]   ;;  %v4557_v63 = vld [vmem:[#allocation9 + $0x1c4] ss:$16 sps:$4 sm:$0xff]   ;;  %v4560_v1 = vld [vmem:[#allocation9 + $0x1cc] ss:$16 sps:$4 sm:$0xff]  }
  0x56   :  { %v4555_v2 = vld [vmem:[#allocation9 + $0x1c0] ss:$16 sps:$4 sm:$0xff]   ;;  %v4558_v3 = vld [vmem:[#allocation9 + $0x1c8] ss:$16 sps:$4 sm:$0xff]   ;;  %v4563_v4 = vld [vmem:[#allocation9 + $0x1a4] ss:$16 sps:$4 sm:$0xff]  }
  0x57   :  { %351 = vmatpush1.bf16.msra.mxu0 %v4478_v12  ;;  %4444 = vmatpush1.bf16.msra.mxu1 %v4478_v12  ;;  %v4566_v5 = vld [vmem:[#allocation9 + $0x1ac] ss:$16 sps:$4 sm:$0xff]   ;;  %v4561_v8 = vld [vmem:[#allocation9 + $0x1a0] ss:$16 sps:$4 sm:$0xff]   ;;  %v4564_v9 = vld [vmem:[#allocation9 + $0x1a8] ss:$16 sps:$4 sm:$0xff]  }
  0x58   :  { %352 = vmatprep.subr.bf16.mxu0 %v4479_v13  ;;  %4437 = vmatprep.subr.bf16.mxu1 %v4479_v13  ;;  %v4490_v6 = vld [vmem:[#allocation3 + $0x28] sm:$0xff]   ;;  %v4567_v12 = vld [vmem:[#allocation9 + $0x180] ss:$16 sps:$4 sm:$0xff]  }
  0x59   :  { %v4498_v7 = vld [vmem:[#allocation3 + $0x68] sm:$0xff]  }
  0x5a   :  { %v4569_v10 = vld [vmem:[#allocation9 + $0x184] ss:$16 sps:$4 sm:$0xff]   ;;  %v4572_v11 = vld [vmem:[#allocation9 + $0x18c] ss:$16 sps:$4 sm:$0xff]   ;;  %v4570_v13 = vld [vmem:[#allocation9 + $0x188] ss:$16 sps:$4 sm:$0xff]  }
  0x5b   :  { %353 = vmatpush1.bf16.msra.mxu0 %v4481_v14  ;;  %4445 = vmatpush1.bf16.msra.mxu1 %v4481_v14  ;;  %v4575_v14 = vld [vmem:[#allocation9 + $0x164] ss:$16 sps:$4 sm:$0xff]  }
  0x5c   :  { %354 = vmatprep.subr.bf16.mxu0 %v4482_v15  ;;  %4438 = vmatprep.subr.bf16.mxu1 %v4482_v15  ;;  %v4578_v15 = vld [vmem:[#allocation9 + $0x16c] ss:$16 sps:$4 sm:$0xff]  }
  0x5f   :  { %355 = vmatpush1.bf16.msra.mxu0 %v4484_v16  ;;  %4446 = vmatpush1.bf16.msra.mxu1 %v4484_v16  ;;  %v4491_v16 = vld [vmem:[#allocation3 + $0x30] sm:$0xff]  }
  0x60   :  { %1077 = vmatprep.subr.bf16.mxu1 %v4503_v17  ;;  %1270 = vmatprep.subr.bf16.mxu0 %v4506_v18  ;;  %v4499_v17 = vld [vmem:[#allocation3 + $0x70] sm:$0xff]  }
  0x61   :  { %v4573_v18 = vld [vmem:[#allocation9 + $0x160] ss:$16 sps:$4 sm:$0xff]  }
  0x62   :  { %373 = vmatmul.mubr.bf16.vlgmr.msra.gmra.mxu0 %v4485_v19  ;;  %453 = vmatmul.mubr.bf16.vlgmr.msra.gmra.mxu1 %v4493_v20  ;;  %v4576_v19 = vld [vmem:[#allocation9 + $0x168] ss:$16 sps:$4 sm:$0xff]   ;;  %v4581_v20 = vld [vmem:[#allocation9 + $0x144] ss:$16 sps:$4 sm:$0xff]  }
  0x63   :  { %382 = vmatprep.mubr.bf16.mxu0 %v4844_v0  ;;  %462 = vmatprep.mubr.bf16.mxu1 %v4844_v0 }
  0x64   :  { %1078 = vmatpush1.bf16.msra.mxu1 %v4501_v21  ;;  %1271 = vmatpush1.bf16.msra.mxu0 %v4504_v22  ;;  %v4584_v21 = vld [vmem:[#allocation9 + $0x14c] ss:$16 sps:$4 sm:$0xff]   ;;  %v4579_v22 = vld [vmem:[#allocation9 + $0x140] ss:$16 sps:$4 sm:$0xff]  }
  0x65   :  { %1079 = vmatprep.subr.bf16.mxu1 %v4509_v23  ;;  %1272 = vmatprep.subr.bf16.mxu0 %v4512_v24  ;;  %v4582_v23 = vld [vmem:[#allocation9 + $0x148] ss:$16 sps:$4 sm:$0xff]  }
  0x66   :  { %v4492_v24 = vld [vmem:[#allocation3 + $0x38] sm:$0xff]  }
  0x68   :  { %1080 = vmatpush1.bf16.msra.mxu1 %v4507_v25  ;;  %1273 = vmatpush1.bf16.msra.mxu0 %v4510_v26  ;;  %v4500_v25 = vld [vmem:[#allocation3 + $0x78] sm:$0xff]  }
  0x69   :  { %1081 = vmatprep.subr.bf16.mxu1 %v4515_v27  ;;  %1274 = vmatprep.subr.bf16.mxu0 %v4518_v28  ;;  %v4587_v26 = vld [vmem:[#allocation9 + $0x124] ss:$16 sps:$4 sm:$0xff]   ;;  %v4590_v27 = vld [vmem:[#allocation9 + $0x12c] ss:$16 sps:$4 sm:$0xff]   ;;  %v4585_v28 = vld [vmem:[#allocation9 + $0x120] ss:$16 sps:$4 sm:$0xff]  }
  0x6a   :  { %383 = vmatmul.mubr.bf16.gmra.mxu0 %v4486_v29  ;;  %463 = vmatmul.mubr.bf16.gmra.mxu1 %v4494_v30  ;;  %v4588_v29 = vld [vmem:[#allocation9 + $0x128] ss:$16 sps:$4 sm:$0xff]   ;;  %v4593_v30 = vld [vmem:[#allocation9 + $0x104] ss:$16 sps:$4 sm:$0xff]  }
  0x6b   :  { %392 = vmatprep.mubr.bf16.mxu0 %v4844_v0  ;;  %472 = vmatprep.mubr.bf16.mxu1 %v4844_v0 }
  0x6c   :  { %1082 = vmatpush1.bf16.msra.mxu1 %v4513_v31  ;;  %1275 = vmatpush1.bf16.msra.mxu0 %v4516_v32  ;;  %v4591_v31 = vld [vmem:[#allocation9 + $0x100] ss:$16 sps:$4 sm:$0xff]   ;;  %v4594_v32 = vld [vmem:[#allocation9 + $0x108] ss:$16 sps:$4 sm:$0xff]  }
  0x6d   :  { %1083 = vmatprep.subr.bf16.mxu1 %v4521_v33  ;;  %1276 = vmatprep.subr.bf16.mxu0 %v4524_v34  ;;  %v154_v33 = vlaneseq }
  0x6f   :  { %v4937_v34 = vshrl.u32 %v154_v33, 7 }
  0x70   :  { %1084 = vmatpush1.bf16.msra.mxu1 %v4519_v35  ;;  %1277 = vmatpush1.bf16.msra.mxu0 %v4522_v36 }
  0x71   :  { %1085 = vmatprep.subr.bf16.mxu1 %v4527_v37  ;;  %1278 = vmatprep.subr.bf16.mxu0 %v4530_v38  ;;  %v4940_v35 = vsub.s32 1, %v4937_v34  ;;  %v4943_v36 = vsub.s32 0, %v4937_v34 }
  0x72   :  { %393 = vmatmul.mubr.bf16.gmra.mxu0 %v4487_v39  ;;  %473 = vmatmul.mubr.bf16.gmra.mxu1 %v4495_v40  ;;  %v152_v39 = vld [vmem:[#allocation8] sm:$0x3] }
  0x73   :  { %402 = vmatprep.mubr.bf16.mxu0 %v4844_v0  ;;  %482 = vmatprep.mubr.bf16.mxu1 %v4844_v0  ;;  %8336 = vst [vmem:[#allocation17_spill] sm:$0xff] %v4940_v35  ;;  %8337 = vst [vmem:[#allocation18_spill] sm:$0xff] %v4943_v36 }
  0x74   :  { %1086 = vmatpush1.bf16.msra.mxu1 %v4525_v41  ;;  %1279 = vmatpush1.bf16.msra.mxu0 %v4528_v42  ;;  %v4950_v42 = vrot.slane %v152_v39, %v4940_v35 }
  0x75   :  { %1087 = vmatprep.subr.bf16.mxu1 %v4533_v43  ;;  %1280 = vmatprep.subr.bf16.mxu0 %v4536_v44  ;;  %v4953_v43 = vrot.slane %v152_v39, %v4943_v36 }
  0x78   :  { %1088 = vmatpush1.bf16.msra.mxu1 %v4531_v45  ;;  %1281 = vmatpush1.bf16.msra.mxu0 %v4534_v46 }
  0x79   :  { %1089 = vmatprep.subr.bf16.mxu1 %v4539_v47  ;;  %1282 = vmatprep.subr.bf16.mxu0 %v4542_v48 }
  0x7a   :  { %403 = vmatmul.mubr.bf16.gmra.mxu0 %v4488_v49  ;;  %483 = vmatmul.mubr.bf16.gmra.mxu1 %v4496_v50 }
  0x7b   :  { %412 = vmatprep.mubr.bf16.mxu0 %v4844_v0  ;;  %492 = vmatprep.mubr.bf16.mxu1 %v4844_v0 }
  0x7c   :  { %1090 = vmatpush1.bf16.msra.mxu1 %v4537_v51  ;;  %1283 = vmatpush1.bf16.msra.mxu0 %v4540_v52 }
  0x7d   :  { %1091 = vmatprep.subr.bf16.mxu1 %v4545_v53  ;;  %1284 = vmatprep.subr.bf16.mxu0 %v4548_v54 }
  0x80   :  { %1092 = vmatpush1.bf16.msra.mxu1 %v4543_v55  ;;  %1285 = vmatpush1.bf16.msra.mxu0 %v4546_v56 }
  0x81   :  { %1093 = vmatprep.subr.bf16.mxu1 %v4551_v58  ;;  %1286 = vmatprep.subr.bf16.mxu0 %v4554_v59 }
  0x82   :  { %413 = vmatmul.mubr.bf16.gmra.mxu0 %v4489_v57  ;;  %493 = vmatmul.mubr.bf16.gmra.mxu1 %v4497_v60 }
  0x83   :  { %422 = vmatprep.mubr.bf16.mxu0 %v4844_v0  ;;  %502 = vmatprep.mubr.bf16.mxu1 %v4844_v0 }
  0x84   :  { %1094 = vmatpush2.bf16.msra.mxu1 %v4549_v61  ;;  %1287 = vmatpush2.bf16.msra.mxu0 %v4552_v62 }
  0x85   :  { %1095 = vmatprep.subr.bf16.mxu1 %v4557_v63  ;;  %1288 = vmatprep.subr.bf16.mxu0 %v4560_v1 }
  0x88   :  { %1096 = vmatpush2.bf16.msra.mxu1 %v4555_v2  ;;  %1289 = vmatpush2.bf16.msra.mxu0 %v4558_v3 }
  0x89   :  { %1097 = vmatprep.subr.bf16.mxu1 %v4563_v4  ;;  %1290 = vmatprep.subr.bf16.mxu0 %v4566_v5 }
  0x8a   :  { %423 = vmatmul.mubr.bf16.gmra.mxu0 %v4490_v6  ;;  %503 = vmatmul.mubr.bf16.gmra.mxu1 %v4498_v7 }
  0x8b   :  { %432 = vmatprep.mubr.bf16.mxu0 %v4844_v0  ;;  %512 = vmatprep.mubr.bf16.mxu1 %v4844_v0 }
  0x8c   :  { %1098 = vmatpush2.bf16.msra.mxu1 %v4561_v8  ;;  %1291 = vmatpush2.bf16.msra.mxu0 %v4564_v9 }
  0x8d   :  { %1099 = vmatprep.subr.bf16.mxu1 %v4569_v10  ;;  %1292 = vmatprep.subr.bf16.mxu0 %v4572_v11 }
  0x90   :  { %1100 = vmatpush2.bf16.msra.mxu1 %v4567_v12  ;;  %1293 = vmatpush2.bf16.msra.mxu0 %v4570_v13 }
  0x91   :  { %1101 = vmatprep.subr.bf16.mxu1 %v4575_v14  ;;  %1294 = vmatprep.subr.bf16.mxu0 %v4578_v15 }
  0x92   :  { %433 = vmatmul.mubr.bf16.gmra.mxu0 %v4491_v16  ;;  %513 = vmatmul.mubr.bf16.gmra.mxu1 %v4499_v17 }
  0x93   :  { %442 = vmatprep.mubr.bf16.mxu0 %v4844_v0  ;;  %522 = vmatprep.mubr.bf16.mxu1 %v4844_v0  ;;  %v4596_v0 = vld [vmem:[#allocation9 + $0x10c] ss:$16 sps:$4 sm:$0xff]  }
  0x94   :  { %1102 = vmatpush2.bf16.msra.mxu1 %v4573_v18  ;;  %1295 = vmatpush2.bf16.msra.mxu0 %v4576_v19 }
  0x95   :  { %1103 = vmatprep.subr.bf16.mxu1 %v4581_v20  ;;  %1296 = vmatprep.subr.bf16.mxu0 %v4584_v21 }
  0x98   :  { %1104 = vmatpush2.bf16.msra.mxu1 %v4579_v22  ;;  %1297 = vmatpush2.bf16.msra.mxu0 %v4582_v23 }
  0x99   :  { %1105 = vmatprep.subr.bf16.mxu1 %v4587_v26  ;;  %1298 = vmatprep.subr.bf16.mxu0 %v4590_v27 }
  0x9a   :  { %443 = vmatmul.mubr.bf16.gmra.mxu0 %v4492_v24  ;;  %523 = vmatmul.mubr.bf16.gmra.mxu1 %v4500_v25 }
  0x9c   :  { %1106 = vmatpush2.bf16.msra.mxu1 %v4585_v28  ;;  %1299 = vmatpush2.bf16.msra.mxu0 %v4588_v29 }
  0x9d   :  { %1107 = vmatprep.subr.bf16.mxu1 %v4593_v30  ;;  %1300 = vmatprep.subr.bf16.mxu0 %v4596_v0 }
  0xa0   :  { %1108 = vmatpush2.bf16.msra.mxu1 %v4591_v31  ;;  %1301 = vmatpush2.bf16.msra.mxu0 %v4594_v32 }
 0x122   :  { %v374_v37 = vpop.f32.mrf.mxu0  ;;  %v4945_v38 = vpop.f32.mrf.mxu1 }
 0x123   :  { %v4969_v51 = vadd.f32 %v374_v37, %v4953_v43 }
 0x124   :  { %v376_v40 = vpop.f32.mrf.mxu0  ;;  %v4947_v41 = vpop.f32.mrf.mxu1 }
 0x125   :  { %v4963_v49 = vadd.f32 %v376_v40, %v4950_v42  ;;  %8341 = vst [vmem:[#allocation22_spill] sm:$0xff] %v4969_v51 }
 0x126   :  { %v378_v44 = vpop.f32.mrf.mxu0  ;;  %v4955_v45 = vpop.f32.mrf.mxu1 }
 0x127   :  { %v4958_v46 = vadd.f32 %v378_v44, %v4953_v43  ;;  %8339 = vst [vmem:[#allocation20_spill] sm:$0xff] %v4963_v49 }
 0x128   :  { %v380_v47 = vpop.f32.mrf.mxu0  ;;  %v4960_v48 = vpop.f32.mrf.mxu1 }
 0x129   :  { %8338 = vst [vmem:[#allocation19_spill] sm:$0xff] %v4958_v46  ;;  %v4966_v50 = vadd.f32 %v380_v47, %v4950_v42  ;;  %v661_v55 = vpack.c.bf16 %v4958_v46, %v4969_v51 }
 0x12a   :  { %v384_v52 = vpop.f32.mrf.mxu0  ;;  %v4971_v53 = vpop.f32.mrf.mxu1 }
 0x12b   :  { %8340 = vst [vmem:[#allocation21_spill] sm:$0xff] %v4966_v50  ;;  %v662_v54 = vpack.c.bf16 %v4966_v50, %v4963_v49  ;;  %v4991_v1 = vadd.f32 %v384_v52, %v4953_v43 }
 0x12c   :  { %v386_v56 = vpop.f32.mrf.mxu0  ;;  %v4977_v57 = vpop.f32.mrf.mxu1 }
 0x12d   :  { %1109 = vmatprep.mubr.bf16.mxu1 %v662_v54  ;;  %1302 = vmatprep.mubr.bf16.mxu0 %v662_v54  ;;  %v4985_v62 = vadd.f32 %v386_v56, %v4950_v42  ;;  %8345 = vst [vmem:[#allocation26_spill] sm:$0xff] %v4991_v1 }
 0x12e   :  { %v388_v58 = vpop.f32.mrf.mxu0  ;;  %1110 = vmatmul.mubr.bf16.vlgmr.msra.gmra.mxu1 %v661_v55  ;;  %1303 = vmatmul.mubr.bf16.vlgmr.msra.gmra.mxu0 %v661_v55  ;;  %v4982_v61 = vpop.f32.mrf.mxu1 }
 0x12f   :  { %v4980_v59 = vadd.f32 %v388_v58, %v4953_v43  ;;  %8343 = vst [vmem:[#allocation24_spill] sm:$0xff] %v4985_v62 }
 0x130   :  { %v390_v60 = vpop.f32.mrf.mxu0  ;;  %v4997_v6 = vpop.f32.mrf.mxu1 }
 0x131   :  { %8342 = vst [vmem:[#allocation23_spill] sm:$0xff] %v4980_v59  ;;  %v4988_v63 = vadd.f32 %v390_v60, %v4950_v42  ;;  %v663_v4 = vpack.c.bf16 %v4980_v59, %v4991_v1 }
 0x132   :  { %v394_v2 = vpop.f32.mrf.mxu0  ;;  %v5002_v10 = vpop.f32.mrf.mxu1 }
 0x133   :  { %8344 = vst [vmem:[#allocation25_spill] sm:$0xff] %v4988_v63  ;;  %v664_v3 = vpack.c.bf16 %v4988_v63, %v4985_v62  ;;  %v5011_v13 = vadd.f32 %v394_v2, %v4953_v43 }
 0x134   :  { %v396_v5 = vpop.f32.mrf.mxu0  ;;  %v5017_v18 = vpop.f32.mrf.mxu1 }
 0x135   :  { %1119 = vmatprep.mubr.bf16.mxu1 %v664_v3  ;;  %1312 = vmatprep.mubr.bf16.mxu0 %v664_v3  ;;  %v5005_v11 = vadd.f32 %v396_v5, %v4950_v42  ;;  %8349 = vst [vmem:[#allocation30_spill] sm:$0xff] %v5011_v13 }
 0x136   :  { %v398_v7 = vpop.f32.mrf.mxu0  ;;  %1120 = vmatmul.mubr.bf16.gmra.mxu1 %v663_v4  ;;  %1313 = vmatmul.mubr.bf16.gmra.mxu0 %v663_v4  ;;  %v5022_v22 = vpop.f32.mrf.mxu1 }
 0x137   :  { %v5000_v8 = vadd.f32 %v398_v7, %v4953_v43  ;;  %8347 = vst [vmem:[#allocation28_spill] sm:$0xff] %v5005_v11 }
 0x138   :  { %v400_v9 = vpop.f32.mrf.mxu0  ;;  %v5037_v30 = vpop.f32.mrf.mxu1 }
 0x139   :  { %8346 = vst [vmem:[#allocation27_spill] sm:$0xff] %v5000_v8  ;;  %v5008_v12 = vadd.f32 %v400_v9, %v4950_v42  ;;  %v665_v16 = vpack.c.bf16 %v5000_v8, %v5011_v13 }
 0x13a   :  { %v404_v14 = vpop.f32.mrf.mxu0  ;;  %v5042_v33 = vpop.f32.mrf.mxu1 }
 0x13b   :  { %8348 = vst [vmem:[#allocation29_spill] sm:$0xff] %v5008_v12  ;;  %v666_v15 = vpack.c.bf16 %v5008_v12, %v5005_v11  ;;  %v5031_v25 = vadd.f32 %v404_v14, %v4953_v43 }
 0x13c   :  { %v406_v17 = vpop.f32.mrf.mxu0  ;;  %v5057_v55 = vpop.f32.mrf.mxu1 }
 0x13d   :  { %1129 = vmatprep.mubr.bf16.mxu1 %v666_v15  ;;  %1322 = vmatprep.mubr.bf16.mxu0 %v666_v15  ;;  %v5025_v23 = vadd.f32 %v406_v17, %v4950_v42  ;;  %8353 = vst [vmem:[#allocation34_spill] sm:$0xff] %v5031_v25 }
 0x13e   :  { %v408_v19 = vpop.f32.mrf.mxu0  ;;  %1130 = vmatmul.mubr.bf16.gmra.mxu1 %v665_v16  ;;  %1323 = vmatmul.mubr.bf16.gmra.mxu0 %v665_v16  ;;  %v5062_v2 = vpop.f32.mrf.mxu1 }
 0x13f   :  { %v5020_v20 = vadd.f32 %v408_v19, %v4953_v43  ;;  %8351 = vst [vmem:[#allocation32_spill] sm:$0xff] %v5025_v23 }
 0x140   :  { %v410_v21 = vpop.f32.mrf.mxu0  ;;  %v5077_v16 = vpop.f32.mrf.mxu1 }
 0x141   :  { %8350 = vst [vmem:[#allocation31_spill] sm:$0xff] %v5020_v20  ;;  %v5028_v24 = vadd.f32 %v410_v21, %v4950_v42  ;;  %v667_v28 = vpack.c.bf16 %v5020_v20, %v5031_v25 }
 0x142   :  { %v414_v26 = vpop.f32.mrf.mxu0 }
 0x143   :  { %8352 = vst [vmem:[#allocation33_spill] sm:$0xff] %v5028_v24  ;;  %v668_v27 = vpack.c.bf16 %v5028_v24, %v5025_v23  ;;  %v5051_v40 = vadd.f32 %v414_v26, %v4953_v43  ;;  %v5082_v26 = vpop.f32.mrf.mxu1 }
 0x144   :  { %v416_v29 = vpop.f32.mrf.mxu0 }
 0x145   :  { %1139 = vmatprep.mubr.bf16.mxu1 %v668_v27  ;;  %1332 = vmatprep.mubr.bf16.mxu0 %v668_v27  ;;  %v5045_v37 = vadd.f32 %v416_v29, %v4950_v42  ;;  %8357 = vst [vmem:[#allocation38_spill] sm:$0xff] %v5051_v40 }
 0x146   :  { %v418_v0 = vpop.f32.mrf.mxu0  ;;  %1140 = vmatmul.mubr.bf16.gmra.mxu1 %v667_v28  ;;  %1333 = vmatmul.mubr.bf16.gmra.mxu0 %v667_v28 }
 0x147   :  { %v5040_v31 = vadd.f32 %v418_v0, %v4953_v43  ;;  %8355 = vst [vmem:[#allocation36_spill] sm:$0xff] %v5045_v37 }
 0x148   :  { %v420_v32 = vpop.f32.mrf.mxu0 }
 0x149   :  { %8354 = vst [vmem:[#allocation35_spill] sm:$0xff] %v5040_v31  ;;  %v5048_v39 = vadd.f32 %v420_v32, %v4950_v42  ;;  %v669_v52 = vpack.c.bf16 %v5040_v31, %v5051_v40 }
 0x14a   :  { %v424_v44 = vpop.f32.mrf.mxu0 }
 0x14b   :  { %8356 = vst [vmem:[#allocation37_spill] sm:$0xff] %v5048_v39  ;;  %v670_v47 = vpack.c.bf16 %v5048_v39, %v5045_v37  ;;  %v5071_v5 = vadd.f32 %v424_v44, %v4953_v43 }
 0x14c   :  { %v426_v54 = vpop.f32.mrf.mxu0 }
 0x14d   :  { %1149 = vmatprep.mubr.bf16.mxu1 %v670_v47  ;;  %1342 = vmatprep.mubr.bf16.mxu0 %v670_v47  ;;  %v5065_v3 = vadd.f32 %v426_v54, %v4950_v42  ;;  %8361 = vst [vmem:[#allocation42_spill] sm:$0xff] %v5071_v5 }
 0x14e   :  { %v428_v56 = vpop.f32.mrf.mxu0  ;;  %1150 = vmatmul.mubr.bf16.gmra.mxu1 %v669_v52  ;;  %1343 = vmatmul.mubr.bf16.gmra.mxu0 %v669_v52  ;;  %v496_v52 = vpop.f32.mrf.mxu1 }
 0x14f   :  { %v5060_v58 = vadd.f32 %v428_v56, %v4953_v43  ;;  %8359 = vst [vmem:[#allocation40_spill] sm:$0xff] %v5065_v3  ;;  %v5099_v56 = vadd.f32 %v4947_v41, %v4950_v42 }
 0x150   :  { %v430_v60 = vpop.f32.mrf.mxu0 }
 0x151   :  { %8358 = vst [vmem:[#allocation39_spill] sm:$0xff] %v5060_v58  ;;  %v5068_v4 = vadd.f32 %v430_v60, %v4950_v42  ;;  %v671_v14 = vpack.c.bf16 %v5060_v58, %v5071_v5  ;;  %8366 = vst [vmem:[#allocation47_spill] sm:$0xff] %v5099_v56  ;;  %v5103_v60 = vadd.f32 %v4960_v48, %v4950_v42 }
 0x152   :  { %v434_v7 = vpop.f32.mrf.mxu0 }
 0x153   :  { %8360 = vst [vmem:[#allocation41_spill] sm:$0xff] %v5068_v4  ;;  %v672_v9 = vpack.c.bf16 %v5068_v4, %v5065_v3  ;;  %v5091_v29 = vadd.f32 %v434_v7, %v4953_v43  ;;  %8367 = vst [vmem:[#allocation48_spill] sm:$0xff] %v5103_v60  ;;  %v678_v48 = vpack.c.bf16 %v5103_v60, %v5099_v56  ;;  %v4639_v60 = vld [vmem:[#allocation11] ss:$8 sps:$4 sm:$0xff]  }
 0x154   :  { %v436_v15 = vpop.f32.mrf.mxu0  ;;  %v4642_v56 = vld [vmem:[#allocation11 + $0x100] ss:$8 sps:$4 sm:$0xff]  }
 0x155   :  { %1159 = vmatprep.mubr.bf16.mxu1 %v672_v9  ;;  %1352 = vmatprep.mubr.bf16.mxu0 %v672_v9  ;;  %v5085_v27 = vadd.f32 %v436_v15, %v4950_v42  ;;  %8365 = vst [vmem:[#allocation46_spill] sm:$0xff] %v5091_v29 }
 0x156   :  { %v438_v17 = vpop.f32.mrf.mxu0  ;;  %1160 = vmatmul.mubr.bf16.gmra.mxu1 %v671_v14  ;;  %1353 = vmatmul.mubr.bf16.gmra.mxu0 %v671_v14  ;;  %v5108_v14 = vpop.f32.mrf.mxu1 }
 0x157   :  { %v5080_v19 = vadd.f32 %v438_v17, %v4953_v43  ;;  %8363 = vst [vmem:[#allocation44_spill] sm:$0xff] %v5085_v27 }
 0x158   :  { %v440_v21 = vpop.f32.mrf.mxu0 }
 0x159   :  { %8362 = vst [vmem:[#allocation43_spill] sm:$0xff] %v5080_v19  ;;  %v5088_v28 = vadd.f32 %v440_v21, %v4950_v42  ;;  %v673_v44 = vpack.c.bf16 %v5080_v19, %v5091_v29 }
 0x15a   :  { %v444_v0 = vpop.f32.mrf.mxu0 }
 0x15b   :  { %8364 = vst [vmem:[#allocation45_spill] sm:$0xff] %v5088_v28  ;;  %v674_v32 = vpack.c.bf16 %v5088_v28, %v5085_v27  ;;  %v5117_v21 = vadd.f32 %v444_v0, %v4953_v43  ;;  %v5131_v0 = vadd.f32 %v4997_v6, %v4950_v42  ;;  %v5147_v6 = vadd.f32 %v5017_v18, %v4950_v42 }
 0x15c   :  { %v446_v47 = vpop.f32.mrf.mxu0 }
 0x15d   :  { %1169 = vmatprep.mubr.bf16.mxu1 %v674_v32  ;;  %1362 = vmatprep.mubr.bf16.mxu0 %v674_v32  ;;  %v5111_v15 = vadd.f32 %v446_v47, %v4950_v42  ;;  %8371 = vst [vmem:[#allocation52_spill] sm:$0xff] %v5117_v21  ;;  %v5127_v47 = vadd.f32 %v4977_v57, %v4950_v42  ;;  %8373 = vst [vmem:[#allocation54_spill] sm:$0xff] %v5131_v0 }
 0x15e   :  { %v448_v54 = vpop.f32.mrf.mxu0  ;;  %1170 = vmatmul.mubr.bf16.gmra.mxu1 %v673_v44  ;;  %1363 = vmatmul.mubr.bf16.gmra.mxu0 %v673_v44  ;;  %v500_v44 = vpop.f32.mrf.mxu1  ;;  %8376 = vst [vmem:[#allocation57_spill] sm:$0xff] %v5147_v6 }
 0x15f   :  { %v5106_v7 = vadd.f32 %v448_v54, %v4953_v43  ;;  %8369 = vst [vmem:[#allocation50_spill] sm:$0xff] %v5111_v15  ;;  %8372 = vst [vmem:[#allocation53_spill] sm:$0xff] %v5127_v47  ;;  %v5135_v54 = vadd.f32 %v4945_v38, %v4953_v43  ;;  %v5151_v38 = vadd.f32 %v5037_v30, %v4950_v42 }
 0x160   :  { %v450_v9 = vpop.f32.mrf.mxu0  ;;  %v5167_v30 = vadd.f32 %v5057_v55, %v4950_v42 }
 0x161   :  { %8368 = vst [vmem:[#allocation49_spill] sm:$0xff] %v5106_v7  ;;  %v5114_v17 = vadd.f32 %v450_v9, %v4950_v42  ;;  %v675_v32 = vpack.c.bf16 %v5106_v7, %v5117_v21  ;;  %8374 = vst [vmem:[#allocation55_spill] sm:$0xff] %v5135_v54  ;;  %v5139_v9 = vadd.f32 %v4955_v45, %v4953_v43 }
 0x162   :  { %8377 = vst [vmem:[#allocation58_spill] sm:$0xff] %v5151_v38  ;;  %v5155_v45 = vadd.f32 %v4971_v53, %v4953_v43  ;;  %8380 = vst [vmem:[#allocation61_spill] sm:$0xff] %v5167_v30  ;;  %v5171_v53 = vadd.f32 %v5077_v16, %v4950_v42  ;;  %v5186_v16 = vadd.f32 %v496_v52, %v4950_v42 }
 0x163   :  { %8370 = vst [vmem:[#allocation51_spill] sm:$0xff] %v5114_v17  ;;  %v676_v41 = vpack.c.bf16 %v5114_v17, %v5111_v15  ;;  %8375 = vst [vmem:[#allocation56_spill] sm:$0xff] %v5139_v9  ;;  %v677_v57 = vpack.c.bf16 %v5139_v9, %v5135_v54  ;;  %v4641_v9 = vld [vmem:[#allocation11 + $0x4] ss:$8 sps:$4 sm:$0xff]  }
 0x164   :  { %8378 = vst [vmem:[#allocation59_spill] sm:$0xff] %v5155_v45  ;;  %8381 = vst [vmem:[#allocation62_spill] sm:$0xff] %v5171_v53  ;;  %v4644_v54 = vld [vmem:[#allocation11 + $0x104] ss:$8 sps:$4 sm:$0xff]  }
 0x165   :  { %1179 = vmatprep.mubr.bf16.mxu1 %v676_v41  ;;  %1372 = vmatprep.mubr.bf16.mxu0 %v676_v41  ;;  %v504_v41 = vpop.f32.mrf.mxu1  ;;  %8384 = vst [vmem:[#allocation65_spill] sm:$0xff] %v5186_v16 }
 0x166   :  { %1180 = vmatmul.mubr.bf16.gmra.mxu1 %v675_v32  ;;  %1373 = vmatmul.mubr.bf16.gmra.mxu0 %v675_v32  ;;  %v680_v32 = vpack.c.bf16 %v5131_v0, %v5127_v47  ;;  %v5159_v0 = vadd.f32 %v4982_v61, %v4953_v43  ;;  %v5175_v61 = vadd.f32 %v5002_v10, %v4953_v43 }
 0x167   :  { %1189 = vmatprep.mubr.bf16.mxu1 %v678_v48  ;;  %1382 = vmatprep.mubr.bf16.mxu0 %v678_v48  ;;  %v506_v48 = vpop.f32.mrf.mxu1  ;;  %v5189_v10 = vadd.f32 %v500_v44, %v4950_v42 }
 0x168   :  { %8379 = vst [vmem:[#allocation60_spill] sm:$0xff] %v5159_v0  ;;  %v679_v18 = vpack.c.bf16 %v5159_v0, %v5155_v45  ;;  %8382 = vst [vmem:[#allocation63_spill] sm:$0xff] %v5175_v61  ;;  %v5204_v44 = vadd.f32 %v506_v48, %v4950_v42 }
 0x169   :  { %v508_v47 = vpop.f32.mrf.mxu1  ;;  %8385 = vst [vmem:[#allocation66_spill] sm:$0xff] %v5189_v10 }
 0x16a   :  { %8388 = vst [vmem:[#allocation69_spill] sm:$0xff] %v5204_v44 }
 0x16e   :  { %1190 = vmatmul.mubr.bf16.gmra.mxu1 %v677_v57  ;;  %1383 = vmatmul.mubr.bf16.gmra.mxu0 %v677_v57  ;;  %v682_v57 = vpack.c.bf16 %v5151_v38, %v5147_v6  ;;  %v5179_v38 = vadd.f32 %v5022_v22, %v4953_v43  ;;  %v5193_v22 = vadd.f32 %v5042_v33, %v4953_v43 }
 0x16f   :  { %1199 = vmatprep.mubr.bf16.mxu1 %v680_v32  ;;  %1392 = vmatprep.mubr.bf16.mxu0 %v680_v32  ;;  %v510_v32 = vpop.f32.mrf.mxu1 }
 0x170   :  { %8383 = vst [vmem:[#allocation64_spill] sm:$0xff] %v5179_v38  ;;  %v681_v55 = vpack.c.bf16 %v5179_v38, %v5175_v61  ;;  %8386 = vst [vmem:[#allocation67_spill] sm:$0xff] %v5193_v22  ;;  %v5207_v33 = vadd.f32 %v510_v32, %v4950_v42 }
 0x171   :  { %v514_v6 = vpop.f32.mrf.mxu1 }
 0x172   :  { %8389 = vst [vmem:[#allocation70_spill] sm:$0xff] %v5207_v33 }
 0x176   :  { %1200 = vmatmul.mubr.bf16.gmra.mxu1 %v679_v18  ;;  %1393 = vmatmul.mubr.bf16.gmra.mxu0 %v679_v18  ;;  %v684_v18 = vpack.c.bf16 %v5171_v53, %v5167_v30  ;;  %v5197_v53 = vadd.f32 %v5062_v2, %v4953_v43  ;;  %v5211_v2 = vadd.f32 %v5082_v26, %v4953_v43 }
 0x177   :  { %1209 = vmatprep.mubr.bf16.mxu1 %v682_v57  ;;  %1402 = vmatprep.mubr.bf16.mxu0 %v682_v57  ;;  %v516_v57 = vpop.f32.mrf.mxu1 }
 0x178   :  { %8387 = vst [vmem:[#allocation68_spill] sm:$0xff] %v5197_v53  ;;  %v683_v52 = vpack.c.bf16 %v5197_v53, %v5193_v22  ;;  %8390 = vst [vmem:[#allocation71_spill] sm:$0xff] %v5211_v2  ;;  %v5222_v32 = vadd.f32 %v516_v57, %v4950_v42 }
 0x179   :  { %v518_v30 = vpop.f32.mrf.mxu1 }
 0x17a   :  { %8392 = vst [vmem:[#allocation73_spill] sm:$0xff] %v5222_v32 }
 0x17b   :  { %v520_v38 = vpop.f32.mrf.mxu1 }
 0x17c   :  { %v5225_v26 = vadd.f32 %v520_v38, %v4950_v42  ;;  %v5247_v38 = vadd.f32 %v518_v30, %v4953_v43  ;;  %v4597_v30 = vld [vmem:[#allocation11 + $0x70] ss:$8 sps:$4 sm:$0xff]  }
 0x17e   :  { %1210 = vmatmul.mubr.bf16.gmra.mxu1 %v681_v55  ;;  %1403 = vmatmul.mubr.bf16.gmra.mxu0 %v681_v55  ;;  %v686_v55 = vpack.c.bf16 %v5189_v10, %v5186_v16  ;;  %v524_v10 = vpop.f32.mrf.mxu1  ;;  %8393 = vst [vmem:[#allocation74_spill] sm:$0xff] %v5225_v26  ;;  %8399 = vst [vmem:[#allocation80_spill] sm:$0xff] %v5247_v38 }
 0x17f   :  { %1219 = vmatprep.mubr.bf16.mxu1 %v684_v18  ;;  %1412 = vmatprep.mubr.bf16.mxu0 %v684_v18  ;;  %v5215_v18 = vadd.f32 %v5108_v14, %v4953_v43  ;;  %v5228_v14 = vadd.f32 %v504_v41, %v4953_v43 }
 0x180   :  { %v526_v16 = vpop.f32.mrf.mxu1 }
 0x181   :  { %8391 = vst [vmem:[#allocation72_spill] sm:$0xff] %v5215_v18  ;;  %v685_v48 = vpack.c.bf16 %v5215_v18, %v5211_v2  ;;  %8394 = vst [vmem:[#allocation75_spill] sm:$0xff] %v5228_v14 }
 0x186   :  { %1220 = vmatmul.mubr.bf16.gmra.mxu1 %v683_v52  ;;  %1413 = vmatmul.mubr.bf16.gmra.mxu0 %v683_v52  ;;  %v688_v52 = vpack.c.bf16 %v5207_v33, %v5204_v44  ;;  %v528_v33 = vpop.f32.mrf.mxu1  ;;  %v690_v44 = vpack.c.bf16 %v5225_v26, %v5222_v32 }
 0x187   :  { %1229 = vmatprep.mubr.bf16.mxu1 %v686_v55  ;;  %1422 = vmatprep.mubr.bf16.mxu0 %v686_v55  ;;  %v5231_v55 = vadd.f32 %v508_v47, %v4953_v43  ;;  %v5244_v47 = vadd.f32 %v514_v6, %v4953_v43 }
 0x188   :  { %v530_v57 = vpop.f32.mrf.mxu1 }
 0x189   :  { %8395 = vst [vmem:[#allocation76_spill] sm:$0xff] %v5231_v55  ;;  %v5241_v41 = vadd.f32 %v530_v57, %v4950_v42  ;;  %8398 = vst [vmem:[#allocation79_spill] sm:$0xff] %v5244_v47  ;;  %v4600_v57 = vld [vmem:[#allocation11 + $0x170] ss:$8 sps:$4 sm:$0xff]  }
 0x18b   :  { %8397 = vst [vmem:[#allocation78_spill] sm:$0xff] %v5241_v41 }
 0x18e   :  { %1230 = vmatmul.mubr.bf16.gmra.mxu1 %v685_v48  ;;  %1423 = vmatmul.mubr.bf16.gmra.mxu0 %v685_v48  ;;  %v687_v48 = vpack.c.bf16 %v5231_v55, %v5228_v14 }
 0x18f   :  { %1239 = vmatprep.mubr.bf16.mxu1 %v688_v52  ;;  %1432 = vmatprep.mubr.bf16.mxu0 %v688_v52  ;;  %v5238_v52 = vadd.f32 %v526_v16, %v4950_v42  ;;  %v5254_v16 = vadd.f32 %v524_v10, %v4953_v43  ;;  %v5257_v42 = vadd.f32 %v528_v33, %v4953_v43  ;;  %v4606_v10 = vld [vmem:[#allocation11 + $0x160] ss:$8 sps:$4 sm:$0xff]   ;;  %v4609_v43 = vld [vmem:[#allocation11 + $0x50] ss:$8 sps:$4 sm:$0xff]   ;;  %v4611_v33 = vld [vmem:[#allocation11 + $0x54] ss:$8 sps:$4 sm:$0xff]  }
 0x191   :  { %8396 = vst [vmem:[#allocation77_spill] sm:$0xff] %v5238_v52  ;;  %v692_v26 = vpack.c.bf16 %v5241_v41, %v5238_v52  ;;  %8400 = vst [vmem:[#allocation81_spill] sm:$0xff] %v5254_v16  ;;  %v691_v6 = vpack.c.bf16 %v5257_v42, %v5254_v16  ;;  %v4602_v52 = vld [vmem:[#allocation11 + $0x174] ss:$8 sps:$4 sm:$0xff]  }
 0x192   :  { %8401 = vst [vmem:[#allocation82_spill] sm:$0xff] %v5257_v42  ;;  %3048 = vmatprep.subr.bf16.mxu0 %v4602_v52  ;;  %v4612_v42 = vld [vmem:[#allocation11 + $0x150] ss:$8 sps:$4 sm:$0xff]   ;;  %v4617_v52 = vld [vmem:[#allocation11 + $0x44] ss:$8 sps:$4 sm:$0xff]  }
 0x193   :  { %3049 = vmatpush1.bf16.msra.mxu0 %v4600_v57  ;;  %v4620_v57 = vld [vmem:[#allocation11 + $0x144] ss:$8 sps:$4 sm:$0xff]  }
 0x196   :  { %1240 = vmatmul.mubr.bf16.gmra.mxu1 %v687_v48  ;;  %1433 = vmatmul.mubr.bf16.gmra.mxu0 %v687_v48  ;;  %v689_v48 = vpack.c.bf16 %v5247_v38, %v5244_v47  ;;  %v4608_v38 = vld [vmem:[#allocation11 + $0x164] ss:$8 sps:$4 sm:$0xff]  }
 0x197   :  { %1249 = vmatprep.mubr.bf16.mxu1 %v690_v44  ;;  %1442 = vmatprep.mubr.bf16.mxu0 %v690_v44  ;;  %v4599_v44 = vld [vmem:[#allocation11 + $0x74] ss:$8 sps:$4 sm:$0xff]  }
 0x198   :  { %2855 = vmatprep.subr.bf16.mxu1 %v4599_v44  ;;  %3050 = vmatprep.subr.bf16.mxu0 %v4608_v38  ;;  %v4615_v44 = vld [vmem:[#allocation11 + $0x40] ss:$8 sps:$4 sm:$0xff]   ;;  %v4623_v38 = vld [vmem:[#allocation11 + $0x34] ss:$8 sps:$4 sm:$0xff]  }
 0x199   :  { %2856 = vmatpush1.bf16.msra.mxu1 %v4597_v30  ;;  %3051 = vmatpush1.bf16.msra.mxu0 %v4606_v10  ;;  %v4618_v30 = vld [vmem:[#allocation11 + $0x140] ss:$8 sps:$4 sm:$0xff]   ;;  %v4626_v10 = vld [vmem:[#allocation11 + $0x134] ss:$8 sps:$4 sm:$0xff]  }
 0x19e   :  { %1250 = vmatmul.mubr.bf16.gmra.mxu1 %v689_v48  ;;  %1443 = vmatmul.mubr.bf16.gmra.mxu0 %v689_v48  ;;  %v4605_v48 = vld [vmem:[#allocation11 + $0x64] ss:$8 sps:$4 sm:$0xff]  }
 0x19f   :  { %1259 = vmatprep.mubr.bf16.mxu1 %v692_v26  ;;  %1452 = vmatprep.mubr.bf16.mxu0 %v692_v26  ;;  %v4603_v26 = vld [vmem:[#allocation11 + $0x60] ss:$8 sps:$4 sm:$0xff]  }
 0x1a0   :  { %2857 = vmatprep.subr.bf16.mxu1 %v4605_v48  ;;  %v4621_v48 = vld [vmem:[#allocation11 + $0x30] ss:$8 sps:$4 sm:$0xff]  }
 0x1a1   :  { %2858 = vmatpush1.bf16.msra.mxu1 %v4603_v26  ;;  %v4624_v26 = vld [vmem:[#allocation11 + $0x130] ss:$8 sps:$4 sm:$0xff]  }
 0x1a2   :  { %2859 = vmatprep.subr.bf16.mxu1 %v4611_v33  ;;  %v4627_v33 = vld [vmem:[#allocation11 + $0x20] ss:$8 sps:$4 sm:$0xff]  }
 0x1a5   :  { %2860 = vmatpush1.bf16.msra.mxu1 %v4609_v43  ;;  %v4630_v43 = vld [vmem:[#allocation11 + $0x120] ss:$8 sps:$4 sm:$0xff]  }
 0x1a6   :  { %1260 = vmatmul.mubr.bf16.gmra.mxu1 %v691_v6  ;;  %1453 = vmatmul.mubr.bf16.gmra.mxu0 %v691_v6  ;;  %v4614_v6 = vld [vmem:[#allocation11 + $0x154] ss:$8 sps:$4 sm:$0xff]  }
 0x1a7   :  { %3052 = vmatprep.subr.bf16.mxu0 %v4614_v6  ;;  %2861 = vmatprep.subr.bf16.mxu1 %v4617_v52  ;;  %v4629_v6 = vld [vmem:[#allocation11 + $0x24] ss:$8 sps:$4 sm:$0xff]   ;;  %v4633_v52 = vld [vmem:[#allocation11 + $0x10] ss:$8 sps:$4 sm:$0xff]  }
 0x1a8   :  { %3053 = vmatpush1.bf16.msra.mxu0 %v4612_v42  ;;  %v4632_v42 = vld [vmem:[#allocation11 + $0x124] ss:$8 sps:$4 sm:$0xff]  }
 0x1a9   :  { %3054 = vmatprep.subr.bf16.mxu0 %v4620_v57  ;;  %2862 = vmatpush1.bf16.msra.mxu1 %v4615_v44  ;;  %v4635_v57 = vld [vmem:[#allocation11 + $0x14] ss:$8 sps:$4 sm:$0xff]   ;;  %v4636_v44 = vld [vmem:[#allocation11 + $0x110] ss:$8 sps:$4 sm:$0xff]  }
 0x1aa   :  { %2863 = vmatprep.subr.bf16.mxu1 %v4623_v38 }
 0x1ac   :  { %3055 = vmatpush1.bf16.msra.mxu0 %v4618_v30  ;;  %v4638_v30 = vld [vmem:[#allocation11 + $0x114] ss:$8 sps:$4 sm:$0xff]  }
 0x1ad   :  { %3056 = vmatprep.subr.bf16.mxu0 %v4626_v10  ;;  %2864 = vmatpush1.bf16.msra.mxu1 %v4621_v48 }
 0x1ae   :  { %2865 = vmatprep.subr.bf16.mxu1 %v4629_v6 }
 0x1b0   :  { %3057 = vmatpush1.bf16.msra.mxu0 %v4624_v26 }
 0x1b1   :  { %3058 = vmatprep.subr.bf16.mxu0 %v4632_v42  ;;  %2866 = vmatpush1.bf16.msra.mxu1 %v4627_v33 }
 0x1b2   :  { %2867 = vmatprep.subr.bf16.mxu1 %v4635_v57 }
 0x1b4   :  { %3059 = vmatpush1.bf16.msra.mxu0 %v4630_v43 }
 0x1b5   :  { %3060 = vmatprep.subr.bf16.mxu0 %v4638_v30  ;;  %2868 = vmatpush1.bf16.msra.mxu1 %v4633_v52 }
 0x1b6   :  { %2869 = vmatprep.subr.bf16.mxu1 %v4641_v9 }
 0x1b8   :  { %3061 = vmatpush1.bf16.msra.mxu0 %v4636_v44 }
 0x1b9   :  { %3062 = vmatprep.subr.bf16.mxu0 %v4644_v54  ;;  %2870 = vmatpush1.bf16.msra.mxu1 %v4639_v60 }
 0x1bc   :  { %3063 = vmatpush1.bf16.msra.mxu0 %v4642_v56 }
 0x1ee   :  { %v5261_v38 = vpop.f32.mrf.mxu1  ;;  %v5263_v48 = vpop.f32.mrf.mxu0 }
 0x1ef   :  { %v1615_v56 = vmul.f32 %v5261_v38, %v5261_v38  ;;  %v1617_v60 = vmul.f32 %v5263_v48, %v5263_v48 }
 0x1f0   :  { %v5265_v26 = vpop.f32.mrf.mxu1  ;;  %v5267_v10 = vpop.f32.mrf.mxu0 }
 0x1f1   :  { %v1616_v3 = vmul.f32 %v5265_v26, %v5265_v26  ;;  %v1618_v25 = vmul.f32 %v5267_v10, %v5267_v10 }
 0x1f2   :  { %v5269_v6 = vpop.f32.mrf.mxu1  ;;  %v5271_v33 = vpop.f32.mrf.mxu0 }
 0x1f3   :  { %v1619_v4 = vmul.f32 %v5269_v6, %v5269_v6  ;;  %v1621_v54 = vmul.f32 %v5271_v33, %v5271_v33  ;;  %v1463_v40 = vadd.f32 %v5269_v6, %v5261_v38  ;;  %v1537_v24 = vadd.f32 %v5271_v33, %v5263_v48 }
 0x1f4   :  { %v5273_v43 = vpop.f32.mrf.mxu1  ;;  %v5275_v42 = vpop.f32.mrf.mxu0 }
 0x1f5   :  { %8402 = vst [vmem:[#allocation83_spill] sm:$0xff] %v5275_v42  ;;  %v1620_v5 = vmul.f32 %v5273_v43, %v5273_v43  ;;  %v1622_v39 = vmul.f32 %v5275_v42, %v5275_v42  ;;  %v1743_v12 = vadd.f32 %v1619_v4, %v1615_v56  ;;  %v1817_v8 = vadd.f32 %v1621_v54, %v1617_v60 }
 0x1f6   :  { %v5277_v57 = vpop.f32.mrf.mxu1  ;;  %v5279_v52 = vpop.f32.mrf.mxu0  ;;  %v1500_v1 = vadd.f32 %v5273_v43, %v5265_v26  ;;  %v1574_v50 = vadd.f32 %v5275_v42, %v5267_v10 }
 0x1f7   :  { %8403 = vst [vmem:[#allocation84_spill] sm:$0xff] %v5277_v57  ;;  %8404 = vst [vmem:[#allocation85_spill] sm:$0xff] %v5279_v52  ;;  %v1623_v20 = vmul.f32 %v5277_v57, %v5277_v57  ;;  %v1625_v23 = vmul.f32 %v5279_v52, %v5279_v52  ;;  %v1464_v59 = vadd.f32 %v1463_v40, %v5277_v57 }
 0x1f8   :  { %v5281_v44 = vpop.f32.mrf.mxu1  ;;  %v5283_v30 = vpop.f32.mrf.mxu0  ;;  %v1538_v62 = vadd.f32 %v1537_v24, %v5279_v52  ;;  %v1780_v46 = vadd.f32 %v1620_v5, %v1616_v3  ;;  %v1854_v54 = vadd.f32 %v1622_v39, %v1618_v25 }
 0x1f9   :  { %8405 = vst [vmem:[#allocation86_spill] sm:$0xff] %v5281_v44  ;;  %8406 = vst [vmem:[#allocation87_spill] sm:$0xff] %v5283_v30  ;;  %v1624_v11 = vmul.f32 %v5281_v44, %v5281_v44  ;;  %v1626_v4 = vmul.f32 %v5283_v30, %v5283_v30  ;;  %v1744_v40 = vadd.f32 %v1743_v12, %v1623_v20 }
 0x1fa   :  { %v5285_v16 = vpop.f32.mrf.mxu1  ;;  %v5287_v32 = vpop.f32.mrf.mxu0  ;;  %v1818_v24 = vadd.f32 %v1817_v8, %v1625_v23  ;;  %v1501_v51 = vadd.f32 %v1500_v1, %v5281_v44  ;;  %v1575_v3 = vadd.f32 %v1574_v50, %v5283_v30 }
 0x1fb   :  { %8407 = vst [vmem:[#allocation88_spill] sm:$0xff] %v5285_v16  ;;  %8408 = vst [vmem:[#allocation89_spill] sm:$0xff] %v5287_v32  ;;  %v1627_v56 = vmul.f32 %v5285_v16, %v5285_v16  ;;  %v1629_v41 = vmul.f32 %v5287_v32, %v5287_v32  ;;  %v1781_v52 = vadd.f32 %v1780_v46, %v1624_v11 }
 0x1fc   :  { %v5289_v47 = vpop.f32.mrf.mxu1  ;;  %v5291_v55 = vpop.f32.mrf.mxu0  ;;  %v1465_v8 = vadd.f32 %v1464_v59, %v5285_v16  ;;  %v1539_v1 = vadd.f32 %v1538_v62, %v5287_v32  ;;  %v1855_v50 = vadd.f32 %v1854_v54, %v1626_v4 }
 0x1fd   :  { %8409 = vst [vmem:[#allocation90_spill] sm:$0xff] %v5289_v47  ;;  %v1628_v25 = vmul.f32 %v5289_v47, %v5289_v47  ;;  %v1630_v39 = vmul.f32 %v5291_v55, %v5291_v55  ;;  %v1745_v11 = vadd.f32 %v1744_v40, %v1627_v56  ;;  %v1502_v20 = vadd.f32 %v1501_v51, %v5289_v47 }
 0x1fe   :  { %v5293_v14 = vpop.f32.mrf.mxu1  ;;  %v5295_v18 = vpop.f32.mrf.mxu0  ;;  %v1819_v59 = vadd.f32 %v1818_v24, %v1629_v41  ;;  %v1576_v16 = vadd.f32 %v1575_v3, %v5291_v55 }
 0x1ff   :  { %8410 = vst [vmem:[#allocation91_spill] sm:$0xff] %v5295_v18  ;;  %v1631_v12 = vmul.f32 %v5293_v14, %v5293_v14  ;;  %v1633_v46 = vmul.f32 %v5295_v18, %v5295_v18  ;;  %v1466_v62 = vadd.f32 %v1465_v8, %v5293_v14  ;;  %v1540_v32 = vadd.f32 %v1539_v1, %v5295_v18 }
 0x200   :  { %v5297_v2 = vpop.f32.mrf.mxu1  ;;  %v5299_v53 = vpop.f32.mrf.mxu0  ;;  %v1782_v42 = vadd.f32 %v1781_v52, %v1628_v25  ;;  %v1856_v54 = vadd.f32 %v1855_v50, %v1630_v39 }
 0x201   :  { %8411 = vst [vmem:[#allocation92_spill] sm:$0xff] %v5297_v2  ;;  %8412 = vst [vmem:[#allocation93_spill] sm:$0xff] %v5299_v53  ;;  %v1632_v23 = vmul.f32 %v5297_v2, %v5297_v2  ;;  %v1634_v4 = vmul.f32 %v5299_v53, %v5299_v53  ;;  %v1746_v47 = vadd.f32 %v1745_v11, %v1631_v12 }
 0x202   :  { %v5301_v22 = vpop.f32.mrf.mxu1  ;;  %v5303_v61 = vpop.f32.mrf.mxu0  ;;  %v1820_v41 = vadd.f32 %v1819_v59, %v1633_v46  ;;  %v1503_v24 = vadd.f32 %v1502_v20, %v5297_v2  ;;  %v1577_v52 = vadd.f32 %v1576_v16, %v5299_v53 }
 0x203   :  { %8413 = vst [vmem:[#allocation94_spill] sm:$0xff] %v5301_v22  ;;  %8414 = vst [vmem:[#allocation95_spill] sm:$0xff] %v5303_v61  ;;  %v1635_v51 = vmul.f32 %v5301_v22, %v5301_v22  ;;  %v1637_v8 = vmul.f32 %v5303_v61, %v5303_v61  ;;  %v1783_v3 = vadd.f32 %v1782_v42, %v1632_v23 }
 0x204   :  { %v5305_v0 = vpop.f32.mrf.mxu1  ;;  %v5307_v45 = vpop.f32.mrf.mxu0  ;;  %v1467_v12 = vadd.f32 %v1466_v62, %v5301_v22  ;;  %v1541_v46 = vadd.f32 %v1540_v32, %v5303_v61  ;;  %v1857_v42 = vadd.f32 %v1856_v54, %v1634_v4 }
 0x205   :  { %8415 = vst [vmem:[#allocation96_spill] sm:$0xff] %v5305_v0  ;;  %v1636_v25 = vmul.f32 %v5305_v0, %v5305_v0  ;;  %v1638_v39 = vmul.f32 %v5307_v45, %v5307_v45  ;;  %v1747_v20 = vadd.f32 %v1746_v47, %v1635_v51  ;;  %v1504_v23 = vadd.f32 %v1503_v24, %v5305_v0 }
 0x206   :  { %v5309_v17 = vpop.f32.mrf.mxu1  ;;  %v5311_v7 = vpop.f32.mrf.mxu0  ;;  %v1821_v62 = vadd.f32 %v1820_v41, %v1637_v8  ;;  %v1578_v22 = vadd.f32 %v1577_v52, %v5307_v45 }
 0x207   :  { %8416 = vst [vmem:[#allocation97_spill] sm:$0xff] %v5311_v7  ;;  %v1639_v11 = vmul.f32 %v5309_v17, %v5309_v17  ;;  %v1641_v16 = vmul.f32 %v5311_v7, %v5311_v7  ;;  %v1468_v32 = vadd.f32 %v1467_v12, %v5309_v17  ;;  %v1542_v61 = vadd.f32 %v1541_v46, %v5311_v7 }
 0x208   :  { %v5313_v15 = vpop.f32.mrf.mxu1  ;;  %v5315_v21 = vpop.f32.mrf.mxu0  ;;  %v1784_v2 = vadd.f32 %v1783_v3, %v1636_v25  ;;  %v1858_v4 = vadd.f32 %v1857_v42, %v1638_v39 }
 0x209   :  { %8417 = vst [vmem:[#allocation98_spill] sm:$0xff] %v5313_v15  ;;  %8418 = vst [vmem:[#allocation99_spill] sm:$0xff] %v5315_v21  ;;  %v1640_v59 = vmul.f32 %v5313_v15, %v5313_v15  ;;  %v1642_v47 = vmul.f32 %v5315_v21, %v5315_v21  ;;  %v1748_v0 = vadd.f32 %v1747_v20, %v1639_v11 }
 0x20a   :  { %v5317_v28 = vpop.f32.mrf.mxu1  ;;  %v5319_v19 = vpop.f32.mrf.mxu0  ;;  %v1822_v41 = vadd.f32 %v1821_v62, %v1641_v16  ;;  %v1505_v8 = vadd.f32 %v1504_v23, %v5313_v15  ;;  %v1579_v3 = vadd.f32 %v1578_v22, %v5315_v21 }
 0x20b   :  { %8419 = vst [vmem:[#allocation100_spill] sm:$0xff] %v5317_v28  ;;  %8420 = vst [vmem:[#allocation101_spill] sm:$0xff] %v5319_v19  ;;  %v1643_v54 = vmul.f32 %v5317_v28, %v5317_v28  ;;  %v1645_v12 = vmul.f32 %v5319_v19, %v5319_v19  ;;  %v1785_v52 = vadd.f32 %v1784_v2, %v1640_v59 }
 0x20c   :  { %v5321_v27 = vpop.f32.mrf.mxu1  ;;  %v5323_v29 = vpop.f32.mrf.mxu0  ;;  %v1469_v11 = vadd.f32 %v1468_v32, %v5317_v28  ;;  %v1543_v16 = vadd.f32 %v1542_v61, %v5319_v19  ;;  %v1859_v2 = vadd.f32 %v1858_v4, %v1642_v47 }
 0x20d   :  { %8421 = vst [vmem:[#allocation102_spill] sm:$0xff] %v5321_v27  ;;  %8422 = vst [vmem:[#allocation103_spill] sm:$0xff] %v5323_v29  ;;  %v1644_v25 = vmul.f32 %v5321_v27, %v5321_v27  ;;  %v1646_v39 = vmul.f32 %v5323_v29, %v5323_v29  ;;  %v1749_v23 = vadd.f32 %v1748_v0, %v1643_v54 }
 0x20e   :  { %v5329_v9 = vpop.f32.mrf.mxu1  ;;  %v5331_v58 = vpop.f32.mrf.mxu0  ;;  %v1506_v59 = vadd.f32 %v1505_v8, %v5321_v27  ;;  %v1823_v32 = vadd.f32 %v1822_v41, %v1645_v12  ;;  %v1580_v19 = vadd.f32 %v1579_v3, %v5323_v29 }
 0x20f   :  { %8423 = vst [vmem:[#allocation104_spill] sm:$0xff] %v5329_v9  ;;  %8424 = vst [vmem:[#allocation105_spill] sm:$0xff] %v5331_v58  ;;  %v1647_v20 = vmul.f32 %v5329_v9, %v5329_v9  ;;  %v1649_v22 = vmul.f32 %v5331_v58, %v5331_v58  ;;  %v1470_v61 = vadd.f32 %v1469_v11, %v5329_v9 }
 0x210   :  { %v5343_v31 = vpop.f32.mrf.mxu1  ;;  %v5345_v37 = vpop.f32.mrf.mxu0  ;;  %v1544_v47 = vadd.f32 %v1543_v16, %v5331_v58  ;;  %v1786_v0 = vadd.f32 %v1785_v52, %v1644_v25  ;;  %v1860_v4 = vadd.f32 %v1859_v2, %v1646_v39 }
 0x211   :  { %8425 = vst [vmem:[#allocation106_spill] sm:$0xff] %v5343_v31  ;;  %8426 = vst [vmem:[#allocation107_spill] sm:$0xff] %v5345_v37  ;;  %v1648_v62 = vmul.f32 %v5343_v31, %v5343_v31  ;;  %v1650_v28 = vmul.f32 %v5345_v37, %v5345_v37  ;;  %v1750_v15 = vadd.f32 %v1749_v23, %v1647_v20 }
 0x212   :  { %v5359_v13 = vpop.f32.mrf.mxu1  ;;  %v5361_v63 = vpop.f32.mrf.mxu0  ;;  %v1824_v41 = vadd.f32 %v1823_v32, %v1649_v22  ;;  %v1507_v11 = vadd.f32 %v1506_v59, %v5343_v31  ;;  %v1581_v52 = vadd.f32 %v1580_v19, %v5345_v37 }
 0x213   :  { %8427 = vst [vmem:[#allocation108_spill] sm:$0xff] %v5359_v13  ;;  %8428 = vst [vmem:[#allocation109_spill] sm:$0xff] %v5361_v63  ;;  %v1651_v54 = vmul.f32 %v5359_v13, %v5359_v13  ;;  %v1653_v12 = vmul.f32 %v5361_v63, %v5361_v63  ;;  %v1787_v16 = vadd.f32 %v1786_v0, %v1648_v62 }
 0x214   :  { %v5373_v60 = vpop.f32.mrf.mxu1  ;;  %v5375_v49 = vpop.f32.mrf.mxu0  ;;  %v1861_v20 = vadd.f32 %v1860_v4, %v1650_v28  ;;  %v1471_v22 = vadd.f32 %v1470_v61, %v5359_v13  ;;  %v1545_v23 = vadd.f32 %v1544_v47, %v5361_v63 }
 0x215   :  { %8429 = vst [vmem:[#allocation110_spill] sm:$0xff] %v5373_v60  ;;  %8430 = vst [vmem:[#allocation111_spill] sm:$0xff] %v5375_v49  ;;  %v1652_v3 = vmul.f32 %v5373_v60, %v5373_v60  ;;  %v1654_v25 = vmul.f32 %v5375_v49, %v5375_v49  ;;  %v1751_v58 = vadd.f32 %v1750_v15, %v1651_v54 }
 0x216   :  { %v5385_v5 = vpop.f32.mrf.mxu1  ;;  %v5387_v57 = vpop.f32.mrf.mxu0  ;;  %v1508_v59 = vadd.f32 %v1507_v11, %v5373_v60  ;;  %v1825_v28 = vadd.f32 %v1824_v41, %v1653_v12  ;;  %v1582_v47 = vadd.f32 %v1581_v52, %v5375_v49 }
 0x217   :  { %8431 = vst [vmem:[#allocation112_spill] sm:$0xff] %v5385_v5  ;;  %8432 = vst [vmem:[#allocation113_spill] sm:$0xff] %v5387_v57  ;;  %v1655_v32 = vmul.f32 %v5385_v5, %v5385_v5  ;;  %v1657_v19 = vmul.f32 %v5387_v57, %v5387_v57  ;;  %v1788_v61 = vadd.f32 %v1787_v16, %v1652_v3 }
 0x218   :  { %v5398_v30 = vpop.f32.mrf.mxu1  ;;  %v5400_v44 = vpop.f32.mrf.mxu0  ;;  %v1862_v15 = vadd.f32 %v1861_v20, %v1654_v25  ;;  %v1472_v54 = vadd.f32 %v1471_v22, %v5385_v5  ;;  %v1546_v11 = vadd.f32 %v1545_v23, %v5387_v57 }
 0x219   :  { %8433 = vst [vmem:[#allocation114_spill] sm:$0xff] %v5398_v30  ;;  %8434 = vst [vmem:[#allocation115_spill] sm:$0xff] %v5400_v44  ;;  %v1656_v62 = vmul.f32 %v5398_v30, %v5398_v30  ;;  %v1658_v4 = vmul.f32 %v5400_v44, %v5400_v44  ;;  %v1752_v31 = vadd.f32 %v1751_v58, %v1655_v32 }
 0x21a   :  { %v5409_v56 = vpop.f32.mrf.mxu1  ;;  %v5411_v40 = vpop.f32.mrf.mxu0  ;;  %v1509_v41 = vadd.f32 %v1508_v59, %v5398_v30  ;;  %v1826_v16 = vadd.f32 %v1825_v28, %v1657_v19  ;;  %v1583_v25 = vadd.f32 %v1582_v47, %v5400_v44 }
 0x21b   :  { %8435 = vst [vmem:[#allocation116_spill] sm:$0xff] %v5409_v56  ;;  %8436 = vst [vmem:[#allocation117_spill] sm:$0xff] %v5411_v40  ;;  %v1659_v63 = vmul.f32 %v5409_v56, %v5409_v56  ;;  %v1661_v12 = vmul.f32 %v5411_v40, %v5411_v40  ;;  %v1789_v52 = vadd.f32 %v1788_v61, %v1656_v62 }
 0x21c   :  { %v5421_v1 = vpop.f32.mrf.mxu1  ;;  %v5423_v50 = vpop.f32.mrf.mxu0  ;;  %v1863_v58 = vadd.f32 %v1862_v15, %v1658_v4  ;;  %v1473_v32 = vadd.f32 %v1472_v54, %v5409_v56  ;;  %v1547_v59 = vadd.f32 %v1546_v11, %v5411_v40 }
 0x21d   :  { %8437 = vst [vmem:[#allocation118_spill] sm:$0xff] %v5421_v1  ;;  %8438 = vst [vmem:[#allocation119_spill] sm:$0xff] %v5423_v50  ;;  %v1660_v3 = vmul.f32 %v5421_v1, %v5421_v1  ;;  %v1662_v20 = vmul.f32 %v5423_v50, %v5423_v50  ;;  %v1753_v30 = vadd.f32 %v1752_v31, %v1659_v63 }
 0x21e   :  { %v5434_v53 = vpop.f32.mrf.mxu1  ;;  %v5436_v18 = vpop.f32.mrf.mxu0  ;;  %v1510_v19 = vadd.f32 %v1509_v41, %v5421_v1  ;;  %v1827_v4 = vadd.f32 %v1826_v16, %v1661_v12  ;;  %v1584_v54 = vadd.f32 %v1583_v25, %v5423_v50 }
 0x21f   :  { %8439 = vst [vmem:[#allocation120_spill] sm:$0xff] %v5434_v53  ;;  %8440 = vst [vmem:[#allocation121_spill] sm:$0xff] %v5436_v18  ;;  %v1663_v57 = vmul.f32 %v5434_v53, %v5434_v53  ;;  %v1665_v62 = vmul.f32 %v5436_v18, %v5436_v18  ;;  %v1790_v15 = vadd.f32 %v1789_v52, %v1660_v3 }
 0x220   :  { %v5445_v51 = vpop.f32.mrf.mxu1  ;;  %v5447_v24 = vpop.f32.mrf.mxu0  ;;  %v1864_v63 = vadd.f32 %v1863_v58, %v1662_v20  ;;  %v1474_v31 = vadd.f32 %v1473_v32, %v5434_v53  ;;  %v1548_v41 = vadd.f32 %v1547_v59, %v5436_v18 }
 0x221   :  { %8441 = vst [vmem:[#allocation122_spill] sm:$0xff] %v5445_v51  ;;  %8442 = vst [vmem:[#allocation123_spill] sm:$0xff] %v5447_v24  ;;  %v1664_v28 = vmul.f32 %v5445_v51, %v5445_v51  ;;  %v1666_v11 = vmul.f32 %v5447_v24, %v5447_v24  ;;  %v1754_v44 = vadd.f32 %v1753_v30, %v1663_v57 }
 0x222   :  { %v5457_v46 = vpop.f32.mrf.mxu1  ;;  %v5459_v42 = vpop.f32.mrf.mxu0  ;;  %v1511_v12 = vadd.f32 %v1510_v19, %v5445_v51  ;;  %v1828_v52 = vadd.f32 %v1827_v4, %v1665_v62  ;;  %v1585_v20 = vadd.f32 %v1584_v54, %v5447_v24 }
 0x223   :  { %8443 = vst [vmem:[#allocation124_spill] sm:$0xff] %v5457_v46  ;;  %8444 = vst [vmem:[#allocation125_spill] sm:$0xff] %v5459_v42  ;;  %v1667_v40 = vmul.f32 %v5457_v46, %v5457_v46  ;;  %v1669_v3 = vmul.f32 %v5459_v42, %v5459_v42  ;;  %v1791_v25 = vadd.f32 %v1790_v15, %v1664_v28 }
 0x224   :  { %v5470_v21 = vpop.f32.mrf.mxu1  ;;  %v5472_v7 = vpop.f32.mrf.mxu0  ;;  %v1865_v57 = vadd.f32 %v1864_v63, %v1666_v11  ;;  %v1475_v30 = vadd.f32 %v1474_v31, %v5457_v46  ;;  %v1549_v19 = vadd.f32 %v1548_v41, %v5459_v42 }
 0x225   :  { %8445 = vst [vmem:[#allocation126_spill] sm:$0xff] %v5470_v21  ;;  %8446 = vst [vmem:[#allocation127_spill] sm:$0xff] %v5472_v7  ;;  %v1668_v16 = vmul.f32 %v5470_v21, %v5470_v21  ;;  %v1670_v58 = vmul.f32 %v5472_v7, %v5472_v7  ;;  %v1755_v53 = vadd.f32 %v1754_v44, %v1667_v40 }
 0x226   :  { %v5481_v8 = vpop.f32.mrf.mxu1  ;;  %v5483_v27 = vpop.f32.mrf.mxu0  ;;  %v1512_v62 = vadd.f32 %v1511_v12, %v5470_v21  ;;  %v1829_v11 = vadd.f32 %v1828_v52, %v1669_v3  ;;  %v1586_v31 = vadd.f32 %v1585_v20, %v5472_v7 }
 0x227   :  { %8447 = vst [vmem:[#allocation128_spill] sm:$0xff] %v5481_v8  ;;  %8448 = vst [vmem:[#allocation129_spill] sm:$0xff] %v5483_v27  ;;  %v1671_v18 = vmul.f32 %v5481_v8, %v5481_v8  ;;  %v1673_v28 = vmul.f32 %v5483_v27, %v5483_v27  ;;  %v1792_v63 = vadd.f32 %v1791_v25, %v1668_v16 }
 0x228   :  { %v5493_v39 = vpop.f32.mrf.mxu1  ;;  %v5495_v2 = vpop.f32.mrf.mxu0  ;;  %v1866_v44 = vadd.f32 %v1865_v57, %v1670_v58  ;;  %v1476_v40 = vadd.f32 %v1475_v30, %v5481_v8  ;;  %v1550_v12 = vadd.f32 %v1549_v19, %v5483_v27 }
 0x229   :  { %8449 = vst [vmem:[#allocation130_spill] sm:$0xff] %v5493_v39  ;;  %8450 = vst [vmem:[#allocation131_spill] sm:$0xff] %v5495_v2  ;;  %v1672_v4 = vmul.f32 %v5493_v39, %v5493_v39  ;;  %v1674_v41 = vmul.f32 %v5495_v2, %v5495_v2  ;;  %v1756_v24 = vadd.f32 %v1755_v53, %v1671_v18 }
 0x22a   :  { %v5506_v0 = vpop.f32.mrf.mxu1  ;;  %v5508_v37 = vpop.f32.mrf.mxu0  ;;  %v1513_v3 = vadd.f32 %v1512_v62, %v5493_v39  ;;  %v1830_v25 = vadd.f32 %v1829_v11, %v1673_v28  ;;  %v1587_v58 = vadd.f32 %v1586_v31, %v5495_v2 }
 0x22b   :  { %8451 = vst [vmem:[#allocation132_spill] sm:$0xff] %v5506_v0  ;;  %8452 = vst [vmem:[#allocation133_spill] sm:$0xff] %v5508_v37  ;;  %v1675_v42 = vmul.f32 %v5506_v0, %v5506_v0  ;;  %v1677_v16 = vmul.f32 %v5508_v37, %v5508_v37  ;;  %v1793_v20 = vadd.f32 %v1792_v63, %v1672_v4 }
 0x22c   :  { %v5517_v60 = vpop.f32.mrf.mxu1  ;;  %v5519_v13 = vpop.f32.mrf.mxu0  ;;  %v1867_v53 = vadd.f32 %v1866_v44, %v1674_v41  ;;  %v1477_v18 = vadd.f32 %v1476_v40, %v5506_v0  ;;  %v1551_v62 = vadd.f32 %v1550_v12, %v5508_v37 }
 0x22d   :  { %8453 = vst [vmem:[#allocation134_spill] sm:$0xff] %v5517_v60  ;;  %8454 = vst [vmem:[#allocation135_spill] sm:$0xff] %v5519_v13  ;;  %v1676_v52 = vmul.f32 %v5517_v60, %v5517_v60  ;;  %v1678_v57 = vmul.f32 %v5519_v13, %v5519_v13  ;;  %v1757_v8 = vadd.f32 %v1756_v24, %v1675_v42 }
 0x22e   :  { %v5529_v22 = vpop.f32.mrf.mxu1  ;;  %v5531_v23 = vpop.f32.mrf.mxu0  ;;  %v1514_v28 = vadd.f32 %v1513_v3, %v5517_v60  ;;  %v1831_v41 = vadd.f32 %v1830_v25, %v1677_v16  ;;  %v1588_v40 = vadd.f32 %v1587_v58, %v5519_v13 }
 0x22f   :  { %v1679_v27 = vmul.f32 %v5529_v22, %v5529_v22  ;;  %v1681_v4 = vmul.f32 %v5531_v23, %v5531_v23  ;;  %v1794_v44 = vadd.f32 %v1793_v20, %v1676_v52  ;;  %v1868_v24 = vadd.f32 %v1867_v53, %v1678_v57 }
 0x230   :  { %v5542_v61 = vpop.f32.mrf.mxu1  ;;  %v5544_v47 = vpop.f32.mrf.mxu0  ;;  %v1478_v42 = vadd.f32 %v1477_v18, %v5529_v22  ;;  %v1552_v3 = vadd.f32 %v1551_v62, %v5531_v23 }
 0x231   :  { %8455 = vst [vmem:[#allocation136_spill] sm:$0xff] %v5542_v61  ;;  %8456 = vst [vmem:[#allocation137_spill] sm:$0xff] %v5544_v47  ;;  %v1680_v11 = vmul.f32 %v5542_v61, %v5542_v61  ;;  %v1682_v12 = vmul.f32 %v5544_v47, %v5544_v47  ;;  %v1758_v2 = vadd.f32 %v1757_v8, %v1679_v27 }
 0x232   :  { %v5553_v1 = vpop.f32.mrf.mxu1  ;;  %v5555_v56 = vpop.f32.mrf.mxu0  ;;  %v1515_v16 = vadd.f32 %v1514_v28, %v5542_v61  ;;  %v1832_v20 = vadd.f32 %v1831_v41, %v1681_v4  ;;  %v1589_v57 = vadd.f32 %v1588_v40, %v5544_v47 }
 0x233   :  { %v1683_v37 = vmul.f32 %v5553_v1, %v5553_v1  ;;  %v1685_v52 = vmul.f32 %v5555_v56, %v5555_v56  ;;  %v1795_v58 = vadd.f32 %v1794_v44, %v1680_v11  ;;  %v1869_v27 = vadd.f32 %v1868_v24, %v1682_v12 }
 0x234   :  { %v5565_v32 = vpop.f32.mrf.mxu1  ;;  %v5567_v59 = vpop.f32.mrf.mxu0  ;;  %v1479_v8 = vadd.f32 %v1478_v42, %v5553_v1  ;;  %v1553_v28 = vadd.f32 %v1552_v3, %v5555_v56 }
 0x235   :  { %8457 = vst [vmem:[#allocation138_spill] sm:$0xff] %v5565_v32  ;;  %8458 = vst [vmem:[#allocation139_spill] sm:$0xff] %v5567_v59  ;;  %v1684_v25 = vmul.f32 %v5565_v32, %v5565_v32  ;;  %v1686_v53 = vmul.f32 %v5567_v59, %v5567_v59  ;;  %v1759_v13 = vadd.f32 %v1758_v2, %v1683_v37 }
 0x236   :  { %v5578_v15 = vpop.f32.mrf.mxu1  ;;  %v5580_v54 = vpop.f32.mrf.mxu0  ;;  %v1516_v4 = vadd.f32 %v1515_v16, %v5565_v32  ;;  %v1833_v12 = vadd.f32 %v1832_v20, %v1685_v52  ;;  %v1590_v42 = vadd.f32 %v1589_v57, %v5567_v59 }
 0x237   :  { %v1687_v61 = vmul.f32 %v5578_v15, %v5578_v15  ;;  %v1689_v11 = vmul.f32 %v5580_v54, %v5580_v54  ;;  %v1796_v24 = vadd.f32 %v1795_v58, %v1684_v25  ;;  %v1870_v37 = vadd.f32 %v1869_v27, %v1686_v53 }
 0x238   :  { %v5589_v46 = vpop.f32.mrf.mxu1  ;;  %v5591_v21 = vpop.f32.mrf.mxu0  ;;  %v1480_v2 = vadd.f32 %v1479_v8, %v5578_v15  ;;  %v1554_v16 = vadd.f32 %v1553_v28, %v5580_v54 }
 0x239   :  { %8459 = vst [vmem:[#allocation140_spill] sm:$0xff] %v5591_v21  ;;  %v1688_v41 = vmul.f32 %v5589_v46, %v5589_v46  ;;  %v1690_v3 = vmul.f32 %v5591_v21, %v5591_v21  ;;  %v1760_v7 = vadd.f32 %v1759_v13, %v1687_v61  ;;  %v1517_v52 = vadd.f32 %v1516_v4, %v5589_v46 }
 0x23a   :  { %v5601_v30 = vpop.f32.mrf.mxu1  ;;  %v5603_v19 = vpop.f32.mrf.mxu0  ;;  %v1834_v58 = vadd.f32 %v1833_v12, %v1689_v11  ;;  %v1591_v53 = vadd.f32 %v1590_v42, %v5591_v21 }
 0x23b   :  { %v1691_v32 = vmul.f32 %v5601_v30, %v5601_v30  ;;  %v1693_v25 = vmul.f32 %v5603_v19, %v5603_v19  ;;  %v1797_v57 = vadd.f32 %v1796_v24, %v1688_v41  ;;  %v1871_v13 = vadd.f32 %v1870_v37, %v1690_v3 }
 0x23c   :  { %v5614_v63 = vpop.f32.mrf.mxu1  ;;  %v5616_v31 = vpop.f32.mrf.mxu0  ;;  %v1481_v61 = vadd.f32 %v1480_v2, %v5601_v30  ;;  %v1555_v4 = vadd.f32 %v1554_v16, %v5603_v19 }
 0x23d   :  { %8460 = vst [vmem:[#allocation141_spill] sm:$0xff] %v5616_v31  ;;  %v1692_v20 = vmul.f32 %v5614_v63, %v5614_v63  ;;  %v1694_v27 = vmul.f32 %v5616_v31, %v5616_v31  ;;  %v1761_v51 = vadd.f32 %v1760_v7, %v1691_v32  ;;  %v1518_v11 = vadd.f32 %v1517_v52, %v5614_v63 }
 0x23e   :  { %v5625_v0 = vpop.f32.mrf.mxu1  ;;  %v5627_v60 = vpop.f32.mrf.mxu0  ;;  %v1835_v3 = vadd.f32 %v1834_v58, %v1693_v25  ;;  %v1592_v2 = vadd.f32 %v1591_v53, %v5616_v31 }
 0x23f   :  { %v1695_v59 = vmul.f32 %v5625_v0, %v5625_v0  ;;  %v1697_v41 = vmul.f32 %v5627_v60, %v5627_v60  ;;  %v1798_v37 = vadd.f32 %v1797_v57, %v1692_v20  ;;  %v1872_v7 = vadd.f32 %v1871_v13, %v1694_v27 }
 0x240   :  { %v5637_v18 = vpop.f32.mrf.mxu1  ;;  %v5639_v62 = vpop.f32.mrf.mxu0  ;;  %v1482_v32 = vadd.f32 %v1481_v61, %v5625_v0  ;;  %v1556_v52 = vadd.f32 %v1555_v4, %v5627_v60 }
 0x241   :  { %8461 = vst [vmem:[#allocation142_spill] sm:$0xff] %v5639_v62  ;;  %v1696_v12 = vmul.f32 %v5637_v18, %v5637_v18  ;;  %v1698_v16 = vmul.f32 %v5639_v62, %v5639_v62  ;;  %v1762_v49 = vadd.f32 %v1761_v51, %v1695_v59  ;;  %v1519_v25 = vadd.f32 %v1518_v11, %v5637_v18 }
 0x242   :  { %v5650_v44 = vpop.f32.mrf.mxu1  ;;  %v5652_v40 = vpop.f32.mrf.mxu0  ;;  %v1836_v57 = vadd.f32 %v1835_v3, %v1697_v41  ;;  %v1593_v27 = vadd.f32 %v1592_v2, %v5639_v62 }
 0x243   :  { %8462 = vst [vmem:[#allocation143_spill] sm:$0xff] %v5652_v40  ;;  %v1699_v21 = vmul.f32 %v5650_v44, %v5650_v44  ;;  %v1701_v20 = vmul.f32 %v5652_v40, %v5652_v40  ;;  %v1799_v53 = vadd.f32 %v1798_v37, %v1696_v12  ;;  %v1873_v51 = vadd.f32 %v1872_v7, %v1698_v16 }
 0x244   :  { %v5661_v47 = vpop.f32.mrf.mxu1  ;;  %v5663_v39 = vpop.f32.mrf.mxu0  ;;  %v1483_v59 = vadd.f32 %v1482_v32, %v5650_v44  ;;  %v1557_v11 = vadd.f32 %v1556_v52, %v5652_v40 }
 0x245   :  { %8463 = vst [vmem:[#allocation144_spill] sm:$0xff] %v5661_v47  ;;  %8464 = vst [vmem:[#allocation145_spill] sm:$0xff] %v5663_v39  ;;  %v1700_v58 = vmul.f32 %v5661_v47, %v5661_v47  ;;  %v1702_v13 = vmul.f32 %v5663_v39, %v5663_v39  ;;  %v1763_v9 = vadd.f32 %v1762_v49, %v1699_v21 }
 0x246   :  { %v5673_v8 = vpop.f32.mrf.mxu1  ;;  %v5675_v28 = vpop.f32.mrf.mxu0  ;;  %v1520_v41 = vadd.f32 %v1519_v25, %v5661_v47  ;;  %v1837_v16 = vadd.f32 %v1836_v57, %v1701_v20  ;;  %v1594_v32 = vadd.f32 %v1593_v27, %v5663_v39  ;;  %v4647_v39 = vld [vmem:[#allocation11 + $0xf4] ss:$8 sps:$4 sm:$0xff]  }
 0x247   :  { %8465 = vst [vmem:[#allocation146_spill] sm:$0xff] %v5675_v28  ;;  %v1703_v31 = vmul.f32 %v5673_v8, %v5673_v8  ;;  %v1705_v12 = vmul.f32 %v5675_v28, %v5675_v28  ;;  %v1800_v7 = vadd.f32 %v1799_v53, %v1700_v58  ;;  %v1874_v49 = vadd.f32 %v1873_v51, %v1702_v13 }
 0x248   :  { %v5686_v24 = vpop.f32.mrf.mxu1  ;;  %v5688_v42 = vpop.f32.mrf.mxu0  ;;  %v1484_v21 = vadd.f32 %v1483_v59, %v5673_v8  ;;  %v1558_v25 = vadd.f32 %v1557_v11, %v5675_v28  ;;  %2871 = vmatprep.subr.bf16.mxu1 %v4647_v39 }
 0x249   :  { %8466 = vst [vmem:[#allocation147_spill] sm:$0xff] %v5686_v24  ;;  %8467 = vst [vmem:[#allocation148_spill] sm:$0xff] %v5688_v42  ;;  %v1704_v3 = vmul.f32 %v5686_v24, %v5686_v24  ;;  %v1706_v52 = vmul.f32 %v5688_v42, %v5688_v42  ;;  %v1764_v47 = vadd.f32 %v1763_v9, %v1703_v31  ;;  %v4650_v9 = vld [vmem:[#allocation11 + $0x1f4] ss:$8 sps:$4 sm:$0xff]  }
 0x24a   :  { %v5697_v50 = vpop.f32.mrf.mxu1  ;;  %v5699_v5 = vpop.f32.mrf.mxu0  ;;  %v1521_v20 = vadd.f32 %v1520_v41, %v5686_v24  ;;  %v1838_v53 = vadd.f32 %v1837_v16, %v1705_v12  ;;  %v1595_v13 = vadd.f32 %v1594_v32, %v5688_v42  ;;  %v4648_v16 = vld [vmem:[#allocation11 + $0x1f0] ss:$8 sps:$4 sm:$0xff]   ;;  %3064 = vmatprep.subr.bf16.mxu0 %v4650_v9 }
 0x24b   :  { %8468 = vst [vmem:[#allocation149_spill] sm:$0xff] %v5697_v50  ;;  %8469 = vst [vmem:[#allocation150_spill] sm:$0xff] %v5699_v5  ;;  %v1707_v62 = vmul.f32 %v5697_v50, %v5697_v50  ;;  %v1709_v58 = vmul.f32 %v5699_v5, %v5699_v5  ;;  %v1801_v27 = vadd.f32 %v1800_v7, %v1704_v3  ;;  %v4645_v3 = vld [vmem:[#allocation11 + $0xf0] ss:$8 sps:$4 sm:$0xff]   ;;  %3065 = vmatpush2.bf16.msra.mxu0 %v4648_v16 }
 0x24c   :  { %v5709_v61 = vpop.f32.mrf.mxu1  ;;  %v5711_v4 = vpop.f32.mrf.mxu0  ;;  %v1485_v51 = vadd.f32 %v1484_v21, %v5697_v50  ;;  %v1875_v31 = vadd.f32 %v1874_v49, %v1706_v52  ;;  %v1559_v41 = vadd.f32 %v1558_v25, %v5699_v5  ;;  %2872 = vmatpush2.bf16.msra.mxu1 %v4645_v3  ;;  %v4654_v3 = vld [vmem:[#allocation11 + $0x1e0] ss:$8 sps:$4 sm:$0xff]  }
 0x24d   :  { %8470 = vst [vmem:[#allocation151_spill] sm:$0xff] %v5709_v61  ;;  %8471 = vst [vmem:[#allocation152_spill] sm:$0xff] %v5711_v4  ;;  %v1708_v57 = vmul.f32 %v5709_v61, %v5709_v61  ;;  %v1710_v28 = vmul.f32 %v5711_v4, %v5711_v4  ;;  %v1765_v7 = vadd.f32 %v1764_v47, %v1707_v62 }
 0x24e   :  { %v5722_v37 = vpop.f32.mrf.mxu1  ;;  %v5724_v2 = vpop.f32.mrf.mxu0  ;;  %v1522_v32 = vadd.f32 %v1521_v20, %v5709_v61  ;;  %v1839_v52 = vadd.f32 %v1838_v53, %v1709_v58  ;;  %v1596_v25 = vadd.f32 %v1595_v13, %v5711_v4  ;;  %v4656_v53 = vld [vmem:[#allocation11 + $0x1e4] ss:$8 sps:$4 sm:$0xff]  }
 0x24f   :  { %8472 = vst [vmem:[#allocation153_spill] sm:$0xff] %v5722_v37  ;;  %8473 = vst [vmem:[#allocation154_spill] sm:$0xff] %v5724_v2  ;;  %v1711_v12 = vmul.f32 %v5722_v37, %v5722_v37  ;;  %v1713_v21 = vmul.f32 %v5724_v2, %v5724_v2  ;;  %v1802_v49 = vadd.f32 %v1801_v27, %v1708_v57  ;;  %v4653_v57 = vld [vmem:[#allocation11 + $0xe4] ss:$8 sps:$4 sm:$0xff]   ;;  %3066 = vmatprep.subr.bf16.mxu0 %v4656_v53 }
 0x250   :  { %v5733_v29 = vpop.f32.mrf.mxu1  ;;  %v5735_v40 = vpop.f32.mrf.mxu0  ;;  %v1486_v47 = vadd.f32 %v1485_v51, %v5722_v37  ;;  %v1560_v62 = vadd.f32 %v1559_v41, %v5724_v2  ;;  %v1876_v27 = vadd.f32 %v1875_v31, %v1710_v28  ;;  %v4651_v41 = vld [vmem:[#allocation11 + $0xe0] ss:$8 sps:$4 sm:$0xff]   ;;  %2873 = vmatprep.subr.bf16.mxu1 %v4653_v57  ;;  %3067 = vmatpush2.bf16.msra.mxu0 %v4654_v3 }
 0x251   :  { %8474 = vst [vmem:[#allocation155_spill] sm:$0xff] %v5735_v40  ;;  %v1712_v5 = vmul.f32 %v5733_v29, %v5733_v29  ;;  %v1714_v20 = vmul.f32 %v5735_v40, %v5735_v40  ;;  %v1766_v13 = vadd.f32 %v1765_v7, %v1711_v12  ;;  %v1523_v9 = vadd.f32 %v1522_v32, %v5733_v29 }
 0x252   :  { %v5744_v59 = vpop.f32.mrf.mxu1  ;;  %v5746_v11 = vpop.f32.mrf.mxu0  ;;  %v1840_v4 = vadd.f32 %v1839_v52, %v1713_v21  ;;  %v1597_v2 = vadd.f32 %v1596_v25, %v5735_v40  ;;  %2874 = vmatpush2.bf16.msra.mxu1 %v4651_v41 }
 0x253   :  { %8475 = vst [vmem:[#allocation156_spill] sm:$0xff] %v5744_v59  ;;  %8476 = vst [vmem:[#allocation157_spill] sm:$0xff] %v5746_v11  ;;  %v1715_v61 = vmul.f32 %v5744_v59, %v5744_v59  ;;  %v1717_v51 = vmul.f32 %v5746_v11, %v5746_v11  ;;  %v1803_v28 = vadd.f32 %v1802_v49, %v1712_v5  ;;  %v4659_v5 = vld [vmem:[#allocation11 + $0xd4] ss:$8 sps:$4 sm:$0xff]  }
 0x254   :  { %v5756_v42 = vpop.f32.mrf.mxu1  ;;  %v5758_v50 = vpop.f32.mrf.mxu0  ;;  %v1487_v31 = vadd.f32 %v1486_v47, %v5744_v59  ;;  %v1877_v32 = vadd.f32 %v1876_v27, %v1714_v20  ;;  %v1561_v52 = vadd.f32 %v1560_v62, %v5746_v11  ;;  %v4662_v49 = vld [vmem:[#allocation11 + $0x1d4] ss:$8 sps:$4 sm:$0xff]   ;;  %v4657_v20 = vld [vmem:[#allocation11 + $0xd0] ss:$8 sps:$4 sm:$0xff]   ;;  %2875 = vmatprep.subr.bf16.mxu1 %v4659_v5 }
 0x255   :  { %8477 = vst [vmem:[#allocation158_spill] sm:$0xff] %v5758_v50  ;;  %v1716_v37 = vmul.f32 %v5756_v42, %v5756_v42  ;;  %v1718_v12 = vmul.f32 %v5758_v50, %v5758_v50  ;;  %v1767_v21 = vadd.f32 %v1766_v13, %v1715_v61  ;;  %v1524_v25 = vadd.f32 %v1523_v9, %v5756_v42  ;;  %v4660_v62 = vld [vmem:[#allocation11 + $0x1d0] ss:$8 sps:$4 sm:$0xff]  }
 0x256   :  { %v5769_v39 = vpop.f32.mrf.mxu1  ;;  %v5771_v58 = vpop.f32.mrf.mxu0  ;;  %v1841_v47 = vadd.f32 %v1840_v4, %v1717_v51  ;;  %v1598_v53 = vadd.f32 %v1597_v2, %v5758_v50  ;;  %3068 = vmatprep.subr.bf16.mxu0 %v4662_v49  ;;  %2876 = vmatpush2.bf16.msra.mxu1 %v4657_v20  ;;  %v4666_v20 = vld [vmem:[#allocation11 + $0x1c0] ss:$8 sps:$4 sm:$0xff]  }
 0x257   :  { %8478 = vst [vmem:[#allocation159_spill] sm:$0xff] %v5769_v39  ;;  %8479 = vst [vmem:[#allocation160_spill] sm:$0xff] %v5771_v58  ;;  %v1719_v7 = vmul.f32 %v5769_v39, %v5769_v39  ;;  %v1721_v59 = vmul.f32 %v5771_v58, %v5771_v58  ;;  %v1804_v27 = vadd.f32 %v1803_v28, %v1716_v37  ;;  %3069 = vmatpush2.bf16.msra.mxu0 %v4660_v62 }
 0x258   :  { %v5779_v24 = vpop.f32.mrf.mxu1  ;;  %v5781_v16 = vpop.f32.mrf.mxu0  ;;  %v1488_v13 = vadd.f32 %v1487_v31, %v5769_v39  ;;  %v1878_v4 = vadd.f32 %v1877_v32, %v1718_v12  ;;  %v1562_v51 = vadd.f32 %v1561_v52, %v5771_v58  ;;  %v4668_v32 = vld [vmem:[#allocation11 + $0x1c4] ss:$8 sps:$4 sm:$0xff]  }
 0x259   :  { %8480 = vst [vmem:[#allocation161_spill] sm:$0xff] %v5779_v24  ;;  %8481 = vst [vmem:[#allocation162_spill] sm:$0xff] %v5781_v16  ;;  %v1720_v61 = vmul.f32 %v5779_v24, %v5779_v24  ;;  %v1722_v9 = vmul.f32 %v5781_v16, %v5781_v16  ;;  %v1768_v2 = vadd.f32 %v1767_v21, %v1719_v7  ;;  %v4665_v7 = vld [vmem:[#allocation11 + $0xc4] ss:$8 sps:$4 sm:$0xff]   ;;  %3070 = vmatprep.subr.bf16.mxu0 %v4668_v32 }
 0x25a   :  { %v5790_v40 = vpop.f32.mrf.mxu1  ;;  %v5792_v57 = vpop.f32.mrf.mxu0  ;;  %v1525_v37 = vadd.f32 %v1524_v25, %v5779_v24  ;;  %v1599_v28 = vadd.f32 %v1598_v53, %v5781_v16  ;;  %v1842_v21 = vadd.f32 %v1841_v47, %v1721_v59  ;;  %v4663_v53 = vld [vmem:[#allocation11 + $0xc0] ss:$8 sps:$4 sm:$0xff]   ;;  %2877 = vmatprep.subr.bf16.mxu1 %v4665_v7 }
 0x25b   :  { %8482 = vst [vmem:[#allocation163_spill] sm:$0xff] %v5790_v40  ;;  %8483 = vst [vmem:[#allocation164_spill] sm:$0xff] %v5792_v57  ;;  %v1723_v50 = vmul.f32 %v5790_v40, %v5790_v40  ;;  %v1725_v31 = vmul.f32 %v5792_v57, %v5792_v57  ;;  %v1805_v52 = vadd.f32 %v1804_v27, %v1720_v61  ;;  %2878 = vmatpush2.bf16.msra.mxu1 %v4663_v53 }
 0x25c   :  { %v5802_v41 = vpop.f32.mrf.mxu1  ;;  %v5804_v3 = vpop.f32.mrf.mxu0  ;;  %v1489_v49 = vadd.f32 %v1488_v13, %v5790_v40  ;;  %v1879_v16 = vadd.f32 %v1878_v4, %v1722_v9  ;;  %v1563_v58 = vadd.f32 %v1562_v51, %v5792_v57  ;;  %3071 = vmatpush2.bf16.msra.mxu0 %v4666_v20 }
 0x25d   :  { %8484 = vst [vmem:[#allocation165_spill] sm:$0xff] %v5802_v41  ;;  %8485 = vst [vmem:[#allocation166_spill] sm:$0xff] %v5804_v3  ;;  %v1724_v39 = vmul.f32 %v5802_v41, %v5802_v41  ;;  %v1726_v25 = vmul.f32 %v5804_v3, %v5804_v3  ;;  %v1769_v59 = vadd.f32 %v1768_v2, %v1723_v50  ;;  %v4671_v50 = vld [vmem:[#allocation11 + $0xb4] ss:$8 sps:$4 sm:$0xff]  }
 0x25e   :  { %v5815_v5 = vpop.f32.mrf.mxu1  ;;  %v5817_v12 = vpop.f32.mrf.mxu0  ;;  %v1526_v47 = vadd.f32 %v1525_v37, %v5802_v41  ;;  %v1843_v13 = vadd.f32 %v1842_v21, %v1725_v31  ;;  %v1600_v4 = vadd.f32 %v1599_v28, %v5804_v3  ;;  %v4674_v2 = vld [vmem:[#allocation11 + $0x1b4] ss:$8 sps:$4 sm:$0xff]   ;;  %v4669_v31 = vld [vmem:[#allocation11 + $0xb0] ss:$8 sps:$4 sm:$0xff]   ;;  %2879 = vmatprep.subr.bf16.mxu1 %v4671_v50 }
 0x25f   :  { %8486 = vst [vmem:[#allocation167_spill] sm:$0xff] %v5815_v5  ;;  %8487 = vst [vmem:[#allocation168_spill] sm:$0xff] %v5817_v12  ;;  %v1727_v24 = vmul.f32 %v5815_v5, %v5815_v5  ;;  %v1729_v61 = vmul.f32 %v5817_v12, %v5817_v12  ;;  %v1806_v9 = vadd.f32 %v1805_v52, %v1724_v39  ;;  %v4672_v28 = vld [vmem:[#allocation11 + $0x1b0] ss:$8 sps:$4 sm:$0xff]   ;;  %3072 = vmatprep.subr.bf16.mxu0 %v4674_v2  ;;  %v4675_v2 = vld [vmem:[#allocation11 + $0xa0] ss:$8 sps:$4 sm:$0xff]  }
 0x260   :  { %v5825_v11 = vpop.f32.mrf.mxu1  ;;  %v5827_v62 = vpop.f32.mrf.mxu0  ;;  %v1880_v37 = vadd.f32 %v1879_v16, %v1726_v25  ;;  %v1490_v32 = vadd.f32 %v1489_v49, %v5815_v5  ;;  %v1564_v41 = vadd.f32 %v1563_v58, %v5817_v12  ;;  %2880 = vmatpush2.bf16.msra.mxu1 %v4669_v31  ;;  %3073 = vmatpush2.bf16.msra.mxu0 %v4672_v28 }
 0x261   :  { %8488 = vst [vmem:[#allocation169_spill] sm:$0xff] %v5825_v11  ;;  %8489 = vst [vmem:[#allocation170_spill] sm:$0xff] %v5827_v62  ;;  %v1728_v27 = vmul.f32 %v5825_v11, %v5825_v11  ;;  %v1730_v51 = vmul.f32 %v5827_v62, %v5827_v62  ;;  %v1770_v21 = vadd.f32 %v1769_v59, %v1727_v24 }
 0x262   :  { %v5837_v57 = vpop.f32.mrf.mxu1  ;;  %v5839_v7 = vpop.f32.mrf.mxu0  ;;  %v1527_v52 = vadd.f32 %v1526_v47, %v5825_v11  ;;  %v1844_v16 = vadd.f32 %v1843_v13, %v1729_v61  ;;  %v1601_v58 = vadd.f32 %v1600_v4, %v5827_v62  ;;  %v4677_v61 = vld [vmem:[#allocation11 + $0xa4] ss:$8 sps:$4 sm:$0xff]  }
 0x263   :  { %8490 = vst [vmem:[#allocation171_spill] sm:$0xff] %v5837_v57  ;;  %8491 = vst [vmem:[#allocation172_spill] sm:$0xff] %v5839_v7  ;;  %v1731_v39 = vmul.f32 %v5837_v57, %v5837_v57  ;;  %v1733_v53 = vmul.f32 %v5839_v7, %v5839_v7  ;;  %v1807_v49 = vadd.f32 %v1806_v9, %v1728_v27  ;;  %v4680_v27 = vld [vmem:[#allocation11 + $0x1a4] ss:$8 sps:$4 sm:$0xff]   ;;  %2881 = vmatprep.subr.bf16.mxu1 %v4677_v61 }
 0x264   :  { %v5848_v3 = vpop.f32.mrf.mxu1  ;;  %v5850_v20 = vpop.f32.mrf.mxu0  ;;  %v1881_v24 = vadd.f32 %v1880_v37, %v1730_v51  ;;  %v1491_v59 = vadd.f32 %v1490_v32, %v5837_v57  ;;  %v1565_v47 = vadd.f32 %v1564_v41, %v5839_v7  ;;  %v4678_v41 = vld [vmem:[#allocation11 + $0x1a0] ss:$8 sps:$4 sm:$0xff]   ;;  %3074 = vmatprep.subr.bf16.mxu0 %v4680_v27  ;;  %2882 = vmatpush2.bf16.msra.mxu1 %v4675_v2 }
 0x265   :  { %8492 = vst [vmem:[#allocation173_spill] sm:$0xff] %v5848_v3  ;;  %8493 = vst [vmem:[#allocation174_spill] sm:$0xff] %v5850_v20  ;;  %v1732_v25 = vmul.f32 %v5848_v3, %v5848_v3  ;;  %v1734_v12 = vmul.f32 %v5850_v20, %v5850_v20  ;;  %v1771_v13 = vadd.f32 %v1770_v21, %v1731_v39  ;;  %3075 = vmatpush2.bf16.msra.mxu0 %v4678_v41 }
 0x266   :  { %v5859_v11 = vpop.f32.mrf.mxu1  ;;  %v5861_v50 = vpop.f32.mrf.mxu0  ;;  %v1528_v9 = vadd.f32 %v1527_v52, %v5848_v3  ;;  %v1602_v4 = vadd.f32 %v1601_v58, %v5850_v20  ;;  %v1845_v37 = vadd.f32 %v1844_v16, %v1733_v53 }
 0x267   :  { %8494 = vst [vmem:[#allocation175_spill] sm:$0xff] %v5859_v11  ;;  %8495 = vst [vmem:[#allocation176_spill] sm:$0xff] %v5861_v50  ;;  %v1735_v51 = vmul.f32 %v5859_v11, %v5859_v11  ;;  %v1808_v32 = vadd.f32 %v1807_v49, %v1732_v25  ;;  %v1737_v31 = vmul.f32 %v5861_v50, %v5861_v50 }
 0x268   :  { %v5869_v62 = vpop.f32.mrf.mxu1  ;;  %v5871_v28 = vpop.f32.mrf.mxu0  ;;  %v1882_v39 = vadd.f32 %v1881_v24, %v1734_v12  ;;  %v1492_v21 = vadd.f32 %v1491_v59, %v5859_v11  ;;  %v1566_v52 = vadd.f32 %v1565_v47, %v5861_v50  ;;  %v4683_v12 = vld [vmem:[#allocation11 + $0x94] ss:$8 sps:$4 sm:$0xff]   ;;  %v4690_v11 = vld [vmem:[#allocation11 + $0x180] ss:$8 sps:$4 sm:$0xff]  }
 0x269   :  { %8496 = vst [vmem:[#allocation177_spill] sm:$0xff] %v5869_v62  ;;  %8497 = vst [vmem:[#allocation178_spill] sm:$0xff] %v5871_v28  ;;  %v1736_v58 = vmul.f32 %v5869_v62, %v5869_v62  ;;  %v1772_v53 = vadd.f32 %v1771_v13, %v1735_v51  ;;  %v1529_v16 = vadd.f32 %v1528_v9, %v5869_v62  ;;  %v4686_v24 = vld [vmem:[#allocation11 + $0x194] ss:$8 sps:$4 sm:$0xff]   ;;  %v4681_v9 = vld [vmem:[#allocation11 + $0x90] ss:$8 sps:$4 sm:$0xff]   ;;  %2883 = vmatprep.subr.bf16.mxu1 %v4683_v12 }
 0x26a   :  { %v1603_v49 = vadd.f32 %v1602_v4, %v5871_v28  ;;  %v1738_v25 = vmul.f32 %v5871_v28, %v5871_v28  ;;  %v5881_v20 = vpop.f32.mrf.mxu1  ;;  %v5883_v61 = vpop.f32.mrf.mxu0  ;;  %v1846_v59 = vadd.f32 %v1845_v37, %v1737_v31  ;;  %v4684_v4 = vld [vmem:[#allocation11 + $0x190] ss:$8 sps:$4 sm:$0xff]   ;;  %3076 = vmatprep.subr.bf16.mxu0 %v4686_v24  ;;  %2884 = vmatpush2.bf16.msra.mxu1 %v4681_v9 }
 0x26b   :  { %8498 = vst [vmem:[#allocation179_spill] sm:$0xff] %v5881_v20  ;;  %8499 = vst [vmem:[#allocation180_spill] sm:$0xff] %v5883_v61  ;;  %v1493_v47 = vadd.f32 %v1492_v21, %v5881_v20  ;;  %v1739_v27 = vmul.f32 %v5881_v20, %v5881_v20  ;;  %v1567_v13 = vadd.f32 %v1566_v52, %v5883_v61  ;;  %3077 = vmatpush2.bf16.msra.mxu0 %v4684_v4 }
 0x26c   :  { %v1809_v51 = vadd.f32 %v1808_v32, %v1736_v58  ;;  %v1883_v2 = vadd.f32 %v1882_v39, %v1738_v25  ;;  %v1741_v28 = vmul.f32 %v5883_v61, %v5883_v61  ;;  %v5891_v50 = vpop.f32.mrf.mxu1  ;;  %v5893_v41 = vpop.f32.mrf.mxu0  ;;  %v4689_v25 = vld [vmem:[#allocation11 + $0x84] ss:$8 sps:$4 sm:$0xff]  }
 0x26d   :  { %8500 = vst [vmem:[#allocation181_spill] sm:$0xff] %v5891_v50  ;;  %8501 = vst [vmem:[#allocation182_spill] sm:$0xff] %v5893_v41  ;;  %v1494_v37 = vrot.slane %v1493_v47, 4  ;;  %v1773_v31 = vadd.f32 %v1772_v53, %v1739_v27  ;;  %v1568_v21 = vrot.slane %v1567_v13, 4  ;;  %v1530_v20 = vadd.f32 %v1529_v16, %v5891_v50  ;;  %v4692_v61 = vld [vmem:[#allocation11 + $0x184] ss:$8 sps:$4 sm:$0xff]   ;;  %2885 = vmatprep.subr.bf16.mxu1 %v4689_v25 }
 0x26e   :  { %v1847_v52 = vadd.f32 %v1846_v59, %v1741_v28  ;;  %v1740_v32 = vmul.f32 %v5891_v50, %v5891_v50  ;;  %v1604_v39 = vadd.f32 %v1603_v49, %v5893_v41  ;;  %v1742_v58 = vmul.f32 %v5893_v41, %v5893_v41  ;;  %v4687_v27 = vld [vmem:[#allocation11 + $0x80] ss:$8 sps:$4 sm:$0xff]   ;;  %3078 = vmatprep.subr.bf16.mxu0 %v4692_v61 }
 0x26f   :  { %v1495_v12 = vadd.f32 %v1494_v37, %v1493_v47  ;;  %v1774_v24 = vrot.slane %v1773_v31, 4  ;;  %v1569_v62 = vadd.f32 %v1568_v21, %v1567_v13  ;;  %v1531_v53 = vrot.slane %v1530_v20, 4  ;;  %2886 = vmatpush2.bf16.msra.mxu1 %v4687_v27  ;;  %3079 = vmatpush2.bf16.msra.mxu0 %v4690_v11 }
 0x270   :  { %v1848_v16 = vrot.slane %v1847_v52, 4  ;;  %v1810_v9 = vadd.f32 %v1809_v51, %v1740_v32  ;;  %v1605_v28 = vrot.slane %v1604_v39, 4  ;;  %v1884_v59 = vadd.f32 %v1883_v2, %v1742_v58 }
 0x271   :  { %v1496_v50 = vrot.slane %v1495_v12, 2  ;;  %v1775_v49 = vadd.f32 %v1774_v24, %v1773_v31  ;;  %v1570_v7 = vrot.slane %v1569_v62, 2  ;;  %v1532_v3 = vadd.f32 %v1531_v53, %v1530_v20 }
 0x272   :  { %v1849_v4 = vadd.f32 %v1848_v16, %v1847_v52  ;;  %v1811_v41 = vrot.slane %v1810_v9, 4  ;;  %v1606_v57 = vadd.f32 %v1605_v28, %v1604_v39  ;;  %v1885_v47 = vrot.slane %v1884_v59, 4 }
 0x273   :  { %v1497_v13 = vadd.f32 %v1496_v50, %v1495_v12  ;;  %v1776_v37 = vrot.slane %v1775_v49, 2  ;;  %v1571_v21 = vadd.f32 %v1570_v7, %v1569_v62  ;;  %v1533_v5 = vrot.slane %v1532_v3, 2 }
 0x274   :  { %v1850_v40 = vrot.slane %v1849_v4, 2  ;;  %v1812_v51 = vadd.f32 %v1811_v41, %v1810_v9  ;;  %v1607_v32 = vrot.slane %v1606_v57, 2  ;;  %v1886_v2 = vadd.f32 %v1885_v47, %v1884_v59 }
 0x275   :  { %v1498_v58 = vrot.slane %v1497_v13, 1  ;;  %v1777_v61 = vadd.f32 %v1776_v37, %v1775_v49  ;;  %v1572_v25 = vrot.slane %v1571_v21, 1  ;;  %v1534_v31 = vadd.f32 %v1533_v5, %v1532_v3 }
 0x276   :  { %v1851_v24 = vadd.f32 %v1850_v40, %v1849_v4  ;;  %v1813_v20 = vrot.slane %v1812_v51, 2  ;;  %v1608_v53 = vadd.f32 %v1607_v32, %v1606_v57  ;;  %v1887_v52 = vrot.slane %v1886_v2, 2 }
 0x277   :  { %v1499_v27 = vadd.f32 %v1498_v58, %v1497_v13  ;;  %v1778_v39 = vrot.slane %v1777_v61, 1  ;;  %v1573_v16 = vadd.f32 %v1572_v25, %v1571_v21  ;;  %v1535_v11 = vrot.slane %v1534_v31, 1 }
 0x278   :  { %v1852_v50 = vrot.slane %v1851_v24, 1  ;;  %v1814_v12 = vadd.f32 %v1813_v20, %v1812_v51  ;;  %v1609_v62 = vrot.slane %v1608_v53, 1  ;;  %v1888_v7 = vadd.f32 %v1887_v52, %v1886_v2 }
 0x279   :  { %v1611_v28 = vmul.f32 0.00390625, %v1499_v27  ;;  %v1779_v41 = vadd.f32 %v1778_v39, %v1777_v61  ;;  %v1613_v9 = vmul.f32 0.00390625, %v1573_v16  ;;  %v1536_v59 = vadd.f32 %v1535_v11, %v1534_v31 }
 0x27a   :  { %v1853_v47 = vadd.f32 %v1852_v50, %v1851_v24  ;;  %v1815_v49 = vrot.slane %v1814_v12, 1  ;;  %v1610_v37 = vadd.f32 %v1609_v62, %v1608_v53  ;;  %v1889_v3 = vrot.slane %v1888_v7, 1 }
 0x27b   :  { %v1891_v40 = vmul.f32 0.00390625, %v1779_v41  ;;  %v1895_v5 = vmul.f32 %v1611_v28, %v1611_v28  ;;  %v1897_v57 = vmul.f32 %v1613_v9, %v1613_v9  ;;  %v1612_v4 = vmul.f32 0.00390625, %v1536_v59 }
 0x27c   :  { %v1893_v13 = vmul.f32 0.00390625, %v1853_v47  ;;  %v1816_v32 = vadd.f32 %v1815_v49, %v1814_v12  ;;  %v1614_v21 = vmul.f32 0.00390625, %v1610_v37  ;;  %v1890_v58 = vadd.f32 %v1889_v3, %v1888_v7 }
 0x27d   :  { %v1896_v25 = vmul.f32 %v1612_v4, %v1612_v4  ;;  %v1899_v52 = vsub.f32 %v1891_v40, %v1895_v5  ;;  %v4845_v12 = vmov 1966171168  }
 0x27e   :  { %v1892_v51 = vmul.f32 0.00390625, %v1816_v32  ;;  %v1894_v20 = vmul.f32 0.00390625, %v1890_v58  ;;  %v1898_v2 = vmul.f32 %v1614_v21, %v1614_v21  ;;  %v1901_v61 = vsub.f32 %v1893_v13, %v1897_v57 }
 0x27f   :  { %v1903_v53 = vmax.f32 %v1899_v52, 0.0  ;;  %v1923_v7 = vunpack.c.l.s4 %v4845_v12 }
 0x280   :  { %v1900_v27 = vsub.f32 %v1892_v51, %v1896_v25  ;;  %v1902_v31 = vsub.f32 %v1894_v20, %v1898_v2  ;;  %v1905_v16 = vmax.f32 %v1901_v61, 0.0  ;;  %v1907_v51 = vld [vmem:[%s8095_s4] sm:$0xf]  ;;  %v1958_v20 = vsub.s32 2, %v4937_v34 }
 0x281   :  { %v1908_v62 = vadd.f32 1e-05, %v1903_v53  ;;  %v1924_v47 = vunpack.c.0.s8 %v1923_v7  ;;  %v8265_v2 = vsub.s32 3, %v4937_v34 }
 0x282   :  { %v1904_v24 = vmax.f32 %v1900_v27, 0.0  ;;  %v1906_v39 = vmax.f32 %v1902_v31, 0.0  ;;  %v1910_v41 = vadd.f32 1e-05, %v1905_v16 }
 0x283   :  { %v5902_v5 = vsub.s32 %v1924_v47, %v4937_v34 }
 0x284   :  { %v1909_v11 = vadd.f32 1e-05, %v1904_v24  ;;  %v1911_v50 = vadd.f32 1e-05, %v1906_v39 }
 0x285   :  { %8502 = vst [vmem:[#allocation183_spill] sm:$0xff] %v5902_v5 }
 0x286   :  { %4693 = vrsqrt.f32 %v1909_v11 }
 0x287   :  { %4695 = vrsqrt.f32 %v1911_v50 }
 0x288   :  { %4697 = vrsqrt.f32 %v1908_v62 }
 0x289   :  { %4699 = vrsqrt.f32 %v1910_v41 }
 0x293   :  { %v4694_v59 = vpop.eup %4693 }
 0x294   :  { %v4696_v49 = vpop.eup %4695 }
 0x295   :  { %v4698_v37 = vpop.eup %4697 }
 0x296   :  { %v4700_v3 = vpop.eup %4699  ;;  %v1920_v40 = vcombine.low %v4698_v37, %v4694_v59  ;;  %v8508_v37 = vld [vmem:[#allocation83_spill] sm:$0xff] }
 0x297   :  { %v1921_v57 = vcombine.low %v4700_v3, %v4696_v49  ;;  %v8510_v3 = vld [vmem:[#allocation84_spill] sm:$0xff] }
 0x298   :  { %v1928_v13 = vrot.slane %v1920_v40, %v5902_v5  ;;  %v8511_v40 = vld [vmem:[#allocation86_spill] sm:$0xff] }
 0x299   :  { %v1935_v32 = vrot.slane %v1921_v57, %v5902_v5  ;;  %v8512_v57 = vld [vmem:[#allocation85_spill] sm:$0xff] }
 0x29b   :  { %v1936_v58 = vcombine.low %v1928_v13, %v1935_v32  ;;  %v8513_v13 = vld [vmem:[#allocation87_spill] sm:$0xff]  ;;  %v8514_v32 = vld [vmem:[#allocation88_spill] sm:$0xff] }
 0x29d   :  { %v1943_v25 = vrot.slane %v1936_v58, %v5902_v5 }
 0x29f   :  { %v1945_v52 = vmul.f32 %v1943_v25, %v1907_v51  ;;  %v8515_v51 = vld [vmem:[#allocation90_spill] sm:$0xff] }
 0x2a1   :  { %v5913_v61 = vrot.slane %v1945_v52, %v4943_v36  ;;  %v5916_v27 = vrot.slane %v1945_v52, %v4940_v35  ;;  %v5918_v31 = vrot.slane %v1945_v52, %v1958_v20  ;;  %v5922_v24 = vrot.slane %v1945_v52, %v8265_v2 }
 0x2a3   :  { %8503 = vst [vmem:[#allocation184_spill] sm:$0xff] %v5913_v61  ;;  %8504 = vst [vmem:[#allocation185_spill] sm:$0xff] %v5916_v27  ;;  %v1968_v39 = vmul.f32 %v5913_v61, %v1611_v28  ;;  %v1969_v53 = vmul.f32 %v5916_v27, %v1612_v4  ;;  %v1970_v16 = vmul.f32 %v5918_v31, %v1613_v9  ;;  %v1946_v28 = vld [vmem:[%s8096_s5] sm:$0xf] }
 0x2a4   :  { %8505 = vst [vmem:[#allocation186_spill] sm:$0xff] %v5918_v31  ;;  %8506 = vst [vmem:[#allocation187_spill] sm:$0xff] %v5922_v24  ;;  %v1971_v11 = vmul.f32 %v5922_v24, %v1614_v21  ;;  %v5933_v47 = vmul.f32 %v5913_v61, %v5261_v38  ;;  %v5940_v9 = vmul.f32 %v5916_v27, %v5265_v26 }
 0x2a5   :  { %v1976_v50 = vcombine.low %v1968_v39, %v1969_v53  ;;  %v5944_v4 = vmul.f32 %v5918_v31, %v5263_v48  ;;  %v5948_v21 = vmul.f32 %v5922_v24, %v5267_v10  ;;  %v5952_v38 = vmul.f32 %v5913_v61, %v5269_v6  ;;  %v8517_v39 = vld [vmem:[#allocation89_spill] sm:$0xff] }
 0x2a6   :  { %v1977_v62 = vcombine.low %v1970_v16, %v1971_v11  ;;  %v5956_v49 = vmul.f32 %v5916_v27, %v5273_v43  ;;  %v5960_v26 = vmul.f32 %v5918_v31, %v5271_v33  ;;  %v5964_v48 = vmul.f32 %v5922_v24, %v8508_v37  ;;  %v8527_v37 = vld [vmem:[#allocation96_spill] sm:$0xff] }
 0x2a7   :  { %v1984_v41 = vrot.slane %v1976_v50, %v5902_v5  ;;  %v5968_v10 = vmul.f32 %v5913_v61, %v8510_v3  ;;  %v5972_v6 = vmul.f32 %v5916_v27, %v8511_v40  ;;  %v5976_v43 = vmul.f32 %v5918_v31, %v8512_v57  ;;  %v8519_v50 = vld [vmem:[#allocation92_spill] sm:$0xff]  ;;  %v8529_v3 = vld [vmem:[#allocation95_spill] sm:$0xff] }
 0x2a8   :  { %v1991_v12 = vrot.slane %v1977_v62, %v5902_v5  ;;  %8507 = vst [vmem:[#allocation188_spill] sm:$0xff] %v5956_v49  ;;  %8509 = vst [vmem:[#allocation83_spill] sm:$0xff] %v5964_v48  ;;  %v5980_v33 = vmul.f32 %v5922_v24, %v8513_v13  ;;  %v5984_v58 = vmul.f32 %v5913_v61, %v8514_v32  ;;  %v8533_v32 = vld [vmem:[#allocation98_spill] sm:$0xff]  ;;  %v8552_v48 = vld [vmem:[#allocation151_spill] sm:$0xff] }
 0x2a9   :  { %v5990_v52 = vmul.f32 %v5916_v27, %v8515_v51  ;;  %v5994_v53 = vmul.f32 %v5918_v31, %v8517_v39  ;;  %v5998_v16 = vmul.f32 %v5922_v24, %v5291_v55  ;;  %v6002_v11 = vmul.f32 %v5913_v61, %v5293_v14  ;;  %v8535_v39 = vld [vmem:[#allocation97_spill] sm:$0xff]  ;;  %v8553_v49 = vld [vmem:[#allocation150_spill] sm:$0xff] }
 0x2aa   :  { %v1992_v7 = vcombine.low %v1984_v41, %v1991_v12  ;;  %v6006_v62 = vmul.f32 %v5916_v27, %v8519_v50  ;;  %v8521_v41 = vld [vmem:[#allocation91_spill] sm:$0xff]  ;;  %v6022_v14 = vmul.f32 %v5916_v27, %v8527_v37  ;;  %v6026_v40 = vmul.f32 %v5918_v31, %v8529_v3  ;;  %v8542_v37 = vld [vmem:[#allocation102_spill] sm:$0xff] }
 0x2ab   :  { %8516 = vst [vmem:[#allocation84_spill] sm:$0xff] %v5990_v52  ;;  %8518 = vst [vmem:[#allocation86_spill] sm:$0xff] %v5998_v16  ;;  %v6010_v12 = vmul.f32 %v5918_v31, %v8521_v41  ;;  %v6030_v57 = vmul.f32 %v5922_v24, %v5307_v45  ;;  %v6034_v13 = vmul.f32 %v5913_v61, %v5309_v17  ;;  %v8537_v41 = vld [vmem:[#allocation99_spill] sm:$0xff]  ;;  %v8550_v16 = vld [vmem:[#allocation146_spill] sm:$0xff] }
 0x2ac   :  { %v1999_v59 = vrot.slane %v1992_v7, %v5902_v5  ;;  %8520 = vst [vmem:[#allocation85_spill] sm:$0xff] %v6006_v62  ;;  %v8523_v7 = vld [vmem:[#allocation93_spill] sm:$0xff]  ;;  %8528 = vst [vmem:[#allocation89_spill] sm:$0xff] %v6022_v14  ;;  %v6038_v51 = vmul.f32 %v5916_v27, %v8533_v32  ;;  %v6042_v50 = vmul.f32 %v5918_v31, %v8535_v39  ;;  %v8549_v14 = vld [vmem:[#allocation147_spill] sm:$0xff] }
 0x2ad   :  { %8522 = vst [vmem:[#allocation87_spill] sm:$0xff] %v6010_v12  ;;  %8530 = vst [vmem:[#allocation92_spill] sm:$0xff] %v6026_v40  ;;  %v6058_v3 = vmul.f32 %v5916_v27, %v8542_v37  ;;  %v8544_v32 = vld [vmem:[#allocation101_spill] sm:$0xff]  ;;  %v2070_v37 = vmul.f32 %v5913_v61, %v5553_v1  ;;  %v2074_v5 = vmul.f32 %v5913_v61, %v5578_v15  ;;  %v8560_v40 = vld [vmem:[#allocation160_spill] sm:$0xff] }
 0x2ae   :  { %v5986_v25 = vsub.f32 %v1946_v28, %v1999_v59  ;;  %v6014_v59 = vmul.f32 %v5922_v24, %v8523_v7  ;;  %v8525_v28 = vld [vmem:[#allocation94_spill] sm:$0xff]  ;;  %8531 = vst [vmem:[#allocation91_spill] sm:$0xff] %v6030_v57  ;;  %8532 = vst [vmem:[#allocation93_spill] sm:$0xff] %v6034_v13  ;;  %v6046_v7 = vmul.f32 %v5922_v24, %v8537_v41  ;;  %v8548_v57 = vld [vmem:[#allocation143_spill] sm:$0xff] }
 0x2af   :  { %v6018_v55 = vmul.f32 %v5913_v61, %v8525_v28  ;;  %8534 = vst [vmem:[#allocation94_spill] sm:$0xff] %v6038_v51  ;;  %8536 = vst [vmem:[#allocation96_spill] sm:$0xff] %v6042_v50  ;;  %v8540_v28 = vld [vmem:[#allocation100_spill] sm:$0xff]  ;;  %v6062_v39 = vmul.f32 %v5918_v31, %v8544_v32  ;;  %v2072_v32 = vmul.f32 %v5918_v31, %v5555_v56  ;;  %v8551_v52 = vld [vmem:[#allocation149_spill] sm:$0xff] }
 0x2b0   :  { %8524 = vst [vmem:[#allocation88_spill] sm:$0xff] %v6014_v59  ;;  %8538 = vst [vmem:[#allocation95_spill] sm:$0xff] %v6046_v7  ;;  %v6050_v45 = vrot.slane %v5986_v25, %v4943_v36  ;;  %v6054_v17 = vmul.f32 %v5913_v61, %v8540_v28  ;;  %v6066_v41 = vrot.slane %v5986_v25, %v4940_v35  ;;  %v8556_v7 = vld [vmem:[#allocation156_spill] sm:$0xff]  ;;  %v8557_v50 = vld [vmem:[#allocation157_spill] sm:$0xff] }
 0x2b1   :  { %8526 = vst [vmem:[#allocation90_spill] sm:$0xff] %v6018_v55  ;;  %8543 = vst [vmem:[#allocation99_spill] sm:$0xff] %v6058_v3  ;;  %v6069_v2 = vrot.slane %v5986_v25, %v1958_v20  ;;  %v2066_v36 = vmul.f32 %v5913_v61, %v5529_v22  ;;  %v2068_v28 = vmul.f32 %v5918_v31, %v5531_v23  ;;  %v8547_v3 = vld [vmem:[#allocation144_spill] sm:$0xff]  ;;  %v8558_v51 = vld [vmem:[#allocation159_spill] sm:$0xff] }
 0x2b2   :  { %8539 = vst [vmem:[#allocation98_spill] sm:$0xff] %v6050_v45  ;;  %8541 = vst [vmem:[#allocation97_spill] sm:$0xff] %v6054_v17  ;;  %v2075_v35 = vmul.f32 %v5916_v27, %v5589_v46  ;;  %v2076_v20 = vmul.f32 %v5918_v31, %v5580_v54  ;;  %v2078_v22 = vmul.f32 %v5913_v61, %v5601_v30  ;;  %v8555_v17 = vld [vmem:[#allocation154_spill] sm:$0xff]  ;;  %v8559_v13 = vld [vmem:[#allocation161_spill] sm:$0xff] }
 0x2b3   :  { %8545 = vst [vmem:[#allocation100_spill] sm:$0xff] %v6062_v39  ;;  %8546 = vst [vmem:[#allocation102_spill] sm:$0xff] %v6069_v2  ;;  %v2079_v23 = vmul.f32 %v5916_v27, %v5614_v63  ;;  %v2080_v1 = vmul.f32 %v5918_v31, %v5603_v19  ;;  %v2082_v56 = vmul.f32 %v5913_v61, %v5625_v0  ;;  %v8554_v39 = vld [vmem:[#allocation153_spill] sm:$0xff]  ;;  %v8561_v55 = vld [vmem:[#allocation163_spill] sm:$0xff] }
 0x2b4   :  { %v2083_v15 = vmul.f32 %v5916_v27, %v5637_v18  ;;  %v2084_v46 = vmul.f32 %v5918_v31, %v5627_v60  ;;  %v2086_v54 = vmul.f32 %v5913_v61, %v5650_v44  ;;  %v2087_v30 = vmul.f32 %v5916_v27, %v8547_v3  ;;  %v8563_v59 = vld [vmem:[#allocation165_spill] sm:$0xff]  ;;  %v8564_v12 = vld [vmem:[#allocation164_spill] sm:$0xff]  ;;  %v8565_v62 = vld [vmem:[#allocation167_spill] sm:$0xff] }
 0x2b5   :  { %v2088_v63 = vmul.f32 %v5918_v31, %v8548_v57  ;;  %v2090_v19 = vmul.f32 %v5913_v61, %v5673_v8  ;;  %v2091_v0 = vmul.f32 %v5916_v27, %v8549_v14  ;;  %v2092_v18 = vmul.f32 %v5918_v31, %v8550_v16 }
 0x2b6   :  { %v2094_v60 = vmul.f32 %v5913_v61, %v8551_v52  ;;  %v2095_v44 = vmul.f32 %v5916_v27, %v8552_v48  ;;  %v2096_v3 = vmul.f32 %v5918_v31, %v8553_v49  ;;  %v2098_v57 = vmul.f32 %v5913_v61, %v8554_v39 }
 0x2b7   :  { %v2099_v8 = vmul.f32 %v5916_v27, %v5733_v29  ;;  %v2100_v14 = vmul.f32 %v5918_v31, %v8555_v17  ;;  %v2102_v16 = vmul.f32 %v5913_v61, %v8556_v7  ;;  %v2103_v52 = vmul.f32 %v5916_v27, %v5756_v42 }
 0x2b8   :  { %v2104_v48 = vmul.f32 %v5918_v31, %v8557_v50  ;;  %v2106_v49 = vmul.f32 %v5913_v61, %v8558_v51  ;;  %v2107_v39 = vmul.f32 %v5916_v27, %v8559_v13  ;;  %v2108_v29 = vmul.f32 %v5918_v31, %v8560_v40 }
 0x2b9   :  { %v2110_v17 = vmul.f32 %v5913_v61, %v8561_v55  ;;  %v6136_v7 = vadd.f32 %v6050_v45, %v2066_v36  ;;  %v6139_v42 = vadd.f32 %v6069_v2, %v2068_v28  ;;  %v2111_v50 = vmul.f32 %v5916_v27, %v8563_v59 }
 0x2ba   :  { %v2112_v51 = vmul.f32 %v5918_v31, %v8564_v12  ;;  %v6146_v13 = vadd.f32 %v6050_v45, %v2070_v37  ;;  %v6149_v40 = vadd.f32 %v6069_v2, %v2072_v32  ;;  %v2114_v55 = vmul.f32 %v5913_v61, %v8565_v62 }
 0x2bb   :  { %8562 = vst [vmem:[#allocation101_spill] sm:$0xff] %v6139_v42  ;;  %v6154_v36 = vadd.f32 %v6050_v45, %v2074_v5  ;;  %v6157_v28 = vadd.f32 %v6066_v41, %v2075_v35  ;;  %v6160_v59 = vadd.f32 %v6069_v2, %v2076_v20  ;;  %v8568_v42 = vld [vmem:[#allocation169_spill] sm:$0xff]  ;;  %v6165_v37 = vadd.f32 %v6050_v45, %v2078_v22  ;;  %v8570_v5 = vld [vmem:[#allocation168_spill] sm:$0xff]  ;;  %v8572_v22 = vld [vmem:[#allocation171_spill] sm:$0xff] }
 0x2bc   :  { %v2115_v12 = vmul.f32 %v5916_v27, %v8568_v42  ;;  %v6168_v32 = vadd.f32 %v6066_v41, %v2079_v23  ;;  %v6171_v62 = vadd.f32 %v6069_v2, %v2080_v1  ;;  %v6176_v35 = vadd.f32 %v6050_v45, %v2082_v56  ;;  %v8574_v56 = vld [vmem:[#allocation173_spill] sm:$0xff] }
 0x2bd   :  { %8566 = vst [vmem:[#allocation144_spill] sm:$0xff] %v6154_v36  ;;  %8567 = vst [vmem:[#allocation143_spill] sm:$0xff] %v6157_v28  ;;  %v2116_v36 = vmul.f32 %v5918_v31, %v8570_v5  ;;  %v6179_v20 = vadd.f32 %v6066_v41, %v2083_v15  ;;  %v6182_v42 = vadd.f32 %v6069_v2, %v2084_v46 }
 0x2be   :  { %8569 = vst [vmem:[#allocation147_spill] sm:$0xff] %v6168_v32  ;;  %v2118_v28 = vmul.f32 %v5913_v61, %v8572_v22  ;;  %v6187_v23 = vadd.f32 %v6050_v45, %v2086_v54  ;;  %v6190_v1 = vadd.f32 %v6066_v41, %v2087_v30  ;;  %v6193_v5 = vadd.f32 %v6069_v2, %v2088_v63  ;;  %v8576_v54 = vld [vmem:[#allocation172_spill] sm:$0xff] }
 0x2bf   :  { %8571 = vst [vmem:[#allocation146_spill] sm:$0xff] %v6179_v20  ;;  %v2119_v32 = vmul.f32 %v5916_v27, %v8574_v56  ;;  %v6198_v15 = vadd.f32 %v6050_v45, %v2090_v19  ;;  %v6201_v46 = vadd.f32 %v6066_v41, %v2091_v0  ;;  %v6204_v22 = vadd.f32 %v6069_v2, %v2092_v18  ;;  %v8578_v19 = vld [vmem:[#allocation175_spill] sm:$0xff] }
 0x2c0   :  { %8573 = vst [vmem:[#allocation149_spill] sm:$0xff] %v6190_v1  ;;  %v2120_v20 = vmul.f32 %v5918_v31, %v8576_v54  ;;  %v6209_v30 = vadd.f32 %v6050_v45, %v2094_v60  ;;  %v6212_v63 = vadd.f32 %v6066_v41, %v2095_v44  ;;  %v6215_v56 = vadd.f32 %v6069_v2, %v2096_v3  ;;  %v8580_v60 = vld [vmem:[#allocation177_spill] sm:$0xff] }
 0x2c1   :  { %8575 = vst [vmem:[#allocation151_spill] sm:$0xff] %v6201_v46  ;;  %v2122_v1 = vmul.f32 %v5913_v61, %v8578_v19  ;;  %v6220_v0 = vadd.f32 %v6050_v45, %v2098_v57  ;;  %v6223_v18 = vadd.f32 %v6066_v41, %v2099_v8  ;;  %v6226_v54 = vadd.f32 %v6069_v2, %v2100_v14  ;;  %v8584_v57 = vld [vmem:[#allocation176_spill] sm:$0xff] }
 0x2c2   :  { %8577 = vst [vmem:[#allocation150_spill] sm:$0xff] %v6212_v63  ;;  %v2123_v46 = vmul.f32 %v5916_v27, %v8580_v60  ;;  %v6231_v44 = vadd.f32 %v6050_v45, %v2102_v16  ;;  %v6234_v3 = vadd.f32 %v6066_v41, %v2103_v52  ;;  %v6237_v19 = vadd.f32 %v6069_v2, %v2104_v48  ;;  %v8588_v16 = vld [vmem:[#allocation179_spill] sm:$0xff] }
 0x2c3   :  { %8579 = vst [vmem:[#allocation153_spill] sm:$0xff] %v6223_v18  ;;  %v2124_v63 = vmul.f32 %v5918_v31, %v8584_v57  ;;  %v6242_v8 = vadd.f32 %v6050_v45, %v2106_v49  ;;  %v6245_v14 = vadd.f32 %v6066_v41, %v2107_v39  ;;  %v6248_v60 = vadd.f32 %v6069_v2, %v2108_v29  ;;  %v8592_v49 = vld [vmem:[#allocation181_spill] sm:$0xff] }
 0x2c4   :  { %8581 = vst [vmem:[#allocation154_spill] sm:$0xff] %v6231_v44  ;;  %8582 = vst [vmem:[#allocation156_spill] sm:$0xff] %v6234_v3  ;;  %v2126_v18 = vmul.f32 %v5913_v61, %v8588_v16  ;;  %v6253_v52 = vadd.f32 %v6050_v45, %v2110_v17  ;;  %v6256_v48 = vadd.f32 %v6066_v41, %v2111_v50  ;;  %v8596_v17 = vld [vmem:[#allocation180_spill] sm:$0xff] }
 0x2c5   :  { %8583 = vst [vmem:[#allocation157_spill] sm:$0xff] %v6237_v19  ;;  %8585 = vst [vmem:[#allocation159_spill] sm:$0xff] %v6242_v8  ;;  %v6259_v57 = vadd.f32 %v6069_v2, %v2112_v51  ;;  %v2127_v3 = vmul.f32 %v5916_v27, %v8592_v49  ;;  %v6264_v39 = vadd.f32 %v6050_v45, %v2114_v55  ;;  %v8600_v55 = vld [vmem:[#allocation103_spill] sm:$0xff]  ;;  %v8649_v8 = vld [vmem:[#allocation100_spill] sm:$0xff] }
 0x2c6   :  { %8586 = vst [vmem:[#allocation161_spill] sm:$0xff] %v6245_v14  ;;  %8587 = vst [vmem:[#allocation160_spill] sm:$0xff] %v6248_v60  ;;  %v6267_v29 = vadd.f32 %v6066_v41, %v2115_v12  ;;  %v6270_v16 = vadd.f32 %v6069_v2, %v2116_v36  ;;  %v2128_v14 = vmul.f32 %v5918_v31, %v8596_v17  ;;  %v8647_v60 = vld [vmem:[#allocation97_spill] sm:$0xff] }
 0x2c7   :  { %8589 = vst [vmem:[#allocation163_spill] sm:$0xff] %v6253_v52  ;;  %8590 = vst [vmem:[#allocation165_spill] sm:$0xff] %v6256_v48  ;;  %v6275_v50 = vadd.f32 %v6050_v45, %v2118_v28  ;;  %v6278_v51 = vadd.f32 %v6066_v41, %v2119_v32  ;;  %v6281_v49 = vadd.f32 %v6069_v2, %v2120_v20  ;;  %v8604_v28 = vld [vmem:[#allocation104_spill] sm:$0xff]  ;;  %v8628_v52 = vld [vmem:[#allocation122_spill] sm:$0xff] }
 0x2c8   :  { %8591 = vst [vmem:[#allocation164_spill] sm:$0xff] %v6259_v57  ;;  %8593 = vst [vmem:[#allocation167_spill] sm:$0xff] %v6264_v39  ;;  %v6285_v48 = vmul.f32 %v5922_v24, %v8600_v55  ;;  %v6288_v12 = vadd.f32 %v6050_v45, %v2122_v1  ;;  %v6291_v36 = vadd.f32 %v6066_v41, %v2123_v46  ;;  %v8608_v1 = vsub.s32 3, %v4937_v34  ;;  %v8624_v39 = vld [vmem:[#allocation118_spill] sm:$0xff]  ;;  %v8625_v57 = vld [vmem:[#allocation117_spill] sm:$0xff] }
 0x2c9   :  { %8594 = vst [vmem:[#allocation169_spill] sm:$0xff] %v6267_v29  ;;  %8595 = vst [vmem:[#allocation168_spill] sm:$0xff] %v6270_v16  ;;  %v6294_v17 = vadd.f32 %v6069_v2, %v2124_v63  ;;  %v2034_v32 = vmul.f32 %v5913_v61, %v8604_v28  ;;  %v6302_v20 = vadd.f32 %v6066_v41, %v2127_v3  ;;  %v8610_v29 = vld [vmem:[#allocation105_spill] sm:$0xff]  ;;  %v8622_v16 = vld [vmem:[#allocation116_spill] sm:$0xff] }
 0x2ca   :  { %8597 = vst [vmem:[#allocation171_spill] sm:$0xff] %v6275_v50  ;;  %8598 = vst [vmem:[#allocation173_spill] sm:$0xff] %v6278_v51  ;;  %v6299_v51 = vadd.f32 %v6050_v45, %v2126_v18  ;;  %v6305_v55 = vadd.f32 %v6069_v2, %v2128_v14  ;;  %v6310_v46 = vrot.slane %v5986_v25, %v8608_v1  ;;  %v8615_v25 = vld [vmem:[#allocation111_spill] sm:$0xff] }
 0x2cb   :  { %8599 = vst [vmem:[#allocation172_spill] sm:$0xff] %v6281_v49  ;;  %8601 = vst [vmem:[#allocation175_spill] sm:$0xff] %v6288_v12  ;;  %v2036_v28 = vmul.f32 %v5918_v31, %v8610_v29  ;;  %v2041_v1 = vmul.f32 %v5922_v24, %v8615_v25  ;;  %v8616_v12 = vld [vmem:[#allocation112_spill] sm:$0xff]  ;;  %v8618_v29 = vld [vmem:[#allocation114_spill] sm:$0xff]  ;;  %v2047_v25 = vmul.f32 %v5916_v27, %v8624_v39 }
 0x2cc   :  { %8602 = vst [vmem:[#allocation177_spill] sm:$0xff] %v6291_v36  ;;  %8603 = vst [vmem:[#allocation176_spill] sm:$0xff] %v6294_v17  ;;  %v8609_v36 = vld [vmem:[#allocation106_spill] sm:$0xff]  ;;  %v8611_v17 = vld [vmem:[#allocation107_spill] sm:$0xff]  ;;  %v2043_v49 = vmul.f32 %v5916_v27, %v8618_v29  ;;  %v2151_v39 = vadd.f32 %v6050_v45, %v5933_v47  ;;  %v2160_v47 = vadd.f32 %v6066_v41, %v5972_v6 }
 0x2cd   :  { %8605 = vst [vmem:[#allocation179_spill] sm:$0xff] %v6299_v51  ;;  %8606 = vst [vmem:[#allocation181_spill] sm:$0xff] %v6302_v20  ;;  %v2035_v63 = vmul.f32 %v5916_v27, %v8609_v36  ;;  %v2037_v18 = vmul.f32 %v5922_v24, %v8611_v17  ;;  %v8612_v51 = vld [vmem:[#allocation108_spill] sm:$0xff]  ;;  %v8613_v20 = vld [vmem:[#allocation110_spill] sm:$0xff]  ;;  %v6328_v36 = vmul.f32 %v5913_v61, %v8616_v12 }
 0x2ce   :  { %8607 = vst [vmem:[#allocation180_spill] sm:$0xff] %v6305_v55  ;;  %v2038_v3 = vmul.f32 %v5913_v61, %v8612_v51  ;;  %v2039_v14 = vmul.f32 %v5916_v27, %v8613_v20  ;;  %v8614_v55 = vld [vmem:[#allocation109_spill] sm:$0xff]  ;;  %v8621_v51 = vld [vmem:[#allocation115_spill] sm:$0xff]  ;;  %v6346_v12 = vmul.f32 %v5918_v31, %v8625_v57  ;;  %v2152_v57 = vadd.f32 %v6066_v41, %v5940_v9 }
 0x2cf   :  { %v2040_v34 = vmul.f32 %v5918_v31, %v8614_v55  ;;  %8617 = vst [vmem:[#allocation103_spill] sm:$0xff] %v6328_v36  ;;  %v8619_v17 = vld [vmem:[#allocation113_spill] sm:$0xff]  ;;  %v2045_v20 = vmul.f32 %v5922_v24, %v8621_v51  ;;  %v6340_v55 = vmul.f32 %v5913_v61, %v8622_v16  ;;  %v8627_v36 = vld [vmem:[#allocation119_spill] sm:$0xff]  ;;  %v8632_v16 = vld [vmem:[#allocation126_spill] sm:$0xff]  ;;  %v6382_v9 = vadd.f32 %v6069_v2, %v5976_v43 }
 0x2d0   :  { %v6334_v50 = vmul.f32 %v5918_v31, %v8619_v17  ;;  %8626 = vst [vmem:[#allocation105_spill] sm:$0xff] %v6346_v12  ;;  %v2049_v29 = vmul.f32 %v5922_v24, %v8627_v36  ;;  %v6352_v17 = vmul.f32 %v5916_v27, %v8628_v52  ;;  %v6360_v61 = vmul.f32 %v5916_v27, %v8632_v16  ;;  %v8635_v43 = vld [vmem:[#allocation87_spill] sm:$0xff]  ;;  %v8641_v12 = vld [vmem:[#allocation94_spill] sm:$0xff] }
 0x2d1   :  { %8623 = vst [vmem:[#allocation106_spill] sm:$0xff] %v6340_v55  ;;  %v2153_v36 = vadd.f32 %v6069_v2, %v5944_v4  ;;  %v2154_v52 = vadd.f32 %v6310_v46, %v5948_v21  ;;  %v2157_v31 = vadd.f32 %v6069_v2, %v5960_v26  ;;  %v6376_v16 = vadd.f32 %v6050_v45, %v5968_v10  ;;  %v8634_v10 = vld [vmem:[#allocation85_spill] sm:$0xff]  ;;  %v8643_v55 = vld [vmem:[#allocation96_spill] sm:$0xff] }
 0x2d2   :  { %8620 = vst [vmem:[#allocation104_spill] sm:$0xff] %v6334_v50  ;;  %8629 = vst [vmem:[#allocation107_spill] sm:$0xff] %v6352_v17  ;;  %v8630_v50 = vld [vmem:[#allocation123_spill] sm:$0xff]  ;;  %v2162_v4 = vadd.f32 %v6310_v46, %v5980_v33  ;;  %v6388_v21 = vadd.f32 %v6050_v45, %v5984_v58  ;;  %v6396_v26 = vadd.f32 %v6050_v45, %v6002_v11  ;;  %v8636_v33 = vld [vmem:[#allocation88_spill] sm:$0xff] }
 0x2d3   :  { %v6356_v51 = vmul.f32 %v5922_v24, %v8630_v50  ;;  %8633 = vst [vmem:[#allocation110_spill] sm:$0xff] %v6360_v61  ;;  %v2155_v50 = vadd.f32 %v6050_v45, %v5952_v38  ;;  %v6392_v38 = vadd.f32 %v6069_v2, %v5994_v53  ;;  %v6400_v6 = vadd.f32 %v6066_v41, %v8634_v10  ;;  %v8637_v61 = vld [vmem:[#allocation90_spill] sm:$0xff]  ;;  %v8639_v17 = vld [vmem:[#allocation93_spill] sm:$0xff]  ;;  %v8645_v24 = vld [vmem:[#allocation95_spill] sm:$0xff] }
 0x2d4   :  { %v6404_v27 = vadd.f32 %v6069_v2, %v8635_v43  ;;  %v6408_v58 = vadd.f32 %v6310_v46, %v8636_v33  ;;  %v6412_v53 = vadd.f32 %v6050_v45, %v8637_v61  ;;  %v6420_v10 = vadd.f32 %v6050_v45, %v8639_v17 }
 0x2d5   :  { %8631 = vst [vmem:[#allocation108_spill] sm:$0xff] %v6356_v51  ;;  %v8638_v51 = vld [vmem:[#allocation92_spill] sm:$0xff]  ;;  %v6424_v43 = vadd.f32 %v6066_v41, %v8641_v12  ;;  %v6428_v33 = vadd.f32 %v6069_v2, %v8643_v55  ;;  %v6432_v61 = vadd.f32 %v6310_v46, %v8645_v24  ;;  %v6440_v17 = vadd.f32 %v6069_v2, %v8649_v8 }
 0x2d6   :  { %v6416_v11 = vadd.f32 %v6069_v2, %v8638_v51  ;;  %8640 = vst [vmem:[#allocation109_spill] sm:$0xff] %v6420_v10  ;;  %v6436_v51 = vadd.f32 %v6050_v45, %v8647_v60  ;;  %v6443_v10 = vadd.f32 %v6050_v45, %v2034_v32  ;;  %v6446_v12 = vadd.f32 %v6066_v41, %v2035_v63  ;;  %v8654_v32 = vld [vmem:[#allocation188_spill] sm:$0xff] }
 0x2d7   :  { %8642 = vst [vmem:[#allocation111_spill] sm:$0xff] %v6424_v43  ;;  %8644 = vst [vmem:[#allocation112_spill] sm:$0xff] %v6428_v33  ;;  %v6449_v55 = vadd.f32 %v6069_v2, %v2036_v28  ;;  %v6452_v24 = vadd.f32 %v6310_v46, %v2037_v18  ;;  %v6455_v33 = vadd.f32 %v6050_v45, %v2038_v3  ;;  %v2279_v60 = vmax.f32 %v2151_v39, 0.0  ;;  %v8655_v43 = vld [vmem:[#allocation83_spill] sm:$0xff]  ;;  %v8656_v3 = vld [vmem:[#allocation84_spill] sm:$0xff] }
 0x2d8   :  { %8646 = vst [vmem:[#allocation114_spill] sm:$0xff] %v6432_v61  ;;  %8648 = vst [vmem:[#allocation113_spill] sm:$0xff] %v6436_v51  ;;  %v2281_v51 = vmax.f32 %v2153_v36, 0.0  ;;  %v2283_v61 = vmax.f32 %v2155_v50, 0.0  ;;  %v2285_v8 = vmax.f32 %v2157_v31, 0.0  ;;  %v2156_v63 = vadd.f32 %v6066_v41, %v8654_v32  ;;  %v8657_v36 = vld [vmem:[#allocation86_spill] sm:$0xff] }
 0x2d9   :  { %8650 = vst [vmem:[#allocation115_spill] sm:$0xff] %v6440_v17  ;;  %8651 = vst [vmem:[#allocation116_spill] sm:$0xff] %v6446_v12  ;;  %v6458_v17 = vadd.f32 %v6066_v41, %v2039_v14  ;;  %v2280_v12 = vmax.f32 %v2152_v57, 0.0  ;;  %v2158_v28 = vadd.f32 %v6310_v46, %v8655_v43  ;;  %v6465_v18 = vadd.f32 %v6069_v2, %v2040_v34 }
 0x2da   :  { %8652 = vst [vmem:[#allocation118_spill] sm:$0xff] %v6452_v24  ;;  %v2282_v24 = vmax.f32 %v2154_v52, 0.0  ;;  %v2164_v39 = vadd.f32 %v6066_v41, %v8656_v3  ;;  %v2166_v31 = vadd.f32 %v6310_v46, %v8657_v36  ;;  %v2284_v50 = vmax.f32 %v2156_v63, 0.0 }
 0x2db   :  { %8653 = vst [vmem:[#allocation117_spill] sm:$0xff] %v6458_v17  ;;  %v2286_v14 = vmax.f32 %v2158_v28, 0.0  ;;  %v2288_v45 = vmax.f32 %v2160_v47, 0.0  ;;  %v2290_v17 = vmax.f32 %v2162_v4, 0.0  ;;  %v2407_v19 = vpack.c.bf16 %v2283_v61, %v2279_v60  ;;  %v8658_v4 = vld [vmem:[#allocation89_spill] sm:$0xff]  ;;  %v8671_v60 = vld [vmem:[#allocation167_spill] sm:$0xff] }
 0x2dc   :  { %v2409_v32 = vpack.c.bf16 %v2285_v8, %v2281_v51  ;;  %v2292_v57 = vmax.f32 %v2164_v39, 0.0  ;;  %v2294_v44 = vmax.f32 %v2166_v31, 0.0  ;;  %v6472_v43 = vadd.f32 %v6310_v46, %v2041_v1  ;;  %v8660_v8 = vld [vmem:[#allocation101_spill] sm:$0xff] }
 0x2dd   :  { %v6475_v34 = vadd.f32 %v6066_v41, %v2043_v49  ;;  %v2408_v52 = vpack.c.bf16 %v2284_v50, %v2280_v12  ;;  %v2410_v2 = vpack.c.bf16 %v2286_v14, %v2282_v24  ;;  %v6478_v3 = vadd.f32 %v6310_v46, %v2045_v20  ;;  %v8659_v49 = vld [vmem:[#allocation91_spill] sm:$0xff]  ;;  %v8661_v14 = vld [vmem:[#allocation144_spill] sm:$0xff] }
 0x2de   :  { %v6481_v63 = vadd.f32 %v6066_v41, %v2047_v25  ;;  %v6484_v47 = vadd.f32 %v6310_v46, %v2049_v29  ;;  %v2172_v61 = vadd.f32 %v6066_v41, %v8658_v4  ;;  %v2412_v1 = vpack.c.bf16 %v2292_v57, %v2288_v45  ;;  %v8662_v4 = vld [vmem:[#allocation99_spill] sm:$0xff]  ;;  %v8672_v20 = vld [vmem:[#allocation168_spill] sm:$0xff] }
 0x2df   :  { %2887 = vmatprep.mubr.bf16.mxu1 %v2408_v52  ;;  %3080 = vmatprep.mubr.bf16.mxu0 %v2410_v2  ;;  %v2414_v51 = vpack.c.bf16 %v2294_v44, %v2290_v17  ;;  %v2174_v12 = vadd.f32 %v6310_v46, %v8659_v49  ;;  %v2343_v29 = vmax.f32 %v6136_v7, 0.0  ;;  %v2345_v28 = vmax.f32 %v8660_v8, 0.0  ;;  %v8673_v25 = vld [vmem:[#allocation171_spill] sm:$0xff]  ;;  %v8674_v24 = vld [vmem:[#allocation172_spill] sm:$0xff] }
 0x2e0   :  { %2888 = vmatmul.mubr.bf16.vlgmr.msra.gmra.mxu1 %v2407_v19  ;;  %3081 = vmatmul.mubr.bf16.vlgmr.msra.gmra.mxu0 %v2409_v32  ;;  %v2347_v2 = vmax.f32 %v6146_v13, 0.0  ;;  %v2349_v45 = vmax.f32 %v6149_v40, 0.0  ;;  %v2287_v44 = vmax.f32 %v6376_v16, 0.0  ;;  %v2291_v17 = vmax.f32 %v6388_v21, 0.0 }
 0x2e1   :  { %2897 = vmatprep.mubr.bf16.mxu1 %v2412_v1  ;;  %3090 = vmatprep.mubr.bf16.mxu0 %v2414_v51  ;;  %v2289_v39 = vmax.f32 %v6382_v9, 0.0  ;;  %v2293_v36 = vmax.f32 %v6392_v38, 0.0  ;;  %v2296_v19 = vmax.f32 %v6400_v6, 0.0  ;;  %v2300_v31 = vmax.f32 %v2172_v61, 0.0  ;;  %v8678_v9 = vld [vmem:[#allocation147_spill] sm:$0xff] }
 0x2e2   :  { %v2298_v7 = vmax.f32 %v6408_v58, 0.0  ;;  %v2302_v50 = vmax.f32 %v2174_v12, 0.0  ;;  %v2351_v13 = vmax.f32 %v8661_v14, 0.0  ;;  %v2353_v40 = vmax.f32 %v6160_v59, 0.0  ;;  %v8667_v14 = vld [vmem:[#allocation160_spill] sm:$0xff]  ;;  %v8676_v59 = vld [vmem:[#allocation113_spill] sm:$0xff] }
 0x2e3   :  { %v2355_v32 = vmax.f32 %v6165_v37, 0.0  ;;  %v2357_v16 = vmax.f32 %v6171_v62, 0.0  ;;  %v2359_v21 = vmax.f32 %v6176_v35, 0.0  ;;  %v2363_v38 = vmax.f32 %v6187_v23, 0.0 }
 0x2e4   :  { %v2365_v6 = vmax.f32 %v6193_v5, 0.0  ;;  %v2411_v58 = vpack.c.bf16 %v2291_v17, %v2287_v44  ;;  %v2413_v52 = vpack.c.bf16 %v2293_v36, %v2289_v39  ;;  %v2180_v61 = vadd.f32 %v6066_v41, %v8662_v4  ;;  %v8663_v17 = vld [vmem:[#allocation154_spill] sm:$0xff]  ;;  %v8664_v39 = vld [vmem:[#allocation157_spill] sm:$0xff]  ;;  %v8665_v36 = vld [vmem:[#allocation111_spill] sm:$0xff] }
 0x2e5   :  { %v2416_v37 = vpack.c.bf16 %v2300_v31, %v2296_v19  ;;  %v2418_v1 = vpack.c.bf16 %v2302_v50, %v2298_v7  ;;  %v2182_v62 = vadd.f32 %v6310_v46, %v6285_v48  ;;  %v2371_v51 = vmax.f32 %v6209_v30, 0.0  ;;  %v8666_v7 = vld [vmem:[#allocation159_spill] sm:$0xff]  ;;  %v8675_v5 = vld [vmem:[#allocation109_spill] sm:$0xff] }
 0x2e6   :  { %v2373_v23 = vmax.f32 %v6215_v56, 0.0  ;;  %v2295_v12 = vmax.f32 %v6396_v26, 0.0  ;;  %v2299_v8 = vmax.f32 %v6412_v53, 0.0  ;;  %v2297_v44 = vmax.f32 %v6404_v27, 0.0 }
 0x2e7   :  { %v2301_v48 = vmax.f32 %v6416_v11, 0.0  ;;  %v2379_v30 = vmax.f32 %v8663_v17, 0.0  ;;  %v2381_v56 = vmax.f32 %v8664_v39, 0.0  ;;  %v2304_v19 = vmax.f32 %v8665_v36, 0.0  ;;  %v8679_v39 = vld [vmem:[#allocation112_spill] sm:$0xff] }
 0x2e8   :  { %2898 = vmatmul.mubr.bf16.gmra.mxu1 %v2411_v58  ;;  %3091 = vmatmul.mubr.bf16.gmra.mxu0 %v2413_v52  ;;  %v2308_v31 = vmax.f32 %v2180_v61, 0.0  ;;  %v2383_v50 = vmax.f32 %v8666_v7, 0.0  ;;  %v8668_v52 = vld [vmem:[#allocation114_spill] sm:$0xff]  ;;  %v2310_v26 = vmax.f32 %v2182_v62, 0.0  ;;  %v2415_v61 = vpack.c.bf16 %v2299_v8, %v2295_v12  ;;  %v8680_v12 = vld [vmem:[#allocation115_spill] sm:$0xff] }
 0x2e9   :  { %2907 = vmatprep.mubr.bf16.mxu1 %v2416_v37  ;;  %3100 = vmatprep.mubr.bf16.mxu0 %v2418_v1  ;;  %v2306_v4 = vmax.f32 %v8668_v52, 0.0  ;;  %v8669_v37 = vld [vmem:[#allocation163_spill] sm:$0xff]  ;;  %v8670_v1 = vld [vmem:[#allocation164_spill] sm:$0xff]  ;;  %v2417_v49 = vpack.c.bf16 %v2301_v48, %v2297_v44  ;;  %v2303_v58 = vmax.f32 %v8675_v5, 0.0  ;;  %v2307_v52 = vmax.f32 %v8676_v59, 0.0  ;;  %v8683_v59 = vld [vmem:[#allocation149_spill] sm:$0xff] }
 0x2ea   :  { %v2387_v53 = vmax.f32 %v8669_v37, 0.0  ;;  %v2389_v27 = vmax.f32 %v8670_v1, 0.0  ;;  %v2420_v7 = vpack.c.bf16 %v2308_v31, %v2304_v19  ;;  %v6540_v62 = vpack.c.bf16 %v2347_v2, %v2343_v29  ;;  %v8677_v1 = vld [vmem:[#allocation143_spill] sm:$0xff]  ;;  %v8681_v44 = vld [vmem:[#allocation116_spill] sm:$0xff]  ;;  %v8682_v2 = vld [vmem:[#allocation146_spill] sm:$0xff] }
 0x2eb   :  { %v2422_v37 = vpack.c.bf16 %v2310_v26, %v2306_v4  ;;  %v6542_v57 = vpack.c.bf16 %v2349_v45, %v2345_v28  ;;  %v2352_v11 = vmax.f32 %v8677_v1, 0.0  ;;  %v2356_v17 = vmax.f32 %v8678_v9, 0.0  ;;  %v8684_v19 = vld [vmem:[#allocation117_spill] sm:$0xff]  ;;  %v8685_v31 = vld [vmem:[#allocation118_spill] sm:$0xff]  ;;  %v8690_v1 = vld [vmem:[#allocation176_spill] sm:$0xff] }
 0x2ec   :  { %v2305_v36 = vmax.f32 %v8679_v39, 0.0  ;;  %v2309_v8 = vmax.f32 %v8680_v12, 0.0  ;;  %v2312_v48 = vmax.f32 %v8681_v44, 0.0  ;;  %v6549_v5 = vpack.c.bf16 %v2355_v32, %v2351_v13  ;;  %v8688_v39 = vld [vmem:[#allocation150_spill] sm:$0xff] }
 0x2ed   :  { %v6551_v29 = vpack.c.bf16 %v2356_v17, %v2352_v11  ;;  %v6553_v28 = vpack.c.bf16 %v2357_v16, %v2353_v40  ;;  %v2360_v45 = vmax.f32 %v8682_v2, 0.0  ;;  %v2364_v9 = vmax.f32 %v8683_v59, 0.0  ;;  %v8687_v16 = vld [vmem:[#allocation151_spill] sm:$0xff] }
 0x2ee   :  { %v2314_v4 = vmax.f32 %v8685_v31, 0.0  ;;  %v2318_v26 = vmax.f32 %v6472_v43, 0.0  ;;  %v6562_v13 = vpack.c.bf16 %v2363_v38, %v2359_v21  ;;  %v8686_v11 = vmax.f32 %v6182_v42, 0.0 }
 0x2ef   :  { %v6564_v32 = vpack.c.bf16 %v2364_v9, %v2360_v45  ;;  %v2368_v17 = vmax.f32 %v8687_v16, 0.0  ;;  %v2401_v12 = vmax.f32 %v8690_v1, 0.0  ;;  %v2419_v44 = vpack.c.bf16 %v2307_v52, %v2303_v58  ;;  %v8694_v45 = vld [vmem:[#allocation156_spill] sm:$0xff]  ;;  %v8698_v16 = vld [vmem:[#allocation165_spill] sm:$0xff] }
 0x2f0   :  { %2908 = vmatmul.mubr.bf16.gmra.mxu1 %v2415_v61  ;;  %3101 = vmatmul.mubr.bf16.gmra.mxu0 %v2417_v49  ;;  %v2316_v49 = vmax.f32 %v8684_v19, 0.0  ;;  %v6568_v40 = vpack.c.bf16 %v2365_v6, %v8686_v11  ;;  %v2372_v61 = vmax.f32 %v8688_v39, 0.0  ;;  %v8691_v43 = vmax.f32 %v6198_v15, 0.0  ;;  %v8693_v6 = vld [vmem:[#allocation153_spill] sm:$0xff]  ;;  %v8699_v39 = vld [vmem:[#allocation179_spill] sm:$0xff] }
 0x2f1   :  { %2917 = vmatprep.mubr.bf16.mxu1 %v2420_v7  ;;  %3110 = vmatprep.mubr.bf16.mxu0 %v2422_v37  ;;  %v8689_v7 = vld [vmem:[#allocation175_spill] sm:$0xff]  ;;  %v8692_v38 = vmax.f32 %v6204_v22, 0.0  ;;  %v2376_v2 = vmax.f32 %v8693_v6, 0.0  ;;  %v2380_v59 = vmax.f32 %v8694_v45, 0.0  ;;  %v2421_v9 = vpack.c.bf16 %v2309_v8, %v2305_v36  ;;  %v8697_v22 = vld [vmem:[#allocation161_spill] sm:$0xff] }
 0x2f2   :  { %v2399_v37 = vmax.f32 %v8689_v7, 0.0  ;;  %v6576_v35 = vpack.c.bf16 %v2371_v51, %v8691_v43  ;;  %v6578_v21 = vpack.c.bf16 %v2372_v61, %v2368_v17  ;;  %v2424_v19 = vpack.c.bf16 %v2316_v49, %v2312_v48  ;;  %v8700_v7 = vld [vmem:[#allocation180_spill] sm:$0xff]  ;;  %v8702_v48 = vld [vmem:[#allocation169_spill] sm:$0xff] }
 0x2f3   :  { %v6582_v42 = vpack.c.bf16 %v2373_v23, %v8692_v38  ;;  %v2426_v31 = vpack.c.bf16 %v2318_v26, %v2314_v4  ;;  %v8695_v11 = vmax.f32 %v6220_v0, 0.0  ;;  %v6590_v15 = vpack.c.bf16 %v2380_v59, %v2376_v2  ;;  %v8703_v4 = vld [vmem:[#allocation173_spill] sm:$0xff]  ;;  %v8710_v59 = vld [vmem:[#allocation127_spill] sm:$0xff] }
 0x2f4   :  { %v8696_v51 = vmax.f32 %v6226_v54, 0.0  ;;  %v2384_v23 = vmax.f32 %v8697_v22, 0.0  ;;  %v2388_v17 = vmax.f32 %v8698_v16, 0.0  ;;  %v2403_v61 = vmax.f32 %v8699_v39, 0.0  ;;  %v8708_v2 = vld [vmem:[#allocation177_spill] sm:$0xff] }
 0x2f5   :  { %v6588_v58 = vpack.c.bf16 %v2379_v30, %v8695_v11  ;;  %v2405_v36 = vmax.f32 %v8700_v7, 0.0  ;;  %v2320_v0 = vmax.f32 %v6475_v34, 0.0  ;;  %v6601_v30 = vpack.c.bf16 %v2387_v53, %v2383_v50  ;;  %v8709_v45 = vld [vmem:[#allocation181_spill] sm:$0xff]  ;;  %v8715_v11 = vld [vmem:[#allocation102_spill] sm:$0xff]  ;;  %v8718_v7 = vld [vmem:[#allocation107_spill] sm:$0xff] }
 0x2f6   :  { %v6594_v52 = vpack.c.bf16 %v2381_v56, %v8696_v51  ;;  %v6603_v8 = vpack.c.bf16 %v2388_v17, %v2384_v23  ;;  %v8701_v54 = vmax.f32 %v8667_v14, 0.0  ;;  %v2392_v49 = vmax.f32 %v8702_v48, 0.0  ;;  %v8717_v23 = vld [vmem:[#allocation105_spill] sm:$0xff]  ;;  %v8719_v48 = vld [vmem:[#allocation108_spill] sm:$0xff] }
 0x2f7   :  { %v2396_v26 = vmax.f32 %v8703_v4, 0.0  ;;  %v2324_v1 = vmax.f32 %v6481_v63, 0.0  ;;  %v2326_v34 = vmax.f32 %v6484_v47, 0.0  ;;  %v8704_v50 = vmax.f32 %v8671_v60, 0.0  ;;  %v8711_v47 = vld [vmem:[#allocation187_spill] sm:$0xff] }
 0x2f8   :  { %2918 = vmatmul.mubr.bf16.gmra.mxu1 %v2419_v44  ;;  %3111 = vmatmul.mubr.bf16.gmra.mxu0 %v2421_v9  ;;  %v6607_v56 = vpack.c.bf16 %v2389_v27, %v8701_v54  ;;  %v2322_v44 = vmax.f32 %v6478_v3, 0.0  ;;  %v8705_v53 = vmax.f32 %v8673_v25, 0.0  ;;  %v8706_v14 = vmax.f32 %v8672_v20, 0.0  ;;  %v8712_v60 = vld [vmem:[#allocation103_spill] sm:$0xff]  ;;  %v8716_v20 = vld [vmem:[#allocation106_spill] sm:$0xff] }
 0x2f9   :  { %2927 = vmatprep.mubr.bf16.mxu1 %v2424_v19  ;;  %3120 = vmatprep.mubr.bf16.mxu0 %v2426_v31  ;;  %v6620_v38 = vpack.c.bf16 %v2396_v26, %v2392_v49  ;;  %v8707_v27 = vmax.f32 %v8674_v24, 0.0  ;;  %v2400_v63 = vmax.f32 %v8708_v2, 0.0  ;;  %v2404_v3 = vmax.f32 %v8709_v45, 0.0  ;;  %v8713_v19 = vld [vmem:[#allocation98_spill] sm:$0xff]  ;;  %v8714_v31 = vld [vmem:[#allocation104_spill] sm:$0xff] }
 0x2fa   :  { %v6618_v43 = vpack.c.bf16 %v8705_v53, %v8704_v50  ;;  %v2057_v9 = vmul.f32 %v8711_v47, %v8710_v59  ;;  %v2191_v25 = vadd.f32 %v8713_v19, %v8712_v60  ;;  %v2193_v51 = vadd.f32 %v8715_v11, %v8714_v31  ;;  %v8726_v45 = vld [vmem:[#allocation184_spill] sm:$0xff] }
 0x2fb   :  { %v6626_v6 = vpack.c.bf16 %v8707_v27, %v8706_v14  ;;  %v6636_v22 = vpack.c.bf16 %v2403_v61, %v2399_v37  ;;  %v2195_v24 = vadd.f32 %v8713_v19, %v8716_v20  ;;  %v2197_v16 = vadd.f32 %v8715_v11, %v8717_v23  ;;  %v8724_v14 = vld [vmem:[#allocation110_spill] sm:$0xff]  ;;  %v8729_v60 = vld [vmem:[#allocation124_spill] sm:$0xff] }
 0x2fc   :  { %v6642_v17 = vpack.c.bf16 %v2404_v3, %v2400_v63  ;;  %v6644_v39 = vpack.c.bf16 %v2405_v36, %v2401_v12  ;;  %v2200_v54 = vadd.f32 %v6066_v41, %v8718_v7  ;;  %v2202_v49 = vadd.f32 %v6310_v46, %v8719_v48  ;;  %v8725_v63 = vld [vmem:[#allocation120_spill] sm:$0xff]  ;;  %v8731_v48 = vld [vmem:[#allocation130_spill] sm:$0xff] }
 0x2fd   :  { %v8720_v4 = vmax.f32 %v6443_v10, 0.0  ;;  %v8721_v37 = vmax.f32 %v6455_v33, 0.0  ;;  %v8722_v26 = vmax.f32 %v6449_v55, 0.0  ;;  %v8723_v50 = vmax.f32 %v6465_v18, 0.0  ;;  %v8727_v10 = vld [vmem:[#allocation121_spill] sm:$0xff]  ;;  %v8728_v33 = vld [vmem:[#allocation186_spill] sm:$0xff] }
 0x2fe   :  { %v2204_v12 = vadd.f32 %v6066_v41, %v8724_v14  ;;  %v2206_v36 = vadd.f32 %v6310_v46, %v2057_v9  ;;  %v2428_v27 = vpack.c.bf16 %v2324_v1, %v2320_v0  ;;  %v2430_v2 = vpack.c.bf16 %v2326_v34, %v2322_v44  ;;  %v8730_v18 = vld [vmem:[#allocation125_spill] sm:$0xff]  ;;  %v8735_v14 = vld [vmem:[#allocation135_spill] sm:$0xff] }
 0x2ff   :  { %v2423_v61 = vpack.c.bf16 %v8721_v37, %v8720_v4  ;;  %v2425_v53 = vpack.c.bf16 %v8723_v50, %v8722_v26  ;;  %v2050_v3 = vmul.f32 %v8726_v45, %v8725_v63  ;;  %v2052_v59 = vmul.f32 %v8728_v33, %v8727_v10  ;;  %v8732_v4 = vld [vmem:[#allocation185_spill] sm:$0xff]  ;;  %v8734_v50 = vld [vmem:[#allocation134_spill] sm:$0xff] }
 0x300   :  { %v2054_v55 = vmul.f32 %v8726_v45, %v8729_v60  ;;  %v2056_v31 = vmul.f32 %v8728_v33, %v8730_v18  ;;  %v2319_v20 = vmax.f32 %v2191_v25, 0.0  ;;  %v2321_v9 = vmax.f32 %v2193_v51, 0.0  ;;  %v8736_v18 = vld [vmem:[#allocation128_spill] sm:$0xff] }
 0x301   :  { %2928 = vmatmul.mubr.bf16.gmra.mxu1 %v2423_v61  ;;  %3121 = vmatmul.mubr.bf16.gmra.mxu0 %v2425_v53  ;;  %v2323_v0 = vmax.f32 %v2195_v24, 0.0  ;;  %v2325_v1 = vmax.f32 %v2197_v16, 0.0  ;;  %v2328_v44 = vmax.f32 %v2200_v54, 0.0  ;;  %v2332_v34 = vmax.f32 %v2204_v12, 0.0  ;;  %v8733_v61 = vld [vmem:[#allocation131_spill] sm:$0xff] }
 0x302   :  { %2937 = vmatprep.mubr.bf16.mxu1 %v2428_v27  ;;  %3130 = vmatprep.mubr.bf16.mxu0 %v2430_v2  ;;  %v2330_v23 = vmax.f32 %v2202_v49, 0.0  ;;  %v2334_v7 = vmax.f32 %v2206_v36, 0.0  ;;  %v2059_v37 = vmul.f32 %v8732_v4, %v8731_v48  ;;  %v2061_v26 = vmul.f32 %v8711_v47, %v8733_v61 }
 0x303   :  { %v2063_v53 = vmul.f32 %v8732_v4, %v8734_v50  ;;  %v2065_v27 = vmul.f32 %v8711_v47, %v8735_v14  ;;  %v2199_v25 = vadd.f32 %v8713_v19, %v2050_v3  ;;  %v2201_v51 = vadd.f32 %v8715_v11, %v2052_v59  ;;  %v8737_v59 = vld [vmem:[#allocation129_spill] sm:$0xff] }
 0x304   :  { %v2203_v24 = vadd.f32 %v8713_v19, %v2054_v55  ;;  %v2205_v16 = vadd.f32 %v8715_v11, %v2056_v31  ;;  %v2208_v54 = vadd.f32 %v6066_v41, %v2059_v37  ;;  %v2210_v49 = vadd.f32 %v6310_v46, %v2061_v26  ;;  %v8738_v31 = vld [vmem:[#allocation132_spill] sm:$0xff]  ;;  %v8739_v37 = vld [vmem:[#allocation133_spill] sm:$0xff] }
 0x305   :  { %v2427_v12 = vpack.c.bf16 %v2323_v0, %v2319_v20  ;;  %v2429_v36 = vpack.c.bf16 %v2325_v1, %v2321_v9  ;;  %v2212_v2 = vadd.f32 %v6066_v41, %v2063_v53  ;;  %v2214_v63 = vadd.f32 %v6310_v46, %v2065_v27  ;;  %v8740_v26 = vld [vmem:[#allocation136_spill] sm:$0xff]  ;;  %v8741_v53 = vld [vmem:[#allocation137_spill] sm:$0xff] }
 0x306   :  { %v2432_v10 = vpack.c.bf16 %v2332_v34, %v2328_v44  ;;  %v2434_v60 = vpack.c.bf16 %v2334_v7, %v2330_v23  ;;  %v2058_v3 = vmul.f32 %v8726_v45, %v8736_v18  ;;  %v2060_v55 = vmul.f32 %v8728_v33, %v8737_v59 }
 0x307   :  { %v2062_v48 = vmul.f32 %v8726_v45, %v8738_v31  ;;  %v2064_v20 = vmul.f32 %v8728_v33, %v8739_v37  ;;  %v2327_v9 = vmax.f32 %v2199_v25, 0.0  ;;  %v2329_v0 = vmax.f32 %v2201_v51, 0.0  ;;  %v8742_v45 = vld [vmem:[#allocation138_spill] sm:$0xff]  ;;  %v8743_v33 = vld [vmem:[#allocation139_spill] sm:$0xff]  ;;  %v8744_v37 = vld [vmem:[#allocation140_spill] sm:$0xff] }
 0x308   :  { %v2331_v1 = vmax.f32 %v2203_v24, 0.0  ;;  %v2333_v44 = vmax.f32 %v2205_v16, 0.0  ;;  %v2336_v34 = vmax.f32 %v2208_v54, 0.0  ;;  %v2340_v23 = vmax.f32 %v2212_v2, 0.0 }
 0x309   :  { %2938 = vmatmul.mubr.bf16.gmra.mxu1 %v2427_v12  ;;  %3131 = vmatmul.mubr.bf16.gmra.mxu0 %v2429_v36  ;;  %v2338_v7 = vmax.f32 %v2210_v49, 0.0  ;;  %v2342_v61 = vmax.f32 %v2214_v63, 0.0  ;;  %v2067_v50 = vmul.f32 %v8732_v4, %v8740_v26  ;;  %v2069_v14 = vmul.f32 %v8711_v47, %v8741_v53 }
 0x30a   :  { %2947 = vmatprep.mubr.bf16.mxu1 %v2432_v10  ;;  %3140 = vmatprep.mubr.bf16.mxu0 %v2434_v60  ;;  %v2071_v27 = vmul.f32 %v8732_v4, %v8742_v45  ;;  %v2073_v12 = vmul.f32 %v8711_v47, %v8743_v33  ;;  %v2207_v25 = vadd.f32 %v8713_v19, %v2058_v3 }
 0x30b   :  { %v2209_v51 = vadd.f32 %v8715_v11, %v2060_v55  ;;  %v2211_v24 = vadd.f32 %v8713_v19, %v2062_v48  ;;  %v2213_v16 = vadd.f32 %v8715_v11, %v2064_v20  ;;  %v2216_v54 = vadd.f32 %v6066_v41, %v2067_v50  ;;  %v8746_v50 = vld [vmem:[#allocation142_spill] sm:$0xff] }
 0x30c   :  { %v2218_v49 = vadd.f32 %v6310_v46, %v2069_v14  ;;  %v2431_v36 = vpack.c.bf16 %v2331_v1, %v2327_v9  ;;  %v2433_v2 = vpack.c.bf16 %v2333_v44, %v2329_v0  ;;  %v2220_v63 = vadd.f32 %v6066_v41, %v2071_v27  ;;  %v8745_v41 = vld [vmem:[#allocation141_spill] sm:$0xff] }
 0x30d   :  { %v2222_v4 = vadd.f32 %v6310_v46, %v2073_v12  ;;  %v2436_v10 = vpack.c.bf16 %v2340_v23, %v2336_v34  ;;  %v2438_v60 = vpack.c.bf16 %v2342_v61, %v2338_v7  ;;  %v2335_v18 = vmax.f32 %v2207_v25, 0.0  ;;  %v8747_v14 = vld [vmem:[#allocation145_spill] sm:$0xff] }
 0x30e   :  { %v2337_v19 = vmax.f32 %v2209_v51, 0.0  ;;  %v2339_v3 = vmax.f32 %v2211_v24, 0.0  ;;  %v2341_v11 = vmax.f32 %v2213_v16, 0.0  ;;  %v2344_v59 = vmax.f32 %v2216_v54, 0.0  ;;  %v8748_v24 = vld [vmem:[#allocation148_spill] sm:$0xff] }
 0x30f   :  { %v2348_v55 = vmax.f32 %v2220_v63, 0.0  ;;  %v2346_v31 = vmax.f32 %v2218_v49, 0.0  ;;  %v2350_v48 = vmax.f32 %v2222_v4, 0.0  ;;  %v2077_v20 = vmul.f32 %v8711_v47, %v8744_v37  ;;  %v8749_v54 = vld [vmem:[#allocation152_spill] sm:$0xff] }
 0x310   :  { %v2081_v9 = vmul.f32 %v8711_v47, %v8745_v41  ;;  %v2435_v0 = vpack.c.bf16 %v2339_v3, %v2335_v18  ;;  %v2437_v1 = vpack.c.bf16 %v2341_v11, %v2337_v19  ;;  %v2085_v53 = vmul.f32 %v8711_v47, %v8746_v50  ;;  %v8755_v41 = vld [vmem:[#allocation174_spill] sm:$0xff] }
 0x311   :  { %2948 = vmatmul.mubr.bf16.gmra.mxu1 %v2431_v36  ;;  %3141 = vmatmul.mubr.bf16.gmra.mxu0 %v2433_v2  ;;  %v2226_v44 = vadd.f32 %v6310_v46, %v2077_v20  ;;  %v2440_v23 = vpack.c.bf16 %v2348_v55, %v2344_v59  ;;  %v2442_v7 = vpack.c.bf16 %v2350_v48, %v2346_v31  ;;  %v8753_v59 = vld [vmem:[#allocation166_spill] sm:$0xff] }
 0x312   :  { %2957 = vmatprep.mubr.bf16.mxu1 %v2436_v10  ;;  %3150 = vmatprep.mubr.bf16.mxu0 %v2438_v60  ;;  %v2230_v34 = vadd.f32 %v6310_v46, %v2081_v9  ;;  %v2089_v45 = vmul.f32 %v8711_v47, %v8747_v14  ;;  %v2234_v27 = vadd.f32 %v6310_v46, %v2085_v53  ;;  %v8751_v10 = vld [vmem:[#allocation158_spill] sm:$0xff] }
 0x313   :  { %v2354_v61 = vmax.f32 %v2226_v44, 0.0  ;;  %v2093_v16 = vmul.f32 %v8711_v47, %v8748_v24  ;;  %v2097_v49 = vmul.f32 %v8711_v47, %v8749_v54  ;;  %v2105_v60 = vmul.f32 %v8711_v47, %v8751_v10 }
 0x314   :  { %v2358_v26 = vmax.f32 %v2230_v34, 0.0  ;;  %v2238_v33 = vadd.f32 %v6310_v46, %v2089_v45  ;;  %v2362_v25 = vmax.f32 %v2234_v27, 0.0  ;;  %v2113_v55 = vmul.f32 %v8711_v47, %v8753_v59 }
 0x315   :  { %v2242_v36 = vadd.f32 %v6310_v46, %v2093_v16  ;;  %v2246_v2 = vadd.f32 %v6310_v46, %v2097_v49  ;;  %v2254_v19 = vadd.f32 %v6310_v46, %v2105_v60  ;;  %v2121_v9 = vmul.f32 %v8711_v47, %v8755_v41 }
 0x316   :  { %v2446_v12 = vpack.c.bf16 %v2358_v26, %v2354_v61  ;;  %v2366_v51 = vmax.f32 %v2238_v33, 0.0  ;;  %v2262_v48 = vadd.f32 %v6310_v46, %v2113_v55 }
 0x318   :  { %v2450_v63 = vpack.c.bf16 %v2366_v51, %v2362_v25 }
 0x319   :  { %2958 = vmatmul.mubr.bf16.gmra.mxu1 %v2435_v0  ;;  %3151 = vmatmul.mubr.bf16.gmra.mxu0 %v2437_v1  ;;  %v2270_v1 = vadd.f32 %v6310_v46, %v2121_v9 }
 0x31a   :  { %2967 = vmatprep.mubr.bf16.mxu1 %v2440_v23  ;;  %3160 = vmatprep.mubr.bf16.mxu0 %v2442_v7  ;;  %v8757_v23 = vld [vmem:[#allocation178_spill] sm:$0xff] }
 0x31b   :  { %v2125_v7 = vmul.f32 %v8711_v47, %v8757_v23 }
 0x31d   :  { %v2274_v26 = vadd.f32 %v6310_v46, %v2125_v7 }
 0x321   :  { %2968 = vmatmul.mubr.bf16.gmra.mxu1 %v6540_v62  ;;  %3161 = vmatmul.mubr.bf16.gmra.mxu0 %v6542_v57  ;;  %v2370_v57 = vmax.f32 %v2242_v36, 0.0  ;;  %v2374_v62 = vmax.f32 %v2246_v2, 0.0 }
 0x322   :  { %2977 = vmatprep.mubr.bf16.mxu1 %v6551_v29  ;;  %3170 = vmatprep.mubr.bf16.mxu0 %v2446_v12  ;;  %v8750_v29 = vld [vmem:[#allocation155_spill] sm:$0xff] }
 0x323   :  { %v2101_v4 = vmul.f32 %v8711_v47, %v8750_v29  ;;  %v2454_v3 = vpack.c.bf16 %v2374_v62, %v2370_v57 }
 0x325   :  { %v2250_v18 = vadd.f32 %v6310_v46, %v2101_v4 }
 0x329   :  { %2978 = vmatmul.mubr.bf16.gmra.mxu1 %v6549_v5  ;;  %3171 = vmatmul.mubr.bf16.gmra.mxu0 %v6553_v28  ;;  %v2378_v5 = vmax.f32 %v2250_v18, 0.0  ;;  %v2382_v28 = vmax.f32 %v2254_v19, 0.0 }
 0x32a   :  { %2987 = vmatprep.mubr.bf16.mxu1 %v6564_v32  ;;  %3180 = vmatprep.mubr.bf16.mxu0 %v2450_v63  ;;  %v8752_v32 = vld [vmem:[#allocation162_spill] sm:$0xff] }
 0x32b   :  { %v2109_v11 = vmul.f32 %v8711_v47, %v8752_v32  ;;  %v2458_v37 = vpack.c.bf16 %v2382_v28, %v2378_v5 }
 0x32d   :  { %v2258_v31 = vadd.f32 %v6310_v46, %v2109_v11 }
 0x331   :  { %2988 = vmatmul.mubr.bf16.gmra.mxu1 %v6562_v13  ;;  %3181 = vmatmul.mubr.bf16.gmra.mxu0 %v6568_v40  ;;  %v2386_v13 = vmax.f32 %v2258_v31, 0.0  ;;  %v2390_v40 = vmax.f32 %v2262_v48, 0.0 }
 0x332   :  { %2997 = vmatprep.mubr.bf16.mxu1 %v6578_v21  ;;  %3190 = vmatprep.mubr.bf16.mxu0 %v2454_v3  ;;  %v8754_v21 = vld [vmem:[#allocation170_spill] sm:$0xff] }
 0x333   :  { %v2117_v20 = vmul.f32 %v8711_v47, %v8754_v21  ;;  %v2462_v44 = vpack.c.bf16 %v2390_v40, %v2386_v13 }
 0x335   :  { %v2266_v0 = vadd.f32 %v6310_v46, %v2117_v20 }
 0x339   :  { %2998 = vmatmul.mubr.bf16.gmra.mxu1 %v6576_v35  ;;  %3191 = vmatmul.mubr.bf16.gmra.mxu0 %v6582_v42  ;;  %v2394_v35 = vmax.f32 %v2266_v0, 0.0  ;;  %v2398_v42 = vmax.f32 %v2270_v1, 0.0 }
 0x33a   :  { %3007 = vmatprep.mubr.bf16.mxu1 %v6590_v15  ;;  %3200 = vmatprep.mubr.bf16.mxu0 %v2458_v37  ;;  %v8756_v15 = vld [vmem:[#allocation182_spill] sm:$0xff] }
 0x33b   :  { %v2129_v34 = vmul.f32 %v8711_v47, %v8756_v15  ;;  %v2466_v50 = vpack.c.bf16 %v2398_v42, %v2394_v35 }
 0x33d   :  { %v2278_v61 = vadd.f32 %v6310_v46, %v2129_v34 }
 0x341   :  { %3008 = vmatmul.mubr.bf16.gmra.mxu1 %v6588_v58  ;;  %3201 = vmatmul.mubr.bf16.gmra.mxu0 %v6594_v52  ;;  %v2402_v58 = vmax.f32 %v2274_v26, 0.0  ;;  %v2406_v52 = vmax.f32 %v2278_v61, 0.0 }
 0x342   :  { %3017 = vmatprep.mubr.bf16.mxu1 %v6603_v8  ;;  %3210 = vmatprep.mubr.bf16.mxu0 %v2462_v44 }
 0x343   :  { %v2470_v8 = vpack.c.bf16 %v2406_v52, %v2402_v58 }
 0x349   :  { %3018 = vmatmul.mubr.bf16.gmra.mxu1 %v6601_v30  ;;  %3211 = vmatmul.mubr.bf16.gmra.mxu0 %v6607_v56 }
 0x34a   :  { %3027 = vmatprep.mubr.bf16.mxu1 %v6620_v38  ;;  %3220 = vmatprep.mubr.bf16.mxu0 %v2466_v50 }
 0x351   :  { %3028 = vmatmul.mubr.bf16.gmra.mxu1 %v6618_v43  ;;  %3221 = vmatmul.mubr.bf16.gmra.mxu0 %v6626_v6 }
 0x352   :  { %3037 = vmatprep.mubr.bf16.mxu1 %v6642_v17  ;;  %3230 = vmatprep.mubr.bf16.mxu0 %v2470_v8 }
 0x359   :  { %3038 = vmatmul.mubr.bf16.gmra.mxu1 %v6636_v22  ;;  %3231 = vmatmul.mubr.bf16.gmra.mxu0 %v6644_v39 }
 0x3a0   :  { %v2889_v46 = vpop.f32.mrf.mxu1  ;;  %v3082_v30 = vpop.f32.mrf.mxu0 }
 0x3a1   :  { %v6774_v56 = vadd.f32 %v3082_v30, %v2889_v46 }
 0x3a2   :  { %v2891_v38 = vpop.f32.mrf.mxu1  ;;  %v3084_v47 = vpop.f32.mrf.mxu0 }
 0x3a3   :  { %8758 = vst [vmem:[#allocation119_spill] sm:$0xff] %v6774_v56  ;;  %v6776_v53 = vadd.f32 %v3084_v47, %v2891_v38 }
 0x3a4   :  { %v2893_v14 = vpop.f32.mrf.mxu1  ;;  %v3086_v45 = vpop.f32.mrf.mxu0 }
 0x3a5   :  { %8759 = vst [vmem:[#allocation122_spill] sm:$0xff] %v6776_v53  ;;  %v6858_v52 = vadd.f32 %v3086_v45, %v2893_v14 }
 0x3a6   :  { %v2895_v43 = vpop.f32.mrf.mxu1  ;;  %v3088_v27 = vpop.f32.mrf.mxu0 }
 0x3a7   :  { %8764 = vst [vmem:[#allocation88_spill] sm:$0xff] %v6858_v52  ;;  %v6860_v8 = vadd.f32 %v3088_v27, %v2895_v43 }
 0x3a8   :  { %v2899_v6 = vpop.f32.mrf.mxu1  ;;  %v3092_v33 = vpop.f32.mrf.mxu0 }
 0x3a9   :  { %8765 = vst [vmem:[#allocation90_spill] sm:$0xff] %v6860_v8  ;;  %v6866_v38 = vadd.f32 %v3092_v33, %v2899_v6  ;;  %v3650_v14 = vmul.f32 %v6860_v8, %v6860_v8  ;;  %v3647_v6 = vmul.f32 %v6774_v56, %v6774_v56 }
 0x3aa   :  { %v2901_v17 = vpop.f32.mrf.mxu1  ;;  %v3094_v12 = vpop.f32.mrf.mxu0 }
 0x3ab   :  { %v6868_v47 = vadd.f32 %v3094_v12, %v2901_v17  ;;  %v3651_v33 = vmul.f32 %v6866_v38, %v6866_v38  ;;  %v3648_v12 = vmul.f32 %v6776_v53, %v6776_v53 }
 0x3ac   :  { %v2903_v25 = vpop.f32.mrf.mxu1  ;;  %v3096_v22 = vpop.f32.mrf.mxu0 }
 0x3ae   :  { %v2905_v51 = vpop.f32.mrf.mxu1  ;;  %v3098_v39 = vpop.f32.mrf.mxu0 }
 0x3af   :  { %v6880_v45 = vadd.f32 %v3098_v39, %v2905_v51 }
 0x3b0   :  { %v2909_v24 = vpop.f32.mrf.mxu1  ;;  %v3102_v16 = vpop.f32.mrf.mxu0 }
 0x3b1   :  { %v6890_v17 = vadd.f32 %v3102_v16, %v2909_v24  ;;  %v3608_v24 = vadd.f32 %v6860_v8, %v6776_v53 }
 0x3b2   :  { %v2911_v54 = vpop.f32.mrf.mxu1  ;;  %v3104_v49 = vpop.f32.mrf.mxu0 }
 0x3b3   :  { %v6898_v51 = vadd.f32 %v3104_v49, %v2911_v54  ;;  %v3654_v54 = vmul.f32 %v6880_v45, %v6880_v45  ;;  %v3609_v53 = vadd.f32 %v3608_v24, %v6868_v47 }
 0x3b4   :  { %v6778_v36 = vpop.f32.mrf.mxu1  ;;  %v6780_v2 = vpop.f32.mrf.mxu0 }
 0x3b5   :  { %v3610_v24 = vadd.f32 %v3609_v53, %v6880_v45 }
 0x3b6   :  { %v6782_v63 = vpop.f32.mrf.mxu1  ;;  %v6784_v57 = vpop.f32.mrf.mxu0 }
 0x3b7   :  { %v6917_v49 = vadd.f32 %v6784_v57, %v6782_v63  ;;  %v3656_v63 = vmul.f32 %v6898_v51, %v6898_v51 }
 0x3b8   :  { %v6786_v62 = vpop.f32.mrf.mxu1  ;;  %v6788_v29 = vpop.f32.mrf.mxu0 }
 0x3ba   :  { %v6790_v4 = vpop.f32.mrf.mxu1  ;;  %v6792_v10 = vpop.f32.mrf.mxu0 }
 0x3bb   :  { %v6935_v57 = vadd.f32 %v6792_v10, %v6790_v4  ;;  %v3658_v4 = vmul.f32 %v6917_v49, %v6917_v49 }
 0x3bc   :  { %v6794_v60 = vpop.f32.mrf.mxu1  ;;  %v6796_v18 = vpop.f32.mrf.mxu0 }
 0x3be   :  { %v6798_v19 = vpop.f32.mrf.mxu1  ;;  %v6800_v3 = vpop.f32.mrf.mxu0 }
 0x3bf   :  { %v6953_v10 = vadd.f32 %v6800_v3, %v6798_v19  ;;  %v3660_v19 = vmul.f32 %v6935_v57, %v6935_v57 }
 0x3c1   :  { %v6802_v5 = vpop.f32.mrf.mxu1  ;;  %v6804_v28 = vpop.f32.mrf.mxu0 }
 0x3c3   :  { %v6806_v32 = vpop.f32.mrf.mxu1  ;;  %v6808_v11 = vpop.f32.mrf.mxu0 }
 0x3c4   :  { %v6971_v3 = vadd.f32 %v6808_v11, %v6806_v32  ;;  %v3662_v32 = vmul.f32 %v6953_v10, %v6953_v10 }
 0x3c5   :  { %v6810_v59 = vpop.f32.mrf.mxu1  ;;  %v6812_v55 = vpop.f32.mrf.mxu0 }
 0x3c7   :  { %v6814_v31 = vpop.f32.mrf.mxu1  ;;  %v6816_v48 = vpop.f32.mrf.mxu0 }
 0x3c8   :  { %v6989_v11 = vadd.f32 %v6816_v48, %v6814_v31  ;;  %v3664_v31 = vmul.f32 %v6971_v3, %v6971_v3 }
 0x3c9   :  { %v6818_v37 = vpop.f32.mrf.mxu1  ;;  %v6820_v13 = vpop.f32.mrf.mxu0 }
 0x3ca   :  { %8770 = vst [vmem:[#allocation95_spill] sm:$0xff] %v6989_v11 }
 0x3cb   :  { %v6822_v40 = vpop.f32.mrf.mxu1  ;;  %v6824_v21 = vpop.f32.mrf.mxu0 }
 0x3cc   :  { %v7007_v48 = vadd.f32 %v6824_v21, %v6822_v40  ;;  %v3666_v40 = vmul.f32 %v6989_v11, %v6989_v11 }
 0x3cd   :  { %v6826_v20 = vpop.f32.mrf.mxu1  ;;  %v6828_v41 = vpop.f32.mrf.mxu0 }
 0x3ce   :  { %8772 = vst [vmem:[#allocation100_spill] sm:$0xff] %v7007_v48 }
 0x3cf   :  { %v6830_v9 = vpop.f32.mrf.mxu1  ;;  %v6832_v0 = vpop.f32.mrf.mxu0 }
 0x3d0   :  { %v7025_v21 = vadd.f32 %v6832_v0, %v6830_v9  ;;  %v3668_v9 = vmul.f32 %v7007_v48, %v7007_v48 }
 0x3d1   :  { %v6834_v1 = vpop.f32.mrf.mxu1  ;;  %v6836_v44 = vpop.f32.mrf.mxu0 }
 0x3d2   :  { %8773 = vst [vmem:[#allocation188_spill] sm:$0xff] %v7025_v21 }
 0x3d3   :  { %v6838_v35 = vpop.f32.mrf.mxu1  ;;  %v6840_v42 = vpop.f32.mrf.mxu0 }
 0x3d4   :  { %v7043_v0 = vadd.f32 %v6840_v42, %v6838_v35  ;;  %v3670_v35 = vmul.f32 %v7025_v21, %v7025_v21 }
 0x3d5   :  { %v6842_v15 = vpop.f32.mrf.mxu1  ;;  %v6844_v34 = vpop.f32.mrf.mxu0 }
 0x3d6   :  { %8775 = vst [vmem:[#allocation84_spill] sm:$0xff] %v7043_v0 }
 0x3d7   :  { %v6846_v23 = vpop.f32.mrf.mxu1  ;;  %v6848_v7 = vpop.f32.mrf.mxu0 }
 0x3d8   :  { %8760 = vst [vmem:[#allocation123_spill] sm:$0xff] %v6848_v7 }
 0x3d9   :  { %v6850_v61 = vpop.f32.mrf.mxu1  ;;  %v6852_v26 = vpop.f32.mrf.mxu0 }
 0x3da   :  { %8761 = vst [vmem:[#allocation126_spill] sm:$0xff] %v6850_v61 }
 0x3db   :  { %v6854_v50 = vpop.f32.mrf.mxu1  ;;  %v6856_v58 = vpop.f32.mrf.mxu0 }
 0x3dc   :  { %8762 = vst [vmem:[#allocation85_spill] sm:$0xff] %v6854_v50  ;;  %8763 = vst [vmem:[#allocation87_spill] sm:$0xff] %v6856_v58  ;;  %v3649_v50 = vmul.f32 %v6858_v52, %v6858_v52  ;;  %v6876_v58 = vadd.f32 %v3096_v22, %v2903_v25  ;;  %v3571_v25 = vadd.f32 %v6858_v52, %v6774_v56 }
 0x3dd   :  { %v6862_v46 = vpop.f32.mrf.mxu1  ;;  %v6864_v30 = vpop.f32.mrf.mxu0  ;;  %v3652_v22 = vmul.f32 %v6868_v47, %v6868_v47  ;;  %v3748_v52 = vadd.f32 %v3650_v14, %v3648_v12 }
 0x3de   :  { %v3653_v16 = vmul.f32 %v6876_v58, %v6876_v58  ;;  %v3572_v56 = vadd.f32 %v3571_v25, %v6866_v38 }
 0x3df   :  { %v6870_v7 = vpop.f32.mrf.mxu1  ;;  %v6872_v61 = vpop.f32.mrf.mxu0  ;;  %v3749_v14 = vadd.f32 %v3748_v52, %v3652_v22  ;;  %v8776_v42 = vld [vmem:[#allocation123_spill] sm:$0xff] }
 0x3e0   :  { %8766 = vst [vmem:[#allocation92_spill] sm:$0xff] %v6872_v61  ;;  %v6910_v61 = vadd.f32 %v6780_v2, %v6778_v36  ;;  %v3655_v36 = vmul.f32 %v6890_v17, %v6890_v17  ;;  %v6928_v2 = vadd.f32 %v6788_v29, %v6786_v62  ;;  %v3573_v12 = vadd.f32 %v3572_v56, %v6876_v58 }
 0x3e1   :  { %v6882_v43 = vpop.f32.mrf.mxu1  ;;  %v6884_v27 = vpop.f32.mrf.mxu0  ;;  %v6946_v56 = vadd.f32 %v6796_v18, %v6794_v60  ;;  %v3750_v29 = vadd.f32 %v3749_v14, %v3654_v54  ;;  %v6964_v18 = vadd.f32 %v6804_v28, %v6802_v5  ;;  %v6982_v28 = vadd.f32 %v6812_v55, %v6810_v59 }
 0x3e2   :  { %8767 = vst [vmem:[#allocation93_spill] sm:$0xff] %v6882_v43  ;;  %8768 = vst [vmem:[#allocation94_spill] sm:$0xff] %v6884_v27  ;;  %v3711_v43 = vadd.f32 %v3649_v50, %v3647_v6  ;;  %v3657_v62 = vmul.f32 %v6910_v61, %v6910_v61  ;;  %v3574_v52 = vadd.f32 %v3573_v12, %v6890_v17 }
 0x3e3   :  { %v6900_v39 = vpop.f32.mrf.mxu1  ;;  %v6902_v27 = vpop.f32.mrf.mxu0  ;;  %v3659_v60 = vmul.f32 %v6928_v2, %v6928_v2  ;;  %v3751_v54 = vadd.f32 %v3750_v29, %v3656_v63  ;;  %v3661_v5 = vmul.f32 %v6946_v56, %v6946_v56  ;;  %8769 = vst [vmem:[#allocation96_spill] sm:$0xff] %v6982_v28  ;;  %v3663_v59 = vmul.f32 %v6964_v18, %v6964_v18 }
 0x3e4   :  { %v3712_v8 = vadd.f32 %v3711_v43, %v3651_v33  ;;  %v3575_v14 = vadd.f32 %v3574_v52, %v6910_v61  ;;  %v7000_v55 = vadd.f32 %v6820_v13, %v6818_v37  ;;  %v3665_v37 = vmul.f32 %v6982_v28, %v6982_v28 }
 0x3e5   :  { %v6919_v50 = vpop.f32.mrf.mxu1  ;;  %v6921_v6 = vpop.f32.mrf.mxu0  ;;  %v3752_v63 = vadd.f32 %v3751_v54, %v3658_v4  ;;  %v7018_v13 = vadd.f32 %v6828_v41, %v6826_v20  ;;  %v7036_v41 = vadd.f32 %v6836_v44, %v6834_v1  ;;  %v7054_v44 = vadd.f32 %v6844_v34, %v6842_v15  ;;  %v8778_v34 = vld [vmem:[#allocation126_spill] sm:$0xff] }
 0x3e6   :  { %v3713_v25 = vadd.f32 %v3712_v8, %v3653_v16  ;;  %v3611_v16 = vadd.f32 %v3610_v24, %v6898_v51  ;;  %v3576_v29 = vadd.f32 %v3575_v14, %v6928_v2  ;;  %8771 = vst [vmem:[#allocation97_spill] sm:$0xff] %v7000_v55  ;;  %v3667_v20 = vmul.f32 %v7000_v55, %v7000_v55 }
 0x3e7   :  { %v6937_v43 = vpop.f32.mrf.mxu1  ;;  %v6939_v33 = vpop.f32.mrf.mxu0  ;;  %v3753_v4 = vadd.f32 %v3752_v63, %v3660_v19  ;;  %8774 = vst [vmem:[#allocation83_spill] sm:$0xff] %v7036_v41  ;;  %v3669_v1 = vmul.f32 %v7018_v13, %v7018_v13  ;;  %v3671_v15 = vmul.f32 %v7036_v41, %v7036_v41 }
 0x3e8   :  { %v3714_v22 = vadd.f32 %v3713_v25, %v3655_v36  ;;  %v3612_v24 = vadd.f32 %v3611_v16, %v6917_v49  ;;  %v3577_v54 = vadd.f32 %v3576_v29, %v6946_v56 }
 0x3e9   :  { %v6955_v8 = vpop.f32.mrf.mxu1  ;;  %v6957_v53 = vpop.f32.mrf.mxu0  ;;  %v3754_v19 = vadd.f32 %v3753_v4, %v3662_v32 }
 0x3ea   :  { %v3715_v25 = vadd.f32 %v3714_v22, %v3657_v62  ;;  %v3613_v16 = vadd.f32 %v3612_v24, %v6935_v57  ;;  %v3578_v63 = vadd.f32 %v3577_v54, %v6964_v18 }
 0x3eb   :  { %v6973_v36 = vpop.f32.mrf.mxu1  ;;  %v6975_v12 = vpop.f32.mrf.mxu0  ;;  %v3755_v32 = vadd.f32 %v3754_v19, %v3664_v31 }
 0x3ec   :  { %v3716_v22 = vadd.f32 %v3715_v25, %v3659_v60  ;;  %v3614_v24 = vadd.f32 %v3613_v16, %v6953_v10  ;;  %v3579_v4 = vadd.f32 %v3578_v63, %v6982_v28  ;;  %v7061_v63 = vadd.f32 %v8776_v42, %v6846_v23  ;;  %v8779_v42 = vld [vmem:[#allocation85_spill] sm:$0xff] }
 0x3ed   :  { %v6991_v62 = vpop.f32.mrf.mxu1  ;;  %v6993_v52 = vpop.f32.mrf.mxu0  ;;  %v3756_v31 = vadd.f32 %v3755_v32, %v3666_v40  ;;  %v7072_v40 = vadd.f32 %v6852_v26, %v8778_v34  ;;  %v3672_v23 = vmul.f32 %v7043_v0, %v7043_v0  ;;  %v3673_v26 = vmul.f32 %v7054_v44, %v7054_v44  ;;  %v8781_v34 = vld [vmem:[#allocation92_spill] sm:$0xff] }
 0x3ee   :  { %v3717_v25 = vadd.f32 %v3716_v22, %v3661_v5  ;;  %v3615_v16 = vadd.f32 %v3614_v24, %v6971_v3  ;;  %v3580_v19 = vadd.f32 %v3579_v4, %v7000_v55  ;;  %8777 = vst [vmem:[#allocation86_spill] sm:$0xff] %v7061_v63  ;;  %v8780_v55 = vld [vmem:[#allocation87_spill] sm:$0xff] }
 0x3ef   :  { %v7009_v60 = vpop.f32.mrf.mxu1  ;;  %v7011_v14 = vpop.f32.mrf.mxu0  ;;  %v3757_v32 = vadd.f32 %v3756_v31, %v3668_v9  ;;  %v7079_v28 = vadd.f32 %v8780_v55, %v8779_v42  ;;  %v7090_v9 = vadd.f32 %v6864_v30, %v6862_v46  ;;  %v3674_v55 = vmul.f32 %v7061_v63, %v7061_v63  ;;  %v8782_v30 = vld [vmem:[#allocation93_spill] sm:$0xff] }
 0x3f0   :  { %v3718_v22 = vadd.f32 %v3717_v25, %v3663_v59  ;;  %v3616_v24 = vadd.f32 %v3615_v16, %v6989_v11  ;;  %v3581_v4 = vadd.f32 %v3580_v19, %v7018_v13  ;;  %v7097_v42 = vadd.f32 %v8781_v34, %v6870_v7 }
 0x3f1   :  { %v7027_v5 = vpop.f32.mrf.mxu1  ;;  %v7029_v29 = vpop.f32.mrf.mxu0  ;;  %v3758_v31 = vadd.f32 %v3757_v32, %v3670_v35  ;;  %v3675_v46 = vmul.f32 %v7072_v40, %v7072_v40  ;;  %v8783_v35 = vld [vmem:[#allocation94_spill] sm:$0xff]  ;;  %v3676_v7 = vmul.f32 %v7079_v28, %v7079_v28  ;;  %v7115_v34 = vadd.f32 %v6902_v27, %v6900_v39 }
 0x3f2   :  { %v3719_v25 = vadd.f32 %v3718_v22, %v3665_v37  ;;  %v3617_v11 = vadd.f32 %v3616_v24, %v7007_v48  ;;  %v3582_v19 = vadd.f32 %v3581_v4, %v7036_v41  ;;  %v7108_v32 = vadd.f32 %v8783_v35, %v8782_v30 }
 0x3f3   :  { %v7045_v59 = vpop.f32.mrf.mxu1  ;;  %v7047_v54 = vpop.f32.mrf.mxu0  ;;  %v3759_v4 = vadd.f32 %v3758_v31, %v3672_v23  ;;  %v3677_v30 = vmul.f32 %v7090_v9, %v7090_v9  ;;  %v7124_v23 = vadd.f32 %v6921_v6, %v6919_v50  ;;  %v3678_v27 = vmul.f32 %v7097_v42, %v7097_v42 }
 0x3f4   :  { %v3720_v16 = vadd.f32 %v3719_v25, %v3667_v20  ;;  %v3618_v48 = vadd.f32 %v3617_v11, %v7025_v21  ;;  %v3583_v41 = vadd.f32 %v3582_v19, %v7054_v44  ;;  %v7131_v39 = vadd.f32 %v6939_v33, %v6937_v43 }
 0x3f5   :  { %v7063_v37 = vpop.f32.mrf.mxu1  ;;  %v7065_v22 = vpop.f32.mrf.mxu0  ;;  %v3760_v31 = vadd.f32 %v3759_v4, %v3674_v55  ;;  %v7138_v50 = vadd.f32 %v6957_v53, %v6955_v8  ;;  %v3680_v55 = vmul.f32 %v7115_v34, %v7115_v34  ;;  %v7145_v43 = vadd.f32 %v6975_v12, %v6973_v36 }
 0x3f6   :  { %v3721_v24 = vadd.f32 %v3720_v16, %v3669_v1  ;;  %v3619_v21 = vadd.f32 %v3618_v48, %v7043_v0  ;;  %v3584_v19 = vadd.f32 %v3583_v41, %v7072_v40  ;;  %v7152_v8 = vadd.f32 %v6993_v52, %v6991_v62 }
 0x3f7   :  { %v7081_v20 = vpop.f32.mrf.mxu1  ;;  %v7083_v25 = vpop.f32.mrf.mxu0  ;;  %8784 = vst [vmem:[#allocation89_spill] sm:$0xff] %v7138_v50  ;;  %v3761_v6 = vadd.f32 %v3760_v31, %v3676_v7  ;;  %v3682_v31 = vmul.f32 %v7131_v39, %v7131_v39  ;;  %v7159_v36 = vadd.f32 %v7011_v14, %v7009_v60  ;;  %v7166_v62 = vadd.f32 %v7029_v29, %v7027_v5 }
 0x3f8   :  { %v3722_v16 = vadd.f32 %v3721_v24, %v3671_v15  ;;  %v3620_v0 = vadd.f32 %v3619_v21, %v7061_v63  ;;  %v3679_v63 = vmul.f32 %v7108_v32, %v7108_v32  ;;  %v3585_v41 = vadd.f32 %v3584_v19, %v7090_v9  ;;  %8785 = vst [vmem:[#allocation91_spill] sm:$0xff] %v7152_v8 }
 0x3f9   :  { %v7099_v1 = vpop.f32.mrf.mxu1  ;;  %v7101_v11 = vpop.f32.mrf.mxu0  ;;  %v3762_v53 = vadd.f32 %v3761_v6, %v3678_v27  ;;  %v3684_v6 = vmul.f32 %v7145_v43, %v7145_v43  ;;  %v7173_v60 = vadd.f32 %v7047_v54, %v7045_v59  ;;  %v7180_v5 = vadd.f32 %v7065_v22, %v7063_v37 }
 0x3fa   :  { %v3723_v24 = vadd.f32 %v3722_v16, %v3673_v26  ;;  %v3621_v35 = vadd.f32 %v3620_v0, %v7079_v28  ;;  %v3586_v7 = vadd.f32 %v3585_v41, %v7108_v32  ;;  %v7187_v59 = vadd.f32 %v7083_v25, %v7081_v20 }
 0x3fb   :  { %v7117_v15 = vpop.f32.mrf.mxu1  ;;  %v3194_v48 = vpop.f32.mrf.mxu0  ;;  %v3763_v52 = vadd.f32 %v3762_v53, %v3680_v55  ;;  %v3686_v53 = vmul.f32 %v7159_v36, %v7159_v36  ;;  %v7193_v37 = vadd.f32 %v7101_v11, %v7099_v1 }
 0x3fc   :  { %v3724_v21 = vadd.f32 %v3723_v24, %v3675_v46  ;;  %v3622_v4 = vadd.f32 %v3621_v35, %v7097_v42  ;;  %v3681_v24 = vmul.f32 %v7124_v23, %v7124_v23  ;;  %v3683_v35 = vmul.f32 %v7138_v50, %v7138_v50 }
 0x3fd   :  { %v3003_v26 = vpop.f32.mrf.mxu1  ;;  %v3196_v16 = vpop.f32.mrf.mxu0  ;;  %v3587_v27 = vadd.f32 %v3586_v7, %v7124_v23  ;;  %v3764_v29 = vadd.f32 %v3763_v52, %v3682_v31  ;;  %8786 = vst [vmem:[#allocation101_spill] sm:$0xff] %v7193_v37  ;;  %v3688_v52 = vmul.f32 %v7173_v60, %v7173_v60 }
 0x3fe   :  { %v3725_v0 = vadd.f32 %v3724_v21, %v3677_v30  ;;  %v3623_v21 = vadd.f32 %v3622_v4, %v7115_v34  ;;  %v3685_v4 = vmul.f32 %v7152_v8, %v7152_v8 }
 0x3ff   :  { %v3005_v33 = vpop.f32.mrf.mxu1  ;;  %v3198_v46 = vpop.f32.mrf.mxu0  ;;  %v3588_v55 = vadd.f32 %v3587_v27, %v7138_v50  ;;  %v3765_v31 = vadd.f32 %v3764_v29, %v3684_v6  ;;  %v7204_v50 = vadd.f32 %v3196_v16, %v3003_v26 }
 0x400   :  { %v3726_v19 = vadd.f32 %v3725_v0, %v3679_v63  ;;  %v3624_v0 = vadd.f32 %v3623_v21, %v7131_v39 }
 0x401   :  { %v3009_v12 = vpop.f32.mrf.mxu1  ;;  %v3202_v30 = vpop.f32.mrf.mxu0  ;;  %v3589_v21 = vadd.f32 %v3588_v55, %v7152_v8  ;;  %v3766_v11 = vadd.f32 %v3765_v31, %v3686_v53 }
 0x402   :  { %v3727_v41 = vadd.f32 %v3726_v19, %v3681_v24  ;;  %v3687_v19 = vmul.f32 %v7166_v62, %v7166_v62  ;;  %v3625_v22 = vadd.f32 %v3624_v0, %v7145_v43  ;;  %v3690_v0 = vmul.f32 %v7187_v59, %v7187_v59 }
 0x403   :  { %v3011_v14 = vpop.f32.mrf.mxu1  ;;  %v3204_v63 = vpop.f32.mrf.mxu0  ;;  %v3590_v6 = vadd.f32 %v3589_v21, %v7166_v62  ;;  %v3767_v26 = vadd.f32 %v3766_v11, %v3688_v52 }
 0x404   :  { %v3728_v7 = vadd.f32 %v3727_v41, %v3683_v35  ;;  %v3689_v35 = vmul.f32 %v7180_v5, %v7180_v5  ;;  %v7202_v41 = vadd.f32 %v3194_v48, %v7117_v15  ;;  %v3626_v1 = vadd.f32 %v3625_v22, %v7159_v36 }
 0x405   :  { %v3013_v54 = vpop.f32.mrf.mxu1  ;;  %v3206_v24 = vpop.f32.mrf.mxu0  ;;  %v7214_v15 = vadd.f32 %v3202_v30, %v3009_v12  ;;  %v3591_v16 = vadd.f32 %v3590_v6, %v7180_v5 }
 0x406   :  { %v3729_v27 = vadd.f32 %v3728_v7, %v3685_v4  ;;  %v3691_v4 = vmul.f32 %v7193_v37, %v7193_v37  ;;  %v7212_v7 = vadd.f32 %v3198_v46, %v3005_v33  ;;  %v3627_v48 = vadd.f32 %v3626_v1, %v7173_v60 }
 0x407   :  { %v3015_v20 = vpop.f32.mrf.mxu1  ;;  %v3208_v25 = vpop.f32.mrf.mxu0  ;;  %v3692_v21 = vmul.f32 %v7202_v41, %v7202_v41  ;;  %v3768_v46 = vadd.f32 %v3767_v26, %v3690_v0  ;;  %v7225_v12 = vadd.f32 %v3206_v24, %v3013_v54  ;;  %v3592_v1 = vadd.f32 %v3591_v16, %v7193_v37 }
 0x408   :  { %v3730_v8 = vadd.f32 %v3729_v27, %v3687_v19  ;;  %v3693_v19 = vmul.f32 %v7204_v50, %v7204_v50  ;;  %v7222_v27 = vadd.f32 %v3204_v63, %v3011_v14  ;;  %v3628_v33 = vadd.f32 %v3627_v48, %v7187_v59 }
 0x409   :  { %v3019_v29 = vpop.f32.mrf.mxu1  ;;  %v3212_v55 = vpop.f32.mrf.mxu0  ;;  %8787 = vst [vmem:[#allocation144_spill] sm:$0xff] %v7225_v12  ;;  %v7233_v14 = vadd.f32 %v3208_v25, %v3015_v20  ;;  %v3769_v24 = vadd.f32 %v3768_v46, %v3692_v21  ;;  %v3593_v48 = vadd.f32 %v3592_v1, %v7204_v50  ;;  %v3697_v16 = vmul.f32 %v7225_v12, %v7225_v12 }
 0x40a   :  { %v3731_v31 = vadd.f32 %v3730_v8, %v3689_v35  ;;  %v3694_v8 = vmul.f32 %v7212_v7, %v7212_v7  ;;  %v3695_v35 = vmul.f32 %v7214_v15, %v7214_v15  ;;  %v3629_v6 = vadd.f32 %v3628_v33, %v7202_v41 }
 0x40b   :  { %v3021_v53 = vpop.f32.mrf.mxu1  ;;  %v3214_v22 = vpop.f32.mrf.mxu0  ;;  %v7235_v63 = vadd.f32 %v3212_v55, %v3019_v29  ;;  %v3594_v21 = vadd.f32 %v3593_v48, %v7214_v15 }
 0x40c   :  { %v3732_v11 = vadd.f32 %v3731_v31, %v3691_v4  ;;  %v3696_v4 = vmul.f32 %v7222_v27, %v7222_v27  ;;  %v7242_v31 = vadd.f32 %v3214_v22, %v3021_v53  ;;  %v3630_v29 = vadd.f32 %v3629_v6, %v7212_v7 }
 0x40d   :  { %v3023_v30 = vpop.f32.mrf.mxu1  ;;  %v3216_v52 = vpop.f32.mrf.mxu0  ;;  %8788 = vst [vmem:[#allocation99_spill] sm:$0xff] %v7235_v63  ;;  %v3770_v55 = vadd.f32 %v3769_v24, %v3694_v8  ;;  %v3699_v46 = vmul.f32 %v7235_v63, %v7235_v63  ;;  %v3595_v8 = vadd.f32 %v3594_v21, %v7225_v12 }
 0x40e   :  { %v3733_v26 = vadd.f32 %v3732_v11, %v3693_v19  ;;  %8789 = vst [vmem:[#allocation154_spill] sm:$0xff] %v7242_v31  ;;  %v7244_v37 = vadd.f32 %v3216_v52, %v3023_v30  ;;  %v3698_v19 = vmul.f32 %v7233_v14, %v7233_v14  ;;  %v3631_v52 = vadd.f32 %v3630_v29, %v7222_v27 }
 0x40f   :  { %v3025_v0 = vpop.f32.mrf.mxu1  ;;  %v3218_v54 = vpop.f32.mrf.mxu0  ;;  %v3771_v11 = vadd.f32 %v3770_v55, %v3696_v4 }
 0x410   :  { %8790 = vst [vmem:[#allocation157_spill] sm:$0xff] %v7244_v37  ;;  %v3734_v33 = vadd.f32 %v3733_v26, %v3695_v35  ;;  %v7252_v1 = vadd.f32 %v3218_v54, %v3025_v0  ;;  %v3700_v35 = vmul.f32 %v7242_v31, %v7242_v31  ;;  %v3701_v24 = vmul.f32 %v7244_v37, %v7244_v37 }
 0x411   :  { %v3029_v20 = vpop.f32.mrf.mxu1  ;;  %v3222_v25 = vpop.f32.mrf.mxu0  ;;  %v3632_v26 = vadd.f32 %v3631_v52, %v7233_v14  ;;  %v3772_v4 = vadd.f32 %v3771_v11, %v3698_v19 }
 0x412   :  { %8791 = vst [vmem:[#allocation111_spill] sm:$0xff] %v7252_v1  ;;  %v7254_v53 = vadd.f32 %v3222_v25, %v3029_v20  ;;  %v3735_v6 = vadd.f32 %v3734_v33, %v3697_v16  ;;  %v3596_v20 = vadd.f32 %v3595_v8, %v7235_v63  ;;  %v3702_v16 = vmul.f32 %v7252_v1, %v7252_v1 }
 0x413   :  { %v3031_v22 = vpop.f32.mrf.mxu1  ;;  %v3224_v30 = vpop.f32.mrf.mxu0  ;;  %v3773_v52 = vadd.f32 %v3772_v4, %v3700_v35 }
 0x414   :  { %8792 = vst [vmem:[#allocation159_spill] sm:$0xff] %v7254_v53  ;;  %v7262_v48 = vadd.f32 %v3224_v30, %v3031_v22  ;;  %v3736_v29 = vadd.f32 %v3735_v6, %v3699_v46  ;;  %v3703_v55 = vmul.f32 %v7254_v53, %v7254_v53  ;;  %v3633_v22 = vadd.f32 %v3632_v26, %v7242_v31 }
 0x415   :  { %v3033_v0 = vpop.f32.mrf.mxu1  ;;  %v3226_v54 = vpop.f32.mrf.mxu0  ;;  %v3597_v30 = vadd.f32 %v3596_v20, %v7244_v37  ;;  %v3774_v26 = vadd.f32 %v3773_v52, %v3702_v16 }
 0x416   :  { %8793 = vst [vmem:[#allocation160_spill] sm:$0xff] %v7262_v48  ;;  %v7266_v25 = vadd.f32 %v3226_v54, %v3033_v0  ;;  %v3737_v8 = vadd.f32 %v3736_v29, %v3701_v24  ;;  %v3704_v19 = vmul.f32 %v7262_v48, %v7262_v48  ;;  %v3634_v0 = vadd.f32 %v3633_v22, %v7252_v1 }
 0x417   :  { %v3035_v21 = vpop.f32.mrf.mxu1  ;;  %v3228_v33 = vpop.f32.mrf.mxu0  ;;  %v3598_v54 = vadd.f32 %v3597_v30, %v7254_v53 }
 0x418   :  { %8794 = vst [vmem:[#allocation114_spill] sm:$0xff] %v7266_v25  ;;  %v7274_v12 = vadd.f32 %v3228_v33, %v3035_v21  ;;  %v3705_v46 = vmul.f32 %v7266_v25, %v7266_v25  ;;  %v3738_v20 = vadd.f32 %v3737_v8, %v3703_v55  ;;  %v3635_v29 = vadd.f32 %v3634_v0, %v7262_v48 }
 0x419   :  { %v3039_v11 = vpop.f32.mrf.mxu1  ;;  %v3232_v6 = vpop.f32.mrf.mxu0  ;;  %v3599_v21 = vadd.f32 %v3598_v54, %v7266_v25  ;;  %v3775_v22 = vadd.f32 %v3774_v26, %v3704_v19 }
 0x41a   :  { %8795 = vst [vmem:[#allocation163_spill] sm:$0xff] %v7274_v12  ;;  %v7282_v63 = vadd.f32 %v3232_v6, %v3039_v11  ;;  %v3706_v35 = vmul.f32 %v7274_v12, %v7274_v12  ;;  %v3739_v30 = vadd.f32 %v3738_v20, %v3705_v46  ;;  %v3636_v16 = vadd.f32 %v3635_v29, %v7274_v12 }
 0x41b   :  { %v3041_v24 = vpop.f32.mrf.mxu1  ;;  %v3234_v4 = vpop.f32.mrf.mxu0 }
 0x41c   :  { %8796 = vst [vmem:[#allocation164_spill] sm:$0xff] %v7282_v63  ;;  %v3707_v33 = vmul.f32 %v7282_v63, %v7282_v63  ;;  %v7290_v37 = vadd.f32 %v3234_v4, %v3041_v24  ;;  %v3600_v55 = vadd.f32 %v3599_v21, %v7282_v63  ;;  %v3776_v0 = vadd.f32 %v3775_v22, %v3706_v35 }
 0x41d   :  { %v3043_v11 = vpop.f32.mrf.mxu1  ;;  %v3236_v6 = vpop.f32.mrf.mxu0 }
 0x41e   :  { %8797 = vst [vmem:[#allocation167_spill] sm:$0xff] %v7290_v37  ;;  %v3708_v52 = vmul.f32 %v7290_v37, %v7290_v37  ;;  %v7296_v8 = vadd.f32 %v3236_v6, %v3043_v11  ;;  %v3740_v54 = vadd.f32 %v3739_v30, %v3707_v33  ;;  %v3637_v24 = vadd.f32 %v3636_v16, %v7290_v37 }
 0x41f   :  { %v3045_v25 = vpop.f32.mrf.mxu1  ;;  %v3238_v48 = vpop.f32.mrf.mxu0 }
 0x420   :  { %8798 = vst [vmem:[#allocation168_spill] sm:$0xff] %v7296_v8  ;;  %v3601_v19 = vadd.f32 %v3600_v55, %v7296_v8  ;;  %v3709_v46 = vmul.f32 %v7296_v8, %v7296_v8  ;;  %v3239_v26 = vadd.f32 %v3238_v48, %v3045_v25  ;;  %v3777_v20 = vadd.f32 %v3776_v0, %v3708_v52 }
 0x422   :  { %v3602_v4 = vrot.slane %v3601_v19, 4  ;;  %v3741_v29 = vadd.f32 %v3740_v54, %v3709_v46  ;;  %v3638_v21 = vadd.f32 %v3637_v24, %v3239_v26  ;;  %v3710_v63 = vmul.f32 %v3239_v26, %v3239_v26 }
 0x424   :  { %v3603_v12 = vadd.f32 %v3602_v4, %v3601_v19  ;;  %v3742_v11 = vrot.slane %v3741_v29, 4  ;;  %v3639_v6 = vrot.slane %v3638_v21, 4  ;;  %v3778_v35 = vadd.f32 %v3777_v20, %v3710_v63 }
 0x426   :  { %v3604_v33 = vrot.slane %v3603_v12, 2  ;;  %v3743_v22 = vadd.f32 %v3742_v11, %v3741_v29  ;;  %v3640_v30 = vadd.f32 %v3639_v6, %v3638_v21  ;;  %v3779_v53 = vrot.slane %v3778_v35, 4 }
 0x428   :  { %v3605_v16 = vadd.f32 %v3604_v33, %v3603_v12  ;;  %v3744_v37 = vrot.slane %v3743_v22, 2  ;;  %v3641_v55 = vrot.slane %v3640_v30, 2  ;;  %v3780_v1 = vadd.f32 %v3779_v53, %v3778_v35 }
 0x42a   :  { %v3606_v31 = vrot.slane %v3605_v16, 1  ;;  %v3745_v8 = vadd.f32 %v3744_v37, %v3743_v22  ;;  %v3642_v48 = vadd.f32 %v3641_v55, %v3640_v30  ;;  %v3781_v25 = vrot.slane %v3780_v1, 2 }
 0x42c   :  { %v3607_v52 = vadd.f32 %v3606_v31, %v3605_v16  ;;  %v3746_v0 = vrot.slane %v3745_v8, 1  ;;  %v3643_v54 = vrot.slane %v3642_v48, 1  ;;  %v3782_v24 = vadd.f32 %v3781_v25, %v3780_v1 }
 0x42e   :  { %v3645_v19 = vmul.f32 0.00390625, %v3607_v52  ;;  %v3747_v46 = vadd.f32 %v3746_v0, %v3745_v8  ;;  %v3644_v4 = vadd.f32 %v3643_v54, %v3642_v48  ;;  %v3783_v63 = vrot.slane %v3782_v24, 1  ;;  %v8799_v8 = vld [vmem:[#allocation183_spill] sm:$0xff]  ;;  %v3793_v48 = vld [vmem:[%s8098_s7] sm:$0x3]  ;;  %v8800_v0 = vld [vmem:[#allocation18_spill] sm:$0xff] }
 0x430   :  { %v3785_v20 = vmul.f32 0.00390625, %v3747_v46  ;;  %v3787_v29 = vmul.f32 %v3645_v19, %v3645_v19  ;;  %v3646_v21 = vmul.f32 0.00390625, %v3644_v4  ;;  %v3784_v11 = vadd.f32 %v3783_v63, %v3782_v24  ;;  %v8801_v24 = vld [vmem:[#allocation17_spill] sm:$0xff] }
 0x432   :  { %v3789_v12 = vsub.f32 %v3785_v20, %v3787_v29  ;;  %v3786_v6 = vmul.f32 0.00390625, %v3784_v11  ;;  %v3788_v33 = vmul.f32 %v3646_v21, %v3646_v21  ;;  %v8802_v29 = vld [vmem:[#allocation119_spill] sm:$0xff] }
 0x434   :  { %v3791_v53 = vmax.f32 %v3789_v12, 0.0  ;;  %v3790_v35 = vsub.f32 %v3786_v6, %v3788_v33  ;;  %v8803_v12 = vld [vmem:[#allocation122_spill] sm:$0xff]  ;;  %v8804_v33 = vld [vmem:[#allocation88_spill] sm:$0xff] }
 0x436   :  { %v3794_v37 = vadd.f32 1e-05, %v3791_v53  ;;  %v3792_v22 = vmax.f32 %v3790_v35, 0.0  ;;  %v8805_v35 = vld [vmem:[#allocation90_spill] sm:$0xff] }
 0x438   :  { %v3795_v30 = vadd.f32 1e-05, %v3792_v22  ;;  %4701 = vrsqrt.f32 %v3794_v37 }
 0x43a   :  { %4703 = vrsqrt.f32 %v3795_v30 }
 0x445   :  { %v4702_v31 = vpop.eup %4701 }
 0x447   :  { %v4704_v1 = vpop.eup %4703 }
 0x448   :  { %v3800_v16 = vcombine.low %v4702_v31, %v4704_v1 }
 0x44a   :  { %v3807_v55 = vrot.slane %v3800_v16, %v8799_v8  ;;  %v8806_v16 = vld [vmem:[#allocation96_spill] sm:$0xff] }
 0x44c   :  { %v3814_v25 = vrot.slane %v3807_v55, %v8799_v8 }
 0x44e   :  { %v3816_v52 = vmul.f32 %v3814_v25, %v3793_v48  ;;  %v8807_v48 = vld [vmem:[#allocation95_spill] sm:$0xff] }
 0x450   :  { %v7308_v54 = vrot.slane %v3816_v52, %v8800_v0  ;;  %v7311_v46 = vrot.slane %v3816_v52, %v8801_v24 }
 0x452   :  { %v3829_v4 = vmul.f32 %v7308_v54, %v3645_v19  ;;  %v3830_v63 = vmul.f32 %v7311_v46, %v3646_v21  ;;  %v3913_v20 = vmul.f32 %v7311_v46, %v3239_v26  ;;  %v7318_v11 = vmul.f32 %v7308_v54, %v8802_v29 }
 0x453   :  { %v7322_v6 = vmul.f32 %v7311_v46, %v8803_v12  ;;  %v7326_v53 = vmul.f32 %v7308_v54, %v8804_v33  ;;  %v7330_v37 = vmul.f32 %v7311_v46, %v8805_v35  ;;  %v7334_v19 = vmul.f32 %v7308_v54, %v6866_v38  ;;  %v8812_v33 = vld [vmem:[#allocation84_spill] sm:$0xff] }
 0x454   :  { %v3833_v26 = vcombine.low %v3829_v4, %v3830_v63  ;;  %v7338_v21 = vmul.f32 %v7311_v46, %v6868_v47  ;;  %v7342_v22 = vmul.f32 %v7308_v54, %v6876_v58  ;;  %v7346_v30 = vmul.f32 %v7311_v46, %v6880_v45  ;;  %v8810_v63 = vld [vmem:[#allocation188_spill] sm:$0xff] }
 0x455   :  { %v7350_v31 = vmul.f32 %v7308_v54, %v6890_v17  ;;  %v7354_v38 = vmul.f32 %v7311_v46, %v6898_v51  ;;  %v7358_v47 = vmul.f32 %v7308_v54, %v6910_v61  ;;  %v7362_v58 = vmul.f32 %v7311_v46, %v6917_v49  ;;  %v3817_v61 = vld [vmem:[%s8099_s8] sm:$0x3]  ;;  %s4846_s8 = smov [#allocation12]  }
 0x456   :  { %v3840_v1 = vrot.slane %v3833_v26, %v8799_v8  ;;  %v7367_v45 = vmul.f32 %v7308_v54, %v6928_v2  ;;  %v7371_v17 = vmul.f32 %v7311_v46, %v6935_v57  ;;  %v7375_v51 = vmul.f32 %v7308_v54, %v6946_v56  ;;  %s4255_s21 = sshll.u32 %s4846_s8, 4  ;;  %s4256_s21 = int_to_ptr.vmem [resolvable:$true] %s4255_s21 }
 0x457   :  { %v7382_v49 = vmul.f32 %v7311_v46, %v6953_v10  ;;  %v7386_v2 = vmul.f32 %v7308_v54, %v6964_v18  ;;  %v7390_v57 = vmul.f32 %v7311_v46, %v6971_v3  ;;  %v7394_v56 = vmul.f32 %v7308_v54, %v8806_v16  ;;  %v8808_v10 = vld [vmem:[#allocation97_spill] sm:$0xff]  ;;  %v8809_v18 = vld [vmem:[#allocation100_spill] sm:$0xff]  ;;  %v8813_v16 = vld [vmem:[#allocation86_spill] sm:$0xff]  ;;  %s4805_s22 = scalar_lea.vmem %s4256_s21, 8192  ;;  %p4810_p12 = scmp.lt.s32.totalorder %s4256_s21, %s4256_s21 }
 0x458   :  { %v3847_v55 = vrot.slane %v3840_v1, %v8799_v8  ;;  %v7399_v25 = vmul.f32 %v7311_v46, %v8807_v48  ;;  %v7403_v52 = vmul.f32 %v7308_v54, %v8808_v10  ;;  %v7407_v4 = vmul.f32 %v7311_v46, %v8809_v18  ;;  %v8811_v8 = vld [vmem:[#allocation83_spill] sm:$0xff]  ;;  %p4806_p11 = scmp.ne.s32.totalorder %s4256_s21, %s4805_s22  ;;  %p4811_p13 = scmp.lt.s32.totalorder %s4805_s22, %s4805_s22 }
 0x459   :  { %v7411_v3 = vmul.f32 %v7308_v54, %v7018_v13  ;;  %v7415_v29 = vmul.f32 %v7311_v46, %v8810_v63  ;;  %v7419_v12 = vmul.f32 %v7308_v54, %v8811_v8  ;;  %v7423_v35 = vmul.f32 %v7311_v46, %v8812_v33 }
 0x45a   :  { %v3849_v26 = vsub.f32 %v3817_v61, %v3847_v55  ;;  %v7427_v1 = vmul.f32 %v7308_v54, %v7054_v44  ;;  %v7431_v13 = vmul.f32 %v7311_v46, %v8813_v16  ;;  %v7435_v48 = vmul.f32 %v7308_v54, %v7072_v40  ;;  %p4812_p0 = por %p4811_p13, %p4810_p12 }
 0x45b   :  { %v7439_v10 = vmul.f32 %v7311_v46, %v7079_v28  ;;  %v7443_v18 = vmul.f32 %v7308_v54, %v7090_v9  ;;  %v7447_v44 = vmul.f32 %v7311_v46, %v7097_v42  ;;  %v7451_v61 = vmul.f32 %v7308_v54, %v7108_v32  ;;  %v8814_v32 = vld [vmem:[#allocation89_spill] sm:$0xff] }
 0x45c   :  { %v7454_v55 = vrot.slane %v3849_v26, %v8800_v0  ;;  %v7457_v40 = vrot.slane %v3849_v26, %v8801_v24  ;;  %v7461_v28 = vmul.f32 %v7311_v46, %v7115_v34  ;;  %v7465_v9 = vmul.f32 %v7308_v54, %v7124_v23  ;;  %v8815_v24 = vld [vmem:[#allocation91_spill] sm:$0xff]  ;;  %p4813_p1 = pnand %p4812_p0, %p4806_p11 }
 0x45d   :  { %v7469_v42 = vmul.f32 %v7311_v46, %v7131_v39  ;;  %v7473_v63 = vmul.f32 %v7308_v54, %v8814_v32  ;;  %v7477_v0 = vmul.f32 %v7311_v46, %v7145_v43  ;;  %v7481_v34 = vmul.f32 %v7308_v54, %v8815_v24  ;;  %v8820_v24 = vld [vmem:[#allocation144_spill] sm:$0xff] }
 0x45e   :  { %v3988_v8 = vadd.f32 %v7457_v40, %v3913_v20  ;;  %v7486_v23 = vmul.f32 %v7311_v46, %v7159_v36  ;;  %v7490_v39 = vmul.f32 %v7308_v54, %v7166_v62  ;;  %v7494_v33 = vmul.f32 %v7311_v46, %v7173_v60  ;;  %v8816_v20 = vld [vmem:[#allocation101_spill] sm:$0xff] }
 0x45f   :  { %v7498_v43 = vmul.f32 %v7308_v54, %v7180_v5  ;;  %v7502_v26 = vmul.f32 %v7311_v46, %v7187_v59  ;;  %v7506_v36 = vmul.f32 %v7308_v54, %v8816_v20  ;;  %v7510_v62 = vmul.f32 %v7311_v46, %v7202_v41  ;;  %v8825_v20 = vld [vmem:[#allocation78_spill] sm:$0xff] }
 0x460   :  { %v4052_v16 = vmax.f32 %v3988_v8, 0.0  ;;  %v7514_v60 = vmul.f32 %v7308_v54, %v7204_v50  ;;  %v7518_v5 = vmul.f32 %v7311_v46, %v7212_v7  ;;  %v7522_v59 = vmul.f32 %v7308_v54, %v7214_v15  ;;  %v8823_v8 = vld [vmem:[#allocation99_spill] sm:$0xff]  ;;  %v8826_v15 = vld [vmem:[#allocation154_spill] sm:$0xff] }
 0x461   :  { %v7526_v32 = vmul.f32 %v7311_v46, %v7222_v27  ;;  %v7530_v41 = vmul.f32 %v7308_v54, %v8820_v24  ;;  %v7534_v50 = vmul.f32 %v7311_v46, %v7233_v14  ;;  %v7538_v7 = vmul.f32 %v7308_v54, %v8823_v8  ;;  %v8827_v27 = vld [vmem:[#allocation157_spill] sm:$0xff]  ;;  %v8829_v24 = vld [vmem:[#allocation111_spill] sm:$0xff]  ;;  %v8833_v8 = vld [vmem:[#allocation160_spill] sm:$0xff] }
 0x462   :  { %8817 = vst [vmem:[#allocation171_spill] sm:$0xff] %v7518_v5  ;;  %8818 = vst [vmem:[#allocation172_spill] sm:$0xff] %v7522_v59  ;;  %v4185_v5 = vadd.f32 %v4052_v16, %v8825_v20  ;;  %v7543_v59 = vmul.f32 %v7311_v46, %v8826_v15  ;;  %v8831_v14 = vld [vmem:[#allocation159_spill] sm:$0xff]  ;;  %v8834_v16 = vld [vmem:[#allocation114_spill] sm:$0xff] }
 0x463   :  { %8819 = vst [vmem:[#allocation109_spill] sm:$0xff] %v7526_v32  ;;  %8821 = vst [vmem:[#allocation113_spill] sm:$0xff] %v7530_v41  ;;  %v7547_v32 = vmul.f32 %v7308_v54, %v8827_v27  ;;  %v7551_v41 = vmul.f32 %v7311_v46, %v8829_v24  ;;  %v7563_v20 = vmul.f32 %v7308_v54, %v8834_v16  ;;  %v8835_v15 = vld [vmem:[#allocation163_spill] sm:$0xff] }
 0x464   :  { %8822 = vst [vmem:[#allocation143_spill] sm:$0xff] %v7534_v50  ;;  %8824 = vst [vmem:[#allocation147_spill] sm:$0xff] %v7538_v7  ;;  %v7555_v50 = vmul.f32 %v7308_v54, %v8831_v14  ;;  %v7559_v7 = vmul.f32 %v7311_v46, %v8833_v8  ;;  %v7567_v27 = vmul.f32 %v7311_v46, %v8835_v15 }
 0x465   :  { %8828 = vst [vmem:[#allocation112_spill] sm:$0xff] %v7547_v32  ;;  %8830 = vst [vmem:[#allocation115_spill] sm:$0xff] %v7551_v41  ;;  %v8836_v32 = vld [vmem:[#allocation164_spill] sm:$0xff]  ;;  %v8837_v41 = vld [vmem:[#allocation167_spill] sm:$0xff]  ;;  %v7583_v16 = vadd.f32 %v7454_v55, %v7318_v11  ;;  %v7587_v15 = vadd.f32 %v7457_v40, %v7322_v6  ;;  %v7603_v11 = vadd.f32 %v7457_v40, %v7338_v21 }
 0x466   :  { %8832 = vst [vmem:[#allocation116_spill] sm:$0xff] %v7555_v50  ;;  %4249 = vst [vmem:[#allocation12 + $0x1f8] sm:$0xff] %v4185_v5  ;;  %v7571_v24 = vmul.f32 %v7308_v54, %v8836_v32  ;;  %v7575_v14 = vmul.f32 %v7311_v46, %v8837_v41  ;;  %v8838_v50 = vld [vmem:[#allocation168_spill] sm:$0xff]  ;;  %v7591_v5 = vadd.f32 %v7454_v55, %v7326_v53 }
 0x467   :  { %v7579_v8 = vmul.f32 %v7308_v54, %v8838_v50  ;;  %v7595_v46 = vadd.f32 %v7457_v40, %v7330_v37  ;;  %v7599_v54 = vadd.f32 %v7454_v55, %v7334_v19  ;;  %v7607_v6 = vadd.f32 %v7454_v55, %v7342_v22 }
 0x468   :  { %v7611_v53 = vadd.f32 %v7457_v40, %v7346_v30  ;;  %v7615_v37 = vadd.f32 %v7454_v55, %v7350_v31  ;;  %v7619_v19 = vadd.f32 %v7457_v40, %v7354_v38  ;;  %v7623_v21 = vadd.f32 %v7454_v55, %v7358_v47 }
 0x469   :  { %v7627_v22 = vadd.f32 %v7457_v40, %v7362_v58  ;;  %v7631_v30 = vadd.f32 %v7454_v55, %v7367_v45  ;;  %v7635_v31 = vadd.f32 %v7457_v40, %v7371_v17  ;;  %v7639_v38 = vadd.f32 %v7454_v55, %v7375_v51  ;;  %v8847_v32 = vld [vmem:[#allocation171_spill] sm:$0xff]  ;;  %v8849_v41 = vld [vmem:[#allocation172_spill] sm:$0xff] }
 0x46a   :  { %v7643_v47 = vadd.f32 %v7457_v40, %v7382_v49  ;;  %v7647_v58 = vadd.f32 %v7454_v55, %v7386_v2  ;;  %v7651_v45 = vadd.f32 %v7457_v40, %v7390_v57  ;;  %v7655_v17 = vadd.f32 %v7454_v55, %v7394_v56  ;;  %v8851_v50 = vld [vmem:[#allocation109_spill] sm:$0xff] }
 0x46b   :  { %v7659_v51 = vadd.f32 %v7457_v40, %v7399_v25  ;;  %v7663_v49 = vadd.f32 %v7454_v55, %v7403_v52  ;;  %v7667_v2 = vadd.f32 %v7457_v40, %v7407_v4  ;;  %v7671_v57 = vadd.f32 %v7454_v55, %v7411_v3 }
 0x46c   :  { %v7675_v56 = vadd.f32 %v7457_v40, %v7415_v29  ;;  %v7679_v25 = vadd.f32 %v7454_v55, %v7419_v12  ;;  %v7683_v52 = vadd.f32 %v7457_v40, %v7423_v35  ;;  %v7687_v4 = vadd.f32 %v7454_v55, %v7427_v1 }
 0x46d   :  { %v7691_v3 = vadd.f32 %v7457_v40, %v7431_v13  ;;  %v7695_v29 = vadd.f32 %v7454_v55, %v7435_v48  ;;  %v7699_v12 = vadd.f32 %v7457_v40, %v7439_v10  ;;  %v7703_v35 = vadd.f32 %v7454_v55, %v7443_v18 }
 0x46e   :  { %v7707_v1 = vadd.f32 %v7457_v40, %v7447_v44  ;;  %v7711_v13 = vadd.f32 %v7454_v55, %v7451_v61  ;;  %v7715_v48 = vadd.f32 %v7457_v40, %v7461_v28  ;;  %v7719_v10 = vadd.f32 %v7454_v55, %v7465_v9 }
 0x46f   :  { %v7723_v18 = vadd.f32 %v7457_v40, %v7469_v42  ;;  %v7727_v44 = vadd.f32 %v7454_v55, %v7473_v63  ;;  %v7731_v61 = vadd.f32 %v7457_v40, %v7477_v0  ;;  %v7735_v28 = vadd.f32 %v7454_v55, %v7481_v34 }
 0x470   :  { %8839 = vst [vmem:[#allocation146_spill] sm:$0xff] %v7719_v10  ;;  %v7739_v9 = vadd.f32 %v7457_v40, %v7486_v23  ;;  %v7743_v42 = vadd.f32 %v7454_v55, %v7490_v39  ;;  %v7747_v63 = vadd.f32 %v7457_v40, %v7494_v33  ;;  %v7751_v0 = vadd.f32 %v7454_v55, %v7498_v43 }
 0x471   :  { %8840 = vst [vmem:[#allocation149_spill] sm:$0xff] %v7723_v18  ;;  %8841 = vst [vmem:[#allocation117_spill] sm:$0xff] %v7731_v61  ;;  %v7755_v34 = vadd.f32 %v7457_v40, %v7502_v26  ;;  %v7759_v23 = vadd.f32 %v7454_v55, %v7506_v36  ;;  %v7763_v39 = vadd.f32 %v7457_v40, %v7510_v62 }
 0x472   :  { %8842 = vst [vmem:[#allocation118_spill] sm:$0xff] %v7735_v28  ;;  %8843 = vst [vmem:[#allocation151_spill] sm:$0xff] %v7739_v9  ;;  %v7767_v33 = vadd.f32 %v7454_v55, %v7514_v60  ;;  %v7771_v43 = vadd.f32 %v7457_v40, %v8847_v32  ;;  %v7775_v26 = vadd.f32 %v7454_v55, %v8849_v41  ;;  %v8886_v28 = vld [vmem:[#allocation26_spill] sm:$0xff] }
 0x473   :  { %8844 = vst [vmem:[#allocation150_spill] sm:$0xff] %v7759_v23  ;;  %8845 = vst [vmem:[#allocation175_spill] sm:$0xff] %v7763_v39  ;;  %v7779_v36 = vadd.f32 %v7457_v40, %v8851_v50  ;;  %v8853_v23 = vld [vmem:[#allocation113_spill] sm:$0xff]  ;;  %v8855_v39 = vld [vmem:[#allocation143_spill] sm:$0xff]  ;;  %v7795_v41 = vadd.f32 %v7457_v40, %v7543_v59  ;;  %v7815_v59 = vadd.f32 %v7454_v55, %v7563_v20  ;;  %v8887_v20 = vmax.f32 %v7599_v54, 0.0 }
 0x474   :  { %8846 = vst [vmem:[#allocation176_spill] sm:$0xff] %v7767_v33  ;;  %8848 = vst [vmem:[#allocation153_spill] sm:$0xff] %v7771_v43  ;;  %v7783_v62 = vadd.f32 %v7454_v55, %v8853_v23  ;;  %v7787_v60 = vadd.f32 %v7457_v40, %v8855_v39  ;;  %v8856_v33 = vld [vmem:[#allocation147_spill] sm:$0xff]  ;;  %v8884_v43 = vld [vmem:[#allocation21_spill] sm:$0xff]  ;;  %v8897_v54 = vmax.f32 %v7619_v19, 0.0 }
 0x475   :  { %8850 = vst [vmem:[#allocation156_spill] sm:$0xff] %v7775_v26  ;;  %8852 = vst [vmem:[#allocation161_spill] sm:$0xff] %v7779_v36  ;;  %v7791_v32 = vadd.f32 %v7454_v55, %v8856_v33  ;;  %v8858_v26 = vld [vmem:[#allocation112_spill] sm:$0xff]  ;;  %v8860_v36 = vld [vmem:[#allocation115_spill] sm:$0xff]  ;;  %v7811_v33 = vadd.f32 %v7457_v40, %v7559_v7  ;;  %v7831_v7 = vadd.f32 %v7454_v55, %v7579_v8 }
 0x476   :  { %8854 = vst [vmem:[#allocation165_spill] sm:$0xff] %v7783_v62  ;;  %v7799_v50 = vadd.f32 %v7454_v55, %v8858_v26  ;;  %v7803_v23 = vadd.f32 %v7457_v40, %v8860_v36  ;;  %v8861_v62 = vld [vmem:[#allocation116_spill] sm:$0xff]  ;;  %8864 = vst [vmem:[#allocation177_spill] sm:$0xff] %v7815_v59  ;;  %v7819_v26 = vadd.f32 %v7457_v40, %v7567_v27  ;;  %v8879_v27 = vmax.f32 %v7583_v16, 0.0 }
 0x477   :  { %8857 = vst [vmem:[#allocation179_spill] sm:$0xff] %v7791_v32  ;;  %v7807_v39 = vadd.f32 %v7454_v55, %v8861_v62  ;;  %8863 = vst [vmem:[#allocation173_spill] sm:$0xff] %v7811_v33  ;;  %v7823_v36 = vadd.f32 %v7454_v55, %v7571_v24  ;;  %v7827_v62 = vadd.f32 %v7457_v40, %v7575_v14  ;;  %v8878_v32 = vld [vmem:[#allocation22_spill] sm:$0xff]  ;;  %v8881_v24 = vmax.f32 %v7587_v15, 0.0 }
 0x478   :  { %8859 = vst [vmem:[#allocation180_spill] sm:$0xff] %v7799_v50  ;;  %8865 = vst [vmem:[#allocation181_spill] sm:$0xff] %v7819_v26  ;;  %v8876_v61 = vmov %v7819_v26  ;;  %v4122_v26 = vadd.f32 %v8879_v27, %v8878_v32  ;;  %v8880_v50 = vld [vmem:[#allocation20_spill] sm:$0xff]  ;;  %v8883_v40 = vmax.f32 %v7591_v5, 0.0  ;;  %v8885_v55 = vmax.f32 %v7595_v46, 0.0  ;;  %v8890_v27 = vld [vmem:[#allocation23_spill] sm:$0xff] }
 0x479   :  { %8862 = vst [vmem:[#allocation169_spill] sm:$0xff] %v7807_v39  ;;  %8866 = vst [vmem:[#allocation127_spill] sm:$0xff] %v7823_v36  ;;  %v4123_v36 = vadd.f32 %v8881_v24, %v8880_v50  ;;  %v8882_v39 = vld [vmem:[#allocation19_spill] sm:$0xff]  ;;  %v4126_v59 = vadd.f32 %v8887_v20, %v8886_v28  ;;  %v8889_v16 = vmax.f32 %v7603_v11, 0.0  ;;  %v8891_v15 = vmax.f32 %v7607_v6, 0.0  ;;  %v8892_v24 = vld [vmem:[#allocation25_spill] sm:$0xff] }
 0x47a   :  { %8867 = vst [vmem:[#allocation187_spill] sm:$0xff] %v7831_v7  ;;  %v8868_v33 = vld [vmem:[#allocation150_spill] sm:$0xff]  ;;  %v8869_v10 = vld [vmem:[#allocation175_spill] sm:$0xff]  ;;  %v4124_v14 = vadd.f32 %v8883_v40, %v8882_v39  ;;  %v4125_v8 = vadd.f32 %v8885_v55, %v8884_v43  ;;  %v8888_v7 = vld [vmem:[#allocation24_spill] sm:$0xff]  ;;  %v8893_v5 = vmax.f32 %v7611_v53, 0.0  ;;  %v8895_v46 = vmax.f32 %v7615_v37, 0.0 }
 0x47b   :  { %v4127_v32 = vadd.f32 %v8889_v16, %v8888_v7  ;;  %v4128_v50 = vadd.f32 %v8891_v15, %v8890_v27  ;;  %v8894_v40 = vld [vmem:[#allocation30_spill] sm:$0xff]  ;;  %v8896_v55 = vld [vmem:[#allocation28_spill] sm:$0xff]  ;;  %v8898_v20 = vld [vmem:[#allocation27_spill] sm:$0xff]  ;;  %v8899_v11 = vmax.f32 %v7623_v21, 0.0  ;;  %4186 = vst [vmem:[#allocation12] sm:$0xff] %v4122_v26  ;;  %v8901_v16 = vmax.f32 %v7627_v22, 0.0 }
 0x47c   :  { %v4129_v39 = vadd.f32 %v8893_v5, %v8892_v24  ;;  %v4130_v43 = vadd.f32 %v8895_v46, %v8894_v40  ;;  %v4131_v28 = vadd.f32 %v8897_v54, %v8896_v55  ;;  %4187 = vst [vmem:[#allocation12 + $0x8] sm:$0xff] %v4123_v36  ;;  %4188 = vst [vmem:[#allocation12 + $0x10] sm:$0xff] %v4124_v14  ;;  %v8900_v6 = vld [vmem:[#allocation29_spill] sm:$0xff]  ;;  %v8902_v27 = vld [vmem:[#allocation34_spill] sm:$0xff]  ;;  %v8903_v15 = vmax.f32 %v7631_v30, 0.0 }
 0x47d   :  { %v8873_v9 = vld [vmem:[#allocation165_spill] sm:$0xff]  ;;  %v4132_v7 = vadd.f32 %v8899_v11, %v8898_v20  ;;  %v4133_v53 = vadd.f32 %v8901_v16, %v8900_v6  ;;  %v8904_v24 = vld [vmem:[#allocation32_spill] sm:$0xff]  ;;  %v8905_v5 = vmax.f32 %v7635_v31, 0.0  ;;  %v8906_v40 = vld [vmem:[#allocation31_spill] sm:$0xff]  ;;  %v8907_v46 = vmax.f32 %v7639_v38, 0.0  ;;  %4189 = vst [vmem:[#allocation12 + $0x18] sm:$0xff] %v4125_v8 }
 0x47e   :  { %v8874_v18 = vld [vmem:[#allocation173_spill] sm:$0xff]  ;;  %v4134_v37 = vadd.f32 %v8903_v15, %v8902_v27  ;;  %4190 = vst [vmem:[#allocation12 + $0x20] sm:$0xff] %v4126_v59  ;;  %4191 = vst [vmem:[#allocation12 + $0x28] sm:$0xff] %v4127_v32  ;;  %v8909_v22 = vmax.f32 %v7643_v47, 0.0  ;;  %v8910_v14 = vld [vmem:[#allocation38_spill] sm:$0xff]  ;;  %v8911_v30 = vmax.f32 %v7647_v58, 0.0 }
 0x47f   :  { %v4135_v19 = vadd.f32 %v8905_v5, %v8904_v24  ;;  %v4136_v21 = vadd.f32 %v8907_v46, %v8906_v40  ;;  %4192 = vst [vmem:[#allocation12 + $0x30] sm:$0xff] %v4128_v50  ;;  %v8908_v26 = vld [vmem:[#allocation33_spill] sm:$0xff]  ;;  %v8912_v54 = vld [vmem:[#allocation36_spill] sm:$0xff]  ;;  %v8913_v31 = vmax.f32 %v7651_v45, 0.0  ;;  %v8914_v11 = vld [vmem:[#allocation35_spill] sm:$0xff]  ;;  %v8915_v38 = vmax.f32 %v7655_v17, 0.0 }
 0x480   :  { %v4137_v36 = vadd.f32 %v8909_v22, %v8908_v26  ;;  %v4138_v55 = vadd.f32 %v8911_v30, %v8910_v14  ;;  %4193 = vst [vmem:[#allocation12 + $0x38] sm:$0xff] %v4129_v39  ;;  %4194 = vst [vmem:[#allocation12 + $0x40] sm:$0xff] %v4130_v43  ;;  %v8916_v59 = vld [vmem:[#allocation37_spill] sm:$0xff]  ;;  %v8917_v47 = vmax.f32 %v7659_v51, 0.0  ;;  %v8918_v32 = vld [vmem:[#allocation42_spill] sm:$0xff]  ;;  %v8919_v58 = vmax.f32 %v7663_v49, 0.0 }
 0x481   :  { %v4139_v20 = vadd.f32 %v8913_v31, %v8912_v54  ;;  %v4140_v6 = vadd.f32 %v8915_v38, %v8914_v11  ;;  %4195 = vst [vmem:[#allocation12 + $0x48] sm:$0xff] %v4131_v28  ;;  %4196 = vst [vmem:[#allocation12 + $0x50] sm:$0xff] %v4132_v7  ;;  %v8920_v16 = vld [vmem:[#allocation40_spill] sm:$0xff]  ;;  %v8921_v45 = vmax.f32 %v7667_v2, 0.0  ;;  %v8922_v15 = vld [vmem:[#allocation39_spill] sm:$0xff]  ;;  %v8923_v17 = vmax.f32 %v7671_v57, 0.0 }
 0x482   :  { %v4141_v8 = vadd.f32 %v8917_v47, %v8916_v59  ;;  %v4142_v50 = vadd.f32 %v8919_v58, %v8918_v32  ;;  %4197 = vst [vmem:[#allocation12 + $0x58] sm:$0xff] %v4133_v53  ;;  %4198 = vst [vmem:[#allocation12 + $0x60] sm:$0xff] %v4134_v37  ;;  %v8924_v39 = vld [vmem:[#allocation41_spill] sm:$0xff]  ;;  %v8925_v51 = vmax.f32 %v7675_v56, 0.0  ;;  %v8926_v28 = vld [vmem:[#allocation46_spill] sm:$0xff]  ;;  %v8927_v49 = vmax.f32 %v7679_v25, 0.0 }
 0x483   :  { %v4143_v27 = vadd.f32 %v8921_v45, %v8920_v16  ;;  %v4144_v24 = vadd.f32 %v8923_v17, %v8922_v15  ;;  %4199 = vst [vmem:[#allocation12 + $0x68] sm:$0xff] %v4135_v19  ;;  %4200 = vst [vmem:[#allocation12 + $0x70] sm:$0xff] %v4136_v21  ;;  %v8928_v5 = vld [vmem:[#allocation44_spill] sm:$0xff]  ;;  %v8929_v2 = vmax.f32 %v7683_v52, 0.0  ;;  %v8930_v46 = vld [vmem:[#allocation43_spill] sm:$0xff]  ;;  %v8931_v57 = vmax.f32 %v7687_v4, 0.0 }
 0x484   :  { %v4145_v43 = vadd.f32 %v8925_v51, %v8924_v39  ;;  %v4146_v7 = vadd.f32 %v8927_v49, %v8926_v28  ;;  %4201 = vst [vmem:[#allocation12 + $0x78] sm:$0xff] %v4137_v36  ;;  %4202 = vst [vmem:[#allocation12 + $0x80] sm:$0xff] %v4138_v55  ;;  %v8932_v53 = vld [vmem:[#allocation45_spill] sm:$0xff]  ;;  %v8933_v56 = vmax.f32 %v7691_v3, 0.0  ;;  %v8934_v19 = vld [vmem:[#allocation52_spill] sm:$0xff]  ;;  %v8935_v25 = vmax.f32 %v7695_v29, 0.0 }
 0x485   :  { %v4147_v40 = vadd.f32 %v8929_v2, %v8928_v5  ;;  %v4148_v26 = vadd.f32 %v8931_v57, %v8930_v46  ;;  %4203 = vst [vmem:[#allocation12 + $0x88] sm:$0xff] %v4139_v20  ;;  %4204 = vst [vmem:[#allocation12 + $0x90] sm:$0xff] %v4140_v6  ;;  %v8936_v22 = vld [vmem:[#allocation50_spill] sm:$0xff]  ;;  %v8937_v52 = vmax.f32 %v7699_v12, 0.0  ;;  %v8938_v30 = vld [vmem:[#allocation49_spill] sm:$0xff]  ;;  %v8939_v4 = vmax.f32 %v7703_v35, 0.0 }
 0x486   :  { %v4149_v37 = vadd.f32 %v8933_v56, %v8932_v53  ;;  %v4150_v21 = vadd.f32 %v8935_v25, %v8934_v19  ;;  %4205 = vst [vmem:[#allocation12 + $0x98] sm:$0xff] %v4141_v8  ;;  %4206 = vst [vmem:[#allocation12 + $0xa0] sm:$0xff] %v4142_v50  ;;  %v8940_v36 = vld [vmem:[#allocation51_spill] sm:$0xff]  ;;  %v8941_v3 = vmax.f32 %v7707_v1, 0.0  ;;  %v8943_v29 = vmax.f32 %v7711_v13, 0.0  ;;  %v8946_v6 = vld [vmem:[#allocation56_spill] sm:$0xff] }
 0x487   :  { %v4151_v14 = vadd.f32 %v8937_v52, %v8936_v22  ;;  %v4152_v54 = vadd.f32 %v8939_v4, %v8938_v30  ;;  %4207 = vst [vmem:[#allocation12 + $0xa8] sm:$0xff] %v4143_v27  ;;  %4208 = vst [vmem:[#allocation12 + $0xb0] sm:$0xff] %v4144_v24  ;;  %v8942_v31 = vld [vmem:[#allocation55_spill] sm:$0xff]  ;;  %v8945_v12 = vmax.f32 %v7715_v48, 0.0  ;;  %v8947_v59 = vld [vmem:[#allocation146_spill] sm:$0xff]  ;;  %v8953_v13 = vmax.f32 %v7727_v44, 0.0 }
 0x488   :  { %v4153_v55 = vadd.f32 %v8941_v3, %v8940_v36  ;;  %v4154_v20 = vadd.f32 %v8943_v29, %v8942_v31  ;;  %v8944_v11 = vld [vmem:[#allocation47_spill] sm:$0xff]  ;;  %v8948_v35 = vmax.f32 %v8947_v59, 0.0  ;;  %4209 = vst [vmem:[#allocation12 + $0xb8] sm:$0xff] %v4145_v43  ;;  %4210 = vst [vmem:[#allocation12 + $0xc0] sm:$0xff] %v4146_v7  ;;  %v8949_v8 = vld [vmem:[#allocation48_spill] sm:$0xff]  ;;  %v8964_v44 = vmax.f32 %v7743_v42, 0.0 }
 0x489   :  { %v4155_v38 = vadd.f32 %v8945_v12, %v8944_v11  ;;  %4211 = vst [vmem:[#allocation12 + $0xc8] sm:$0xff] %v4147_v40  ;;  %4212 = vst [vmem:[#allocation12 + $0xd0] sm:$0xff] %v4148_v26  ;;  %v8950_v32 = vld [vmem:[#allocation149_spill] sm:$0xff]  ;;  %v8952_v50 = vld [vmem:[#allocation59_spill] sm:$0xff]  ;;  %v8966_v46 = vmax.f32 %v7747_v63, 0.0  ;;  %v8968_v53 = vmax.f32 %v7751_v0, 0.0 }
 0x48a   :  { %v4156_v47 = vadd.f32 %v8948_v35, %v8946_v6  ;;  %v8951_v1 = vmax.f32 %v8950_v32, 0.0  ;;  %v4158_v16 = vadd.f32 %v8953_v13, %v8952_v50  ;;  %v8954_v45 = vld [vmem:[#allocation53_spill] sm:$0xff]  ;;  %v8957_v17 = vld [vmem:[#allocation60_spill] sm:$0xff]  ;;  %v8958_v24 = vld [vmem:[#allocation118_spill] sm:$0xff]  ;;  %4213 = vst [vmem:[#allocation12 + $0xd8] sm:$0xff] %v4149_v37  ;;  %v8970_v19 = vmax.f32 %v7755_v34, 0.0 }
 0x48b   :  { %v8955_v27 = vld [vmem:[#allocation117_spill] sm:$0xff]  ;;  %v8959_v39 = vmax.f32 %v8958_v24, 0.0  ;;  %4214 = vst [vmem:[#allocation12 + $0xe0] sm:$0xff] %v4150_v21  ;;  %4215 = vst [vmem:[#allocation12 + $0xe8] sm:$0xff] %v4151_v14  ;;  %v8960_v43 = vld [vmem:[#allocation54_spill] sm:$0xff]  ;;  %v8972_v42 = vmax.f32 %v8868_v33, 0.0 }
 0x48c   :  { %v4157_v58 = vadd.f32 %v8951_v1, %v8949_v8  ;;  %v8956_v48 = vmax.f32 %v8955_v27, 0.0  ;;  %4216 = vst [vmem:[#allocation12 + $0xf0] sm:$0xff] %v4152_v54  ;;  %v8961_v28 = vld [vmem:[#allocation151_spill] sm:$0xff]  ;;  %v8965_v40 = vld [vmem:[#allocation57_spill] sm:$0xff]  ;;  %v8967_v26 = vld [vmem:[#allocation64_spill] sm:$0xff]  ;;  %v8974_v63 = vmax.f32 %v8869_v10, 0.0 }
 0x48d   :  { %v4160_v51 = vadd.f32 %v8959_v39, %v8957_v17  ;;  %v8962_v49 = vmax.f32 %v8961_v28, 0.0  ;;  %v8963_v5 = vld [vmem:[#allocation63_spill] sm:$0xff]  ;;  %v4163_v57 = vadd.f32 %v8966_v46, %v8965_v40  ;;  %v4164_v56 = vadd.f32 %v8968_v53, %v8967_v26  ;;  %4217 = vst [vmem:[#allocation12 + $0xf8] sm:$0xff] %v4153_v55  ;;  %4218 = vst [vmem:[#allocation12 + $0x100] sm:$0xff] %v4154_v20  ;;  %v8969_v37 = vld [vmem:[#allocation58_spill] sm:$0xff] }
 0x48e   :  { %v4159_v15 = vadd.f32 %v8956_v48, %v8954_v45  ;;  %v4162_v2 = vadd.f32 %v8964_v44, %v8963_v5  ;;  %4219 = vst [vmem:[#allocation12 + $0x108] sm:$0xff] %v4155_v38  ;;  %4220 = vst [vmem:[#allocation12 + $0x110] sm:$0xff] %v4156_v47  ;;  %v4165_v25 = vadd.f32 %v8970_v19, %v8969_v37  ;;  %v8971_v21 = vld [vmem:[#allocation67_spill] sm:$0xff]  ;;  %v8973_v52 = vld [vmem:[#allocation61_spill] sm:$0xff]  ;;  %v8988_v59 = vmax.f32 %v8873_v9, 0.0 }
 0x48f   :  { %v4161_v7 = vadd.f32 %v8962_v49, %v8960_v43  ;;  %v4166_v22 = vadd.f32 %v8972_v42, %v8971_v21  ;;  %v4167_v14 = vadd.f32 %v8974_v63, %v8973_v52  ;;  %v8975_v30 = vld [vmem:[#allocation68_spill] sm:$0xff]  ;;  %4221 = vst [vmem:[#allocation12 + $0x118] sm:$0xff] %v4157_v58  ;;  %4222 = vst [vmem:[#allocation12 + $0x120] sm:$0xff] %v4158_v16  ;;  %v8978_v36 = vld [vmem:[#allocation62_spill] sm:$0xff]  ;;  %v8990_v8 = vmax.f32 %v7787_v60, 0.0 }
 0x490   :  { %v8976_v4 = vld [vmem:[#allocation176_spill] sm:$0xff]  ;;  %4223 = vst [vmem:[#allocation12 + $0x128] sm:$0xff] %v4159_v15  ;;  %4224 = vst [vmem:[#allocation12 + $0x130] sm:$0xff] %v4160_v51  ;;  %v8979_v3 = vld [vmem:[#allocation153_spill] sm:$0xff]  ;;  %v8995_v45 = vmax.f32 %v7795_v41, 0.0  ;;  %v9000_v60 = vmax.f32 %v7803_v23, 0.0 }
 0x491   :  { %v8977_v0 = vmax.f32 %v8976_v4, 0.0  ;;  %v8980_v34 = vmax.f32 %v8979_v3, 0.0  ;;  %v8981_v31 = vld [vmem:[#allocation71_spill] sm:$0xff]  ;;  %v8982_v29 = vld [vmem:[#allocation156_spill] sm:$0xff]  ;;  %v8984_v11 = vld [vmem:[#allocation65_spill] sm:$0xff]  ;;  %4225 = vst [vmem:[#allocation12 + $0x138] sm:$0xff] %v4161_v7 }
 0x492   :  { %v8983_v33 = vmax.f32 %v8982_v29, 0.0  ;;  %v8985_v12 = vld [vmem:[#allocation161_spill] sm:$0xff]  ;;  %v8987_v6 = vld [vmem:[#allocation72_spill] sm:$0xff]  ;;  %4226 = vst [vmem:[#allocation12 + $0x140] sm:$0xff] %v4162_v2  ;;  %4227 = vst [vmem:[#allocation12 + $0x148] sm:$0xff] %v4163_v57  ;;  %v9005_v41 = vmax.f32 %v8874_v18, 0.0 }
 0x493   :  { %v4168_v54 = vadd.f32 %v8977_v0, %v8975_v30  ;;  %v4169_v55 = vadd.f32 %v8980_v34, %v8978_v36  ;;  %v8986_v10 = vmax.f32 %v8985_v12, 0.0  ;;  %v4172_v35 = vadd.f32 %v8988_v59, %v8987_v6  ;;  %4228 = vst [vmem:[#allocation12 + $0x150] sm:$0xff] %v4164_v56  ;;  %v8989_v47 = vld [vmem:[#allocation66_spill] sm:$0xff]  ;;  %v8991_v1 = vld [vmem:[#allocation75_spill] sm:$0xff]  ;;  %v8994_v16 = vld [vmem:[#allocation69_spill] sm:$0xff] }
 0x494   :  { %v4170_v20 = vadd.f32 %v8983_v33, %v8981_v31  ;;  %v4173_v32 = vadd.f32 %v8990_v8, %v8989_v47  ;;  %v8992_v58 = vld [vmem:[#allocation179_spill] sm:$0xff]  ;;  %v4175_v27 = vadd.f32 %v8995_v45, %v8994_v16  ;;  %v8996_v9 = vld [vmem:[#allocation76_spill] sm:$0xff]  ;;  %4229 = vst [vmem:[#allocation12 + $0x158] sm:$0xff] %v4165_v25  ;;  %4230 = vst [vmem:[#allocation12 + $0x160] sm:$0xff] %v4166_v22  ;;  %v9010_v23 = vmax.f32 %v8876_v61, 0.0 }
 0x495   :  { %v4171_v38 = vadd.f32 %v8986_v10, %v8984_v11  ;;  %v8993_v50 = vmax.f32 %v8992_v58, 0.0  ;;  %v8997_v48 = vld [vmem:[#allocation180_spill] sm:$0xff]  ;;  %4231 = vst [vmem:[#allocation12 + $0x168] sm:$0xff] %v4167_v14  ;;  %4232 = vst [vmem:[#allocation12 + $0x170] sm:$0xff] %v4168_v54  ;;  %v8999_v24 = vld [vmem:[#allocation70_spill] sm:$0xff]  ;;  %v9015_v18 = vmax.f32 %v7827_v62, 0.0 }
 0x496   :  { %v8998_v15 = vmax.f32 %v8997_v48, 0.0  ;;  %v4177_v39 = vadd.f32 %v9000_v60, %v8999_v24  ;;  %v9001_v51 = vld [vmem:[#allocation79_spill] sm:$0xff]  ;;  %v9002_v43 = vld [vmem:[#allocation169_spill] sm:$0xff]  ;;  %v9006_v44 = vld [vmem:[#allocation80_spill] sm:$0xff]  ;;  %4233 = vst [vmem:[#allocation12 + $0x178] sm:$0xff] %v4169_v55 }
 0x497   :  { %v4174_v13 = vadd.f32 %v8993_v50, %v8991_v1  ;;  %v9003_v28 = vmax.f32 %v9002_v43, 0.0  ;;  %v9004_v7 = vld [vmem:[#allocation73_spill] sm:$0xff]  ;;  %4234 = vst [vmem:[#allocation12 + $0x180] sm:$0xff] %v4170_v20  ;;  %4235 = vst [vmem:[#allocation12 + $0x188] sm:$0xff] %v4171_v38  ;;  %v9009_v57 = vld [vmem:[#allocation74_spill] sm:$0xff] }
 0x498   :  { %v4176_v17 = vadd.f32 %v8998_v15, %v8996_v9  ;;  %v4179_v5 = vadd.f32 %v9005_v41, %v9004_v7  ;;  %v9007_v2 = vld [vmem:[#allocation177_spill] sm:$0xff]  ;;  %4236 = vst [vmem:[#allocation12 + $0x190] sm:$0xff] %v4172_v35  ;;  %v4181_v26 = vadd.f32 %v9010_v23, %v9009_v57  ;;  %v9012_v56 = vld [vmem:[#allocation127_spill] sm:$0xff]  ;;  %v9016_v42 = vld [vmem:[#allocation82_spill] sm:$0xff] }
 0x499   :  { %v4178_v49 = vadd.f32 %v9003_v28, %v9001_v51  ;;  %v9008_v40 = vmax.f32 %v9007_v2, 0.0  ;;  %v9011_v53 = vld [vmem:[#allocation81_spill] sm:$0xff]  ;;  %v9013_v37 = vmax.f32 %v9012_v56, 0.0  ;;  %v9017_v22 = vld [vmem:[#allocation187_spill] sm:$0xff]  ;;  %4237 = vst [vmem:[#allocation12 + $0x198] sm:$0xff] %v4173_v32  ;;  %4238 = vst [vmem:[#allocation12 + $0x1a0] sm:$0xff] %v4174_v13 }
 0x49a   :  { %v9014_v25 = vld [vmem:[#allocation77_spill] sm:$0xff]  ;;  %v9018_v52 = vmax.f32 %v9017_v22, 0.0  ;;  %4239 = vst [vmem:[#allocation12 + $0x1a8] sm:$0xff] %v4175_v27  ;;  %4240 = vst [vmem:[#allocation12 + $0x1b0] sm:$0xff] %v4176_v17 }
 0x49b   :  { %v4180_v46 = vadd.f32 %v9008_v40, %v9006_v44  ;;  %v4182_v19 = vadd.f32 %v9013_v37, %v9011_v53  ;;  %v4183_v21 = vadd.f32 %v9015_v18, %v9014_v25  ;;  %4241 = vst [vmem:[#allocation12 + $0x1b8] sm:$0xff] %v4177_v39  ;;  %4242 = vst [vmem:[#allocation12 + $0x1c0] sm:$0xff] %v4178_v49 }
 0x49c   :  { %v4184_v63 = vadd.f32 %v9018_v52, %v9016_v42  ;;  %4243 = vst [vmem:[#allocation12 + $0x1c8] sm:$0xff] %v4179_v5  ;;  %4245 = vst [vmem:[#allocation12 + $0x1d8] sm:$0xff] %v4181_v26 }
 0x49d   :  { %4244 = vst [vmem:[#allocation12 + $0x1d0] sm:$0xff] %v4180_v46  ;;  %4246 = vst [vmem:[#allocation12 + $0x1e0] sm:$0xff] %v4182_v19 }
 0x49e   :  { %4247 = vst [vmem:[#allocation12 + $0x1e8] sm:$0xff] %v4183_v21  ;;  %4248 = vst [vmem:[#allocation12 + $0x1f0] sm:$0xff] %v4184_v63 }
 0x49f   :  { %4816 = shalt.err (!%p4813_p1)
}
 0x4a0   :  { %4261 = dma.vmem_to_hbm [thread:$0]  %s4256_s21, 8192, %s8100_s9, [#allocation5], %s4837_s19, %s4837_s19, %s4838_s20  }
 0x4a1   :  { %4831 = dma.done.wait [#allocation5], 8192  }
 0x4a2   :  { %4832 = vsyncadd [#allocation5], 4294959104 }
 0x4a3   :  { %4265 = vsyncpa [#allocation4], 1 }
 0x4a4   :  { %4266 = vsyncpa [#allocation7], 1 }
 0x4a5   :  { %4267 = vsyncpa [#allocation10], 1 }
 0x4a6   :  { %4268 = vsyncpa [#allocation5], 1 }

</bundles_post_ra>
